<compile_context>
chip_gen: v6e
topology: v6e:2x2x1
jax: 0.10.0
libtpu: 0.0.40
codegen_flags: <defaults>
</compile_context>

<pallas_src>
import functools

import jax
import jax.numpy as jnp
from jax.experimental import pallas as pl
from jax.experimental.pallas import tpu as pltpu


def _mish(z):
    """mish(z) = z * tanh(softplus(z)) using a single exp per element.

    tanh(softplus(z)) = (e^{2z} + 2 e^z) / (e^{2z} + 2 e^z + 2).  Evaluated
    with u = exp(-|z|) so it is stable for both signs and costs one EUP exp
    plus a few VPU ops (instead of exp + log1p + tanh = 3 EUP ops).
    """
    u = jnp.exp(-jnp.abs(z))
    pos_n = 1.0 + 2.0 * u                 # z >= 0 : numerator / e^{2z}
    pos_d = pos_n + 2.0 * u * u
    neg_n = u * u + 2.0 * u               # z <  0 : e^z == u
    neg_d = neg_n + 2.0
    n = jnp.where(z >= 0, pos_n, neg_n)
    d = jnp.where(z >= 0, pos_d, neg_d)
    return z * (n / d)


def _self_attn_kernel(beta_ref, xq_ref, xk_ref, w_ref, out_ref,
                      qq_ref, qqb_ref, acc_ref, m_ref, l_ref):
    # beta_ref : (1,) SMEM scalar
    # xq_ref   : (C, TQ) VMEM   query-tile slab of x   (batch dim squeezed)
    # xk_ref   : (C, TK) VMEM   key-tile slab of x
    # w_ref    : (D, C)  VMEM   conv1d weight (k=1 axis squeezed)
    # out_ref  : (D, TQ) VMEM   output tile (revisited across the key axis)
    # scratch  : qq (D,TQ) f32, qq bf16 copy, acc (TQ,D) f32, m/l (TQ,1) f32
    kj = pl.program_id(2)

    w = w_ref[...]                                             # (D, C) f32

    @pl.when(kj == 0)
    def _init():
        # q for this query tile: Mish(W @ x_q) -> (D, TQ).  Computed once per
        # query tile, reused for every key tile and for the residual add.
        qq = _mish(jnp.dot(w, xq_ref[...],
                           preferred_element_type=jnp.float32))
        qq_ref[...] = qq
        qqb_ref[...] = qq.astype(jnp.bfloat16)
        m_ref[...] = jnp.full_like(m_ref, -jnp.inf)
        l_ref[...] = jnp.zeros_like(l_ref)
        acc_ref[...] = jnp.zeros_like(acc_ref)

    # q for the current key tile (D*TK elements; cheap to recompute per step).
    qk = _mish(jnp.dot(w, xk_ref[...], preferred_element_type=jnp.float32))
    qk_bf = qk.astype(jnp.bfloat16)                            # (D, TK)

    # scores s[i, j] = sum_d q[d, i] * q[d, j]  ->  (TQ, TK)
    # bf16 MXU operands, f32 accumulation; contraction over D keeps both
    # operands in their natural (D, tile) layout (no large transposes).
    s = jax.lax.dot_general(qqb_ref[...], qk_bf,
                            (((0,), (0,)), ((), ())),
                            preferred_element_type=jnp.float32)

    # Online softmax over the key axis.
    m_prev = m_ref[...]                                        # (TQ, 1)
    m_new = jnp.maximum(m_prev, jnp.max(s, axis=-1, keepdims=True))
    alpha = jnp.exp(m_prev - m_new)                            # (TQ, 1)
    p = jnp.exp(s - m_new)                                     # (TQ, TK) f32

    l_ref[...] = alpha * l_ref[...] + jnp.sum(p, axis=-1, keepdims=True)
    # acc[i, d] += sum_j p[i, j] * qk[d, j] : contract over the key axis with
    # the big (TQ, TK) tile as the lhs, so it is never transposed.
    acc_ref[...] = alpha * acc_ref[...] + jax.lax.dot_general(
        p.astype(jnp.bfloat16), qk_bf,
        (((1,), (1,)), ((), ())), preferred_element_type=jnp.float32)
    m_ref[...] = m_new

    @pl.when(kj == pl.num_programs(2) - 1)
    def _finalize():
        inv_l = pl.reciprocal(l_ref[...], approx=True)         # (TQ, 1)
        out_x_t = acc_ref[...] * inv_l                         # (TQ, D)
        beta = beta_ref[0]                                     # read once
        # Single (TQ, D) -> (D, TQ) layout change per query tile, then the
        # residual add; stored lane-dense as a (D, TQ) output block.
        out_ref[...] = (beta * jnp.transpose(out_x_t)
                        + qq_ref[...]).astype(out_ref.dtype)


@functools.partial(jax.jit, static_argnames=("tq", "tk"))
def self_attn_forward(x, w, beta, *, tq=256, tk=256):
    """x: (B, C, N) f32, w: (D, C) f32 (k=1 conv weight), beta: (1,) f32."""
    B, C, N = x.shape
    D = w.shape[0]
    tq = min(tq, N)
    tk = min(tk, N)
    assert N % tq == 0 and N % tk == 0, "N must be divisible by the tile sizes"
    assert tq == N or tq % 128 == 0, "query tile must be N or a multiple of 128"
    assert tk == N or tk % 128 == 0, "key tile must be N or a multiple of 128"
    nq, nk = N // tq, N // tk

    return pl.pallas_call(
        _self_attn_kernel,
        out_shape=jax.ShapeDtypeStruct((B, D, N), x.dtype),
        grid=(B, nq, nk),
        in_specs=[
            pl.BlockSpec(memory_space=pltpu.MemorySpace.SMEM),          # beta
            pl.BlockSpec((None, C, tq), lambda b, qi, kj: (b, 0, qi)),  # x (query)
            pl.BlockSpec((None, C, tk), lambda b, qi, kj: (b, 0, kj)),  # x (key)
            pl.BlockSpec((D, C), lambda b, qi, kj: (0, 0)),             # weight
        ],
        out_specs=pl.BlockSpec((None, D, tq), lambda b, qi, kj: (b, 0, qi)),
        scratch_shapes=[
            pltpu.VMEM((D, tq), jnp.float32),     # q of the query tile (f32, residual)
            pltpu.VMEM((D, tq), jnp.bfloat16),    # bf16 copy for the MXU
            pltpu.VMEM((tq, D), jnp.float32),     # output accumulator
            pltpu.VMEM((tq, 1), jnp.float32),     # running max
            pltpu.VMEM((tq, 1), jnp.float32),     # running sum
        ],
        compiler_params=pltpu.CompilerParams(
            dimension_semantics=("parallel", "parallel", "arbitrary"),
        ),
    )(beta, x, x, w)


def _reference_f32(x, w, beta):
    # Pure-JAX, full-f32 reference of the PyTorch forward.
    hp = jax.lax.Precision.HIGHEST
    q = jnp.einsum("dc,bcn->bdn", w, x, precision=hp)
    q = q * jnp.tanh(jax.nn.softplus(q))
    energy = jnp.einsum("bdi,bdj->bij", q, q, precision=hp)
    attn = jax.nn.softmax(energy, axis=-1)
    out_x = jnp.einsum("bdj,bij->bdi", q, attn, precision=hp)
    return beta[0] * out_x + q


def _reference_matched(x, w, beta):
    # Same module, but emulating the kernel's precision policy: conv, Mish,
    # softmax statistics and residual in f32; bf16 operands (f32 accumulation)
    # for the two attention matmuls.
    hp = jax.lax.Precision.HIGHEST
    q = jnp.einsum("dc,bcn->bdn", w, x, precision=hp)
    q = q * jnp.tanh(jax.nn.softplus(q))
    qb = q.astype(jnp.bfloat16)
    energy = jnp.einsum("bdi,bdj->bij", qb, qb,
                        preferred_element_type=jnp.float32)
    attn = jax.nn.softmax(energy, axis=-1)
    out_x = jnp.einsum("bdj,bij->bdi", qb, attn.astype(jnp.bfloat16),
                       preferred_element_type=jnp.float32)
    return beta[0] * out_x + q


if __name__ == "__main__":
    # Small shapes consistent with the module: x is (B, in_dim, N).
    B, IN_DIM, OUT_DIM, N = 2, 8, 16, 512

    key = jax.random.PRNGKey(0)
    kx, kw = jax.random.split(key)
    x = jax.random.normal(kx, (B, IN_DIM, N), dtype=jnp.float32)

    # Conv1d weight in torch is (out_dim, in_dim, 1); the k=1 axis is squeezed.
    w = (jax.random.normal(kw, (OUT_DIM, IN_DIM), dtype=jnp.float32)
         * (1.0 / jnp.sqrt(IN_DIM)))
    # nn.Parameter(torch.zeros(1)) -> beta is 0 at init; use a deterministic
    # nonzero value so the attention path contributes to the output.
    beta = jnp.array([0.5], dtype=jnp.float32)

    out = self_attn_forward(x, w, beta)
    out = jax.block_until_ready(out)
    assert out.shape == (B, OUT_DIM, N)

    # Tight check against a precision-matched reference (same bf16-operand /
    # f32-accumulate policy), plus a gross sanity check against pure f32.
    ref_match = _reference_matched(x, w, beta)
    ref_f32 = _reference_f32(x, w, beta)
    err_match = float(jnp.max(jnp.abs(out - ref_match)))
    err_f32 = float(jnp.max(jnp.abs(out - ref_f32)))
    assert err_match < 4e-2, f"mismatch vs precision-matched reference: {err_match}"
    assert err_f32 < 5e-1, f"gross mismatch vs f32 reference: {err_f32}"

    print("KERNEL_OK")
</pallas_src>

<mosaic_0001>
module attributes {stable_mosaic.version = 11 : i64} {
  func.func @_self_attn_kernel(%arg0: i32, %arg1: i32, %arg2: i32, %arg3: memref<1xf32, #tpu.memory_space<smem>>, %arg4: memref<1x8x256xf32, #tpu.memory_space<vmem>>, %arg5: memref<1x8x256xf32, #tpu.memory_space<vmem>>, %arg6: memref<16x8xf32, #tpu.memory_space<vmem>>, %arg7: memref<1x16x256xf32, #tpu.memory_space<vmem>>, %arg8: memref<16x256xf32, #tpu.memory_space<vmem>>, %arg9: memref<16x256xbf16, #tpu.memory_space<vmem>>, %arg10: memref<256x16xf32, #tpu.memory_space<vmem>>, %arg11: memref<256x1xf32, #tpu.memory_space<vmem>>, %arg12: memref<256x1xf32, #tpu.memory_space<vmem>>) attributes {dimension_semantics = [#tpu.dimension_semantics<parallel>, #tpu.dimension_semantics<parallel>, #tpu.dimension_semantics<arbitrary>], iteration_bounds = array<i64: 2, 2, 2>, scalar_prefetch = 0 : i64, scratch_operands = 5 : i64, tpu.core_type = #tpu.core_type<tc>, window_params = [{transform_indices = @transform_0, window_bounds = array<i64: 1>}, {transform_indices = @transform_1, window_bounds = array<i64: 1, 8, 256>}, {transform_indices = @transform_2, window_bounds = array<i64: 1, 8, 256>}, {pipeline_mode = #tpu.pipeline_mode<synchronous>, transform_indices = @transform_3, window_bounds = array<i64: 16, 8>}, {transform_indices = @transform_4, window_bounds = array<i64: 1, 16, 256>}]} {
    %c0 = arith.constant 0 : index
    %c0_0 = arith.constant 0 : index
    %0 = vector.load %arg6[%c0, %c0_0] : memref<16x8xf32, #tpu.memory_space<vmem>>, vector<16x8xf32>
    %c0_i32 = arith.constant 0 : i32
    %1 = arith.cmpi eq, %arg2, %c0_i32 : i32
    %2 = arith.extui %1 : i1 to i32
    %c0_i32_1 = arith.constant 0 : i32
    %3 = arith.cmpi ne, %2, %c0_i32_1 : i32
    scf.if %3 {
      %c0_32 = arith.constant 0 : index
      %c0_33 = arith.constant 0 : index
      %c0_34 = arith.constant 0 : index
      %62 = vector.load %arg4[%c0_32, %c0_33, %c0_34] : memref<1x8x256xf32, #tpu.memory_space<vmem>>, vector<1x8x256xf32>
      %63 = vector.shape_cast %62 : vector<1x8x256xf32> to vector<8x256xf32>
      %cst_35 = arith.constant dense<0.000000e+00> : vector<16x256xf32>
      %64 = tpu.matmul %0, %63, %cst_35 {dimension_numbers = #tpu.dot_dimension_numbers<[1], [0], [0], [1], [0, 0, 1, 1], [], []>} : vector<16x8xf32>, vector<8x256xf32>, vector<16x256xf32> -> vector<16x256xf32>
      %65 = math.absf %64 : vector<16x256xf32>
      %cst_36 = arith.constant 0.000000e+00 : f32
      %66 = vector.broadcast %cst_36 : f32 to vector<16x256xf32>
      %67 = arith.subf %66, %65 : vector<16x256xf32>
      %68 = math.exp %67 : vector<16x256xf32>
      %cst_37 = arith.constant 2.000000e+00 : f32
      %69 = vector.broadcast %cst_37 : f32 to vector<16x256xf32>
      %70 = arith.mulf %69, %68 : vector<16x256xf32>
      %cst_38 = arith.constant 1.000000e+00 : f32
      %71 = vector.broadcast %cst_38 : f32 to vector<16x256xf32>
      %72 = arith.addf %71, %70 : vector<16x256xf32>
      %cst_39 = arith.constant 2.000000e+00 : f32
      %73 = vector.broadcast %cst_39 : f32 to vector<16x256xf32>
      %74 = arith.mulf %73, %68 : vector<16x256xf32>
      %75 = arith.mulf %74, %68 : vector<16x256xf32>
      %76 = arith.addf %72, %75 : vector<16x256xf32>
      %77 = arith.mulf %68, %68 : vector<16x256xf32>
      %cst_40 = arith.constant 2.000000e+00 : f32
      %78 = vector.broadcast %cst_40 : f32 to vector<16x256xf32>
      %79 = arith.mulf %78, %68 : vector<16x256xf32>
      %80 = arith.addf %77, %79 : vector<16x256xf32>
      %cst_41 = arith.constant 2.000000e+00 : f32
      %81 = vector.broadcast %cst_41 : f32 to vector<16x256xf32>
      %82 = arith.addf %80, %81 : vector<16x256xf32>
      %cst_42 = arith.constant 0.000000e+00 : f32
      %83 = vector.broadcast %cst_42 : f32 to vector<16x256xf32>
      %84 = arith.cmpf oge, %64, %83 : vector<16x256xf32>
      %85 = arith.select %84, %72, %80 : vector<16x256xi1>, vector<16x256xf32>
      %cst_43 = arith.constant 0.000000e+00 : f32
      %86 = vector.broadcast %cst_43 : f32 to vector<16x256xf32>
      %87 = arith.cmpf oge, %64, %86 : vector<16x256xf32>
      %88 = arith.select %87, %76, %82 : vector<16x256xi1>, vector<16x256xf32>
      %89 = arith.divf %85, %88 : vector<16x256xf32>
      %90 = arith.mulf %64, %89 : vector<16x256xf32>
      %c0_44 = arith.constant 0 : index
      %c0_45 = arith.constant 0 : index
      %91 = vector.load %arg8[%c0_44, %c0_45] : memref<16x256xf32, #tpu.memory_space<vmem>>, vector<16x256xf32>
      tpu.vector_store %arg8[%c0_44, %c0_45], %90 {strides = array<i32>} : memref<16x256xf32, #tpu.memory_space<vmem>>, vector<16x256xf32>,
      %92 = arith.truncf %90 : vector<16x256xf32> to vector<16x256xbf16>
      %c0_46 = arith.constant 0 : index
      %c0_47 = arith.constant 0 : index
      %93 = vector.load %arg9[%c0_46, %c0_47] : memref<16x256xbf16, #tpu.memory_space<vmem>>, vector<16x256xbf16>
      tpu.vector_store %arg9[%c0_46, %c0_47], %92 {strides = array<i32>} : memref<16x256xbf16, #tpu.memory_space<vmem>>, vector<16x256xbf16>,
      %cst_48 = arith.constant 0xFF800000 : f32
      %94 = vector.broadcast %cst_48 : f32 to vector<256x1xf32>
      %c0_49 = arith.constant 0 : index
      %c0_50 = arith.constant 0 : index
      %95 = vector.load %arg11[%c0_49, %c0_50] : memref<256x1xf32, #tpu.memory_space<vmem>>, vector<256x1xf32>
      tpu.vector_store %arg11[%c0_49, %c0_50], %94 {strides = array<i32>} : memref<256x1xf32, #tpu.memory_space<vmem>>, vector<256x1xf32>,
      %cst_51 = arith.constant 0.000000e+00 : f32
      %96 = vector.broadcast %cst_51 : f32 to vector<256x1xf32>
      %c0_52 = arith.constant 0 : index
      %c0_53 = arith.constant 0 : index
      %97 = vector.load %arg12[%c0_52, %c0_53] : memref<256x1xf32, #tpu.memory_space<vmem>>, vector<256x1xf32>
      tpu.vector_store %arg12[%c0_52, %c0_53], %96 {strides = array<i32>} : memref<256x1xf32, #tpu.memory_space<vmem>>, vector<256x1xf32>,
      %cst_54 = arith.constant 0.000000e+00 : f32
      %98 = vector.broadcast %cst_54 : f32 to vector<256x16xf32>
      %c0_55 = arith.constant 0 : index
      %c0_56 = arith.constant 0 : index
      %99 = vector.load %arg10[%c0_55, %c0_56] : memref<256x16xf32, #tpu.memory_space<vmem>>, vector<256x16xf32>
      tpu.vector_store %arg10[%c0_55, %c0_56], %98 {strides = array<i32>} : memref<256x16xf32, #tpu.memory_space<vmem>>, vector<256x16xf32>,
    } else {
    }
    %c0_2 = arith.constant 0 : index
    %c0_3 = arith.constant 0 : index
    %c0_4 = arith.constant 0 : index
    %4 = vector.load %arg5[%c0_2, %c0_3, %c0_4] : memref<1x8x256xf32, #tpu.memory_space<vmem>>, vector<1x8x256xf32>
    %5 = vector.shape_cast %4 : vector<1x8x256xf32> to vector<8x256xf32>
    %cst = arith.constant dense<0.000000e+00> : vector<16x256xf32>
    %6 = tpu.matmul %0, %5, %cst {dimension_numbers = #tpu.dot_dimension_numbers<[1], [0], [0], [1], [0, 0, 1, 1], [], []>} : vector<16x8xf32>, vector<8x256xf32>, vector<16x256xf32> -> vector<16x256xf32>
    %7 = math.absf %6 : vector<16x256xf32>
    %cst_5 = arith.constant 0.000000e+00 : f32
    %8 = vector.broadcast %cst_5 : f32 to vector<16x256xf32>
    %9 = arith.subf %8, %7 : vector<16x256xf32>
    %10 = math.exp %9 : vector<16x256xf32>
    %cst_6 = arith.constant 2.000000e+00 : f32
    %11 = vector.broadcast %cst_6 : f32 to vector<16x256xf32>
    %12 = arith.mulf %11, %10 : vector<16x256xf32>
    %cst_7 = arith.constant 1.000000e+00 : f32
    %13 = vector.broadcast %cst_7 : f32 to vector<16x256xf32>
    %14 = arith.addf %13, %12 : vector<16x256xf32>
    %cst_8 = arith.constant 2.000000e+00 : f32
    %15 = vector.broadcast %cst_8 : f32 to vector<16x256xf32>
    %16 = arith.mulf %15, %10 : vector<16x256xf32>
    %17 = arith.mulf %16, %10 : vector<16x256xf32>
    %18 = arith.addf %14, %17 : vector<16x256xf32>
    %19 = arith.mulf %10, %10 : vector<16x256xf32>
    %cst_9 = arith.constant 2.000000e+00 : f32
    %20 = vector.broadcast %cst_9 : f32 to vector<16x256xf32>
    %21 = arith.mulf %20, %10 : vector<16x256xf32>
    %22 = arith.addf %19, %21 : vector<16x256xf32>
    %cst_10 = arith.constant 2.000000e+00 : f32
    %23 = vector.broadcast %cst_10 : f32 to vector<16x256xf32>
    %24 = arith.addf %22, %23 : vector<16x256xf32>
    %cst_11 = arith.constant 0.000000e+00 : f32
    %25 = vector.broadcast %cst_11 : f32 to vector<16x256xf32>
    %26 = arith.cmpf oge, %6, %25 : vector<16x256xf32>
    %27 = arith.select %26, %14, %22 : vector<16x256xi1>, vector<16x256xf32>
    %cst_12 = arith.constant 0.000000e+00 : f32
    %28 = vector.broadcast %cst_12 : f32 to vector<16x256xf32>
    %29 = arith.cmpf oge, %6, %28 : vector<16x256xf32>
    %30 = arith.select %29, %18, %24 : vector<16x256xi1>, vector<16x256xf32>
    %31 = arith.divf %27, %30 : vector<16x256xf32>
    %32 = arith.mulf %6, %31 : vector<16x256xf32>
    %33 = arith.truncf %32 : vector<16x256xf32> to vector<16x256xbf16>
    %c0_13 = arith.constant 0 : index
    %c0_14 = arith.constant 0 : index
    %34 = vector.load %arg9[%c0_13, %c0_14] : memref<16x256xbf16, #tpu.memory_space<vmem>>, vector<16x256xbf16>
    %cst_15 = arith.constant dense<0.000000e+00> : vector<256x256xf32>
    %35 = tpu.matmul %34, %33, %cst_15 {dimension_numbers = #tpu.dot_dimension_numbers<[0], [0], [1], [1], [0, 1, 1, 1], [], []>} : vector<16x256xbf16>, vector<16x256xbf16>, vector<256x256xf32> -> vector<256x256xf32>
    %c0_16 = arith.constant 0 : index
    %c0_17 = arith.constant 0 : index
    %36 = vector.load %arg11[%c0_16, %c0_17] : memref<256x1xf32, #tpu.memory_space<vmem>>, vector<256x1xf32>
    %cst_18 = arith.constant dense<0xFF800000> : vector<256xf32>
    %37 = vector.multi_reduction <maximumf>, %35, %cst_18 [1] : vector<256x256xf32> to vector<256xf32>
    %38 = vector.shape_cast %37 : vector<256xf32> to vector<256x1xf32>
    %39 = arith.maximumf %36, %38 : vector<256x1xf32>
    %40 = arith.subf %36, %39 : vector<256x1xf32>
    %41 = math.exp %40 : vector<256x1xf32>
    %42 = vector.broadcast %39 : vector<256x1xf32> to vector<256x256xf32>
    %43 = arith.subf %35, %42 : vector<256x256xf32>
    %44 = math.exp %43 : vector<256x256xf32>
    %c0_19 = arith.constant 0 : index
    %c0_20 = arith.constant 0 : index
    %45 = vector.load %arg12[%c0_19, %c0_20] : memref<256x1xf32, #tpu.memory_space<vmem>>, vector<256x1xf32>
    %46 = arith.mulf %41, %45 : vector<256x1xf32>
    %cst_21 = arith.constant dense<0.000000e+00> : vector<256xf32>
    %47 = vector.multi_reduction <add>, %44, %cst_21 [1] : vector<256x256xf32> to vector<256xf32>
    %48 = vector.shape_cast %47 : vector<256xf32> to vector<256x1xf32>
    %49 = arith.addf %46, %48 : vector<256x1xf32>
    %c0_22 = arith.constant 0 : index
    %c0_23 = arith.constant 0 : index
    %50 = vector.load %arg12[%c0_22, %c0_23] : memref<256x1xf32, #tpu.memory_space<vmem>>, vector<256x1xf32>
    tpu.vector_store %arg12[%c0_22, %c0_23], %49 {strides = array<i32>} : memref<256x1xf32, #tpu.memory_space<vmem>>, vector<256x1xf32>,
    %c0_24 = arith.constant 0 : index
    %c0_25 = arith.constant 0 : index
    %51 = vector.load %arg10[%c0_24, %c0_25] : memref<256x16xf32, #tpu.memory_space<vmem>>, vector<256x16xf32>
    %52 = vector.broadcast %41 : vector<256x1xf32> to vector<256x16xf32>
    %53 = arith.mulf %52, %51 : vector<256x16xf32>
    %54 = arith.truncf %44 : vector<256x256xf32> to vector<256x256xbf16>
    %cst_26 = arith.constant dense<0.000000e+00> : vector<256x16xf32>
    %55 = tpu.matmul %54, %33, %cst_26 {dimension_numbers = #tpu.dot_dimension_numbers<[1], [1], [0], [0], [0, 0, 1, 0], [], []>} : vector<256x256xbf16>, vector<16x256xbf16>, vector<256x16xf32> -> vector<256x16xf32>
    %56 = arith.addf %53, %55 : vector<256x16xf32>
    %c0_27 = arith.constant 0 : index
    %c0_28 = arith.constant 0 : index
    %57 = vector.load %arg10[%c0_27, %c0_28] : memref<256x16xf32, #tpu.memory_space<vmem>>, vector<256x16xf32>
    tpu.vector_store %arg10[%c0_27, %c0_28], %56 {strides = array<i32>} : memref<256x16xf32, #tpu.memory_space<vmem>>, vector<256x16xf32>,
    %c0_29 = arith.constant 0 : index
    %c0_30 = arith.constant 0 : index
    %58 = vector.load %arg11[%c0_29, %c0_30] : memref<256x1xf32, #tpu.memory_space<vmem>>, vector<256x1xf32>
    tpu.vector_store %arg11[%c0_29, %c0_30], %39 {strides = array<i32>} : memref<256x1xf32, #tpu.memory_space<vmem>>, vector<256x1xf32>,
    %c1_i32 = arith.constant 1 : i32
    %59 = arith.cmpi eq, %arg2, %c1_i32 : i32
    %60 = arith.extui %59 : i1 to i32
    %c0_i32_31 = arith.constant 0 : i32
    %61 = arith.cmpi ne, %60, %c0_i32_31 : i32
    scf.if %61 {
      %c0_32 = arith.constant 0 : index
      %c0_33 = arith.constant 0 : index
      %62 = vector.load %arg12[%c0_32, %c0_33] : memref<256x1xf32, #tpu.memory_space<vmem>>, vector<256x1xf32>
      %63 = tpu.reciprocal %62 {approx = true} : vector<256x1xf32> -> vector<256x1xf32>
      %c0_34 = arith.constant 0 : index
      %c0_35 = arith.constant 0 : index
      %64 = vector.load %arg10[%c0_34, %c0_35] : memref<256x16xf32, #tpu.memory_space<vmem>>, vector<256x16xf32>
      %65 = vector.broadcast %63 : vector<256x1xf32> to vector<256x16xf32>
      %66 = arith.mulf %64, %65 : vector<256x16xf32>
      %c0_36 = arith.constant 0 : index
      %67 = memref.load %arg3[%c0_36] : memref<1xf32, #tpu.memory_space<smem>>
      %68 = tpu.transpose %66, [1, 0] : vector<256x16xf32> -> vector<16x256xf32>
      %69 = vector.broadcast %67 : f32 to vector<16x256xf32>
      %70 = arith.mulf %69, %68 : vector<16x256xf32>
      %c0_37 = arith.constant 0 : index
      %c0_38 = arith.constant 0 : index
      %71 = vector.load %arg8[%c0_37, %c0_38] : memref<16x256xf32, #tpu.memory_space<vmem>>, vector<16x256xf32>
      %72 = arith.addf %70, %71 : vector<16x256xf32>
      %c0_39 = arith.constant 0 : index
      %c0_40 = arith.constant 0 : index
      %c0_41 = arith.constant 0 : index
      %73 = vector.load %arg7[%c0_39, %c0_40, %c0_41] : memref<1x16x256xf32, #tpu.memory_space<vmem>>, vector<1x16x256xf32>
      %74 = vector.shape_cast %73 : vector<1x16x256xf32> to vector<16x256xf32>
      %75 = vector.shape_cast %72 : vector<16x256xf32> to vector<1x16x256xf32>
      tpu.vector_store %arg7[%c0_39, %c0_40, %c0_41], %75 {strides = array<i32>} : memref<1x16x256xf32, #tpu.memory_space<vmem>>, vector<1x16x256xf32>,
    } else {
    }
    return
  }
  func.func @transform_0(%arg0: i32, %arg1: i32, %arg2: i32) -> i32 {
    %c0_i32 = arith.constant 0 : i32
    %c0_i32_0 = arith.constant 0 : i32
    return %c0_i32 : i32
  }
  func.func @transform_1(%arg0: i32, %arg1: i32, %arg2: i32) -> (i32, i32, i32) {
    %c0_i32 = arith.constant 0 : i32
    %c0_i32_0 = arith.constant 0 : i32
    return %arg0, %c0_i32, %arg1 : i32, i32, i32
  }
  func.func @transform_2(%arg0: i32, %arg1: i32, %arg2: i32) -> (i32, i32, i32) {
    %c0_i32 = arith.constant 0 : i32
    %c0_i32_0 = arith.constant 0 : i32
    return %arg0, %c0_i32, %arg2 : i32, i32, i32
  }
  func.func @transform_3(%arg0: i32, %arg1: i32, %arg2: i32) -> (i32, i32) {
    %c0_i32 = arith.constant 0 : i32
    %c0_i32_0 = arith.constant 0 : i32
    %c0_i32_1 = arith.constant 0 : i32
    return %c0_i32, %c0_i32_0 : i32, i32
  }
  func.func @transform_4(%arg0: i32, %arg1: i32, %arg2: i32) -> (i32, i32, i32) {
    %c0_i32 = arith.constant 0 : i32
    %c0_i32_0 = arith.constant 0 : i32
    return %arg0, %c0_i32, %arg1 : i32, i32, i32
  }
}

</mosaic_0001>

<bundles_post_ra>
// kernel: self_attn_forward.1
= control target key start
LH: loop header
LB: loop body
LE: loop exit
PB: predicated region body
PF: predicated region fallthrough
CT: control target
= control target key end

     0   :  { %s5194_s0 = inlined_call_operand.<no memory space> [shape: f32[1], index: 0, kind: input, shape index: {}]   ;;  %s5195_s1 = inlined_call_operand.hbm [shape: f32[2,8,512], index: 1, kind: input, shape index: {}, may-alias: {1,2}]   ;;  %s5196_s2 = inlined_call_operand.hbm [shape: f32[2,8,512], index: 2, kind: input, shape index: {}, may-alias: {1,2}]   ;;  %s5197_s3 = inlined_call_operand.vmem [shape: f32[16,8], index: 3, kind: input, shape index: {}]   ;;  %s5198_s4 = inlined_call_operand.hbm [shape: f32[2,16,512], index: 4, kind: output, shape index: {}]  }
   0x1   :  { %5301 = sst [smem:[#allocation96_spill]] %s5195_s1 }
   0x2   :  { %5302 = sst [smem:[#allocation97_spill]] %s5198_s4 }
   0x3   :  { %9 = sst [smem:[#allocation7]] %s5194_s0 }
   0x4   :  { %10 = vsyncpa [#allocation9], 0 }
   0x5   :  { %12 = vsyncpa [#allocation9 + $0x1], 0 }
   0x6   :  { %13 = vsyncpa [#allocation12], 0 }
   0x7   :  { %15 = vsyncpa [#allocation12 + $0x1], 0 }
   0x8   :  { %16 = vsyncpa [#allocation10], 0 }
   0x9   :  { %18 = vsyncpa [#allocation10 + $0x1], 0  ;;  %s3577_s17 = smov 0   ;;  %s3579_s18 = smov 0  }
   0xa   :  { %s3581_s19 = smov 0   ;;  %s3583_s20 = smov 0  }
   0xb   :  { %s3585_s21 = smov 0   ;;  %s3587_s22 = smov 0  }
   0xc   :  { %s3589_s23 = smov 0   ;;  %s3591_s0 = smov 0  }
   0xd   :  { %s3593_s24 = smov 0   ;;  %s3595_s25 = smov 0  }
   0xe   :  { %s3597_s26 = smov 0   ;;  %s3599_s27 = smov 0  }
   0xf   :  { %s3601_s28 = smov 0  }
  0x10 LB: > { %5303 = sst [smem:[#allocation17_spill]] %s3500_s20  ;;  %s2862_s29 = sadd.s32 4294967295, %s3536_s28   ;;  %s3536_s28 = sphi %s3601_s28, %s24_s28   ;;  %s3532_s27 = sphi %s3599_s27, %s5559_s27   ;;  %s3528_s26 = sphi %s3597_s26, %s5551_s26   ;;  %s3524_s25 = sphi %s3595_s25, %s5550_s25   ;;  %s3520_s24 = sphi %s3593_s24, %s5558_s24   ;;  %s3516_s0 = sphi %s3591_s0, %s5549_s0   ;;  %s3512_s23 = sphi %s3589_s23, %s5548_s23   ;;  %s3508_s22 = sphi %s3587_s22, %s5557_s22   ;;  %s3504_s21 = sphi %s3585_s21, %s5556_s21   ;;  %s3500_s20 = sphi %s3583_s20, %s5555_s20   ;;  %s3496_s19 = sphi %s3581_s19, %s5554_s19   ;;  %s3492_s18 = sphi %s3579_s18, %s5553_s18   ;;  %s3488_s17 = sphi %s3577_s17, %s5552_s17  }
  0x11   : > { %5304 = sst [smem:[#allocation18_spill]] %s3520_s24  ;;  %s2863_s30 = sadd.s32 4294967294, %s3536_s28  }
  0x12   : > { %5305 = sst [smem:[#allocation19_spill]] %s3524_s25  ;;  %p80_p0 = scmp.ne.s32.totalorder %s3508_s22, %s3504_s21 }
  0x13   : > { %5306 = sst [smem:[#allocation20_spill]] %s3528_s26  ;;  %p5205_p1 = scmp.eq.s32.totalorder %s3536_s28, 0 }
  0x14   : > { %p86_p2 = scmp.ne.s32.totalorder %s3504_s21, %s3500_s20  ;;  %p3652_p3 = scmp.eq.s32.totalorder %s2862_s29, 0 }
  0x15   : > { %p161_p4 = scmp.eq.s32.totalorder %s2862_s29, 7  ;;  %p3658_p5 = por %p5205_p1, %p80_p0 }
  0x16   : > { %p167_p6 = scmp.eq.s32.totalorder %s2863_s30, 7  ;;  %p3664_p7 = por %p3652_p3, %p86_p2 }
  0x17   : > { %p3668_p8 = por %p161_p4, %p80_p0  ;;  %p5204_p10 = scmp.lt.s32.totalorder %s3536_s28, 8 }
  0x18   : > { %p3672_p9 = por %p167_p6, %p86_p2  ;;  %s193_s13 = sand.u32 1, %s3508_s22  }
  0x19   : > { %s5310_s11 = scalar_select %p3668_p8, 1, 0 }
  0x1a   : > { %s5312_s12 = scalar_select %p3672_p9, 1, 0 }
  0x1b   : > { %5311 = sst [smem:[#allocation21_spill]] %s5310_s11  ;;  %s2866_s14 = sshll.u32 %s193_s13, 4 }
  0x1c   : > { %5313 = sst [smem:[#allocation22_spill]] %s5312_s12  ;;  %s2867_s15 = sshll.u32 %s3528_s26, 1 }
  0x1d   : > { %s2868_s16 = sshll.u32 %s3532_s27, 2  ;;  %s197_s29 = scalar_lea.vmem [#allocation8], %s2866_s14 }
  0x1e   : > { %s207_s30 = sshll.u32 %s197_s29, 4  ;;  %s203_s7 = sadd.s32 %s2868_s16, %s2867_s15  ;;  %s208_s30 = int_to_ptr.vmem [resolvable:$true] %s207_s30 }
  0x1f   : > { %s2869_s6 = sshll.u32 %s203_s7, 7  ;;  %p3686_p11 = pnand %p5204_p10, %p3658_p5 }
  0x20   : > { %s5315_s1 = sld [smem:[#allocation96_spill]]  ;;  %p2874_p12 = scmp.ge.s32.totalorder %s3536_s28, 1 }
  0x21   : > { %p233_p13 = scmp.lt.s32.totalorder %s3536_s28, 9  ;;  %s194_s11 = scalar_lea.sflag [#allocation9], %s193_s13 }
  0x22   : > { %p3342_p0 = pneg %p3686_p11  ;;  %s3353_s14 = scalar_lea.vmem %s208_s30, 256 }
  0x23   : > { %p3354_p2 = scmp.ne.s32.totalorder %s208_s30, %s3353_s14  ;;  %s3538_s7 = smov [#allocation8]  }
  0x24   : > { %s3358_s9 = sshll.u32 %s3538_s7, 4  ;;  %s3359_s9 = int_to_ptr.vmem [resolvable:$false] %s3358_s9 }
  0x25   : > { %p3356_p4 = pnand %p3354_p2, %p3342_p0  ;;  %s3360_s15 = scalar_lea.vmem %s3359_s9, 512 }
  0x26   : > { %s205_s12 = scalar_lea.hbm %s5315_s1, %s2869_s6  ;;  %p3361_p5 = scmp.lt.s32.totalorder %s208_s30, %s3359_s9 }
  0x27   : > { %p3357_p6 = pneg %p3356_p4  ;;  %p3362_p10 = scmp.lt.s32.totalorder %s3360_s15, %s3353_s14 }
  0x29   : > { %p3363_p1 = por %p3362_p10, %p3361_p5 }
  0x2b   : > { %p3364_p9 = pnand %p3363_p1, %p3357_p6 }
  0x2d   : > { %3367 = shalt.err (!%p3364_p9)
}
  0x2e   : > { %2923 = dma.hbm_to_vmem [thread:$0]  (!%p3686_p11), %s205_s12, 256, %s208_s30, %s194_s11  }
  0x2f   : > { %p3703_p1 = pnand %p2874_p12, %p233_p13  ;;  %s36_s20 = sadd.s32 1, %s3524_s25 }
  0x30   : > { %p37_p9 = scmp.ge.s32.totalorder %s36_s20, 2  ;;  %p108_p10 = scmp.ne.s32.totalorder %s3496_s19, %s3492_s18 }
  0x31   : > { %p114_p0 = scmp.ne.s32.totalorder %s3492_s18, %s3488_s17  ;;  %s5318_s6 = sadd.s32 1, %s3528_s26 }
  0x32   : > { %s5561_s20 = smov (%p37_p9, %s36_s20), 0  ;;  %s5563_s6 = smov (!%p37_p9, %s5318_s6), %s3528_s26 }
  0x33   : > { %5317 = sst [smem:[#allocation23_spill]] %s5561_s20  ;;  %s97_s11 = ssub.s32 %s3524_s25, %s5561_s20 }
  0x34   : > { %p5319_p11 = scmp.eq.s32.totalorder %s3536_s28, 0  ;;  %p41_p12 = scmp.ge.s32.totalorder %s5563_s6, 2 }
  0x35   : > { %p3728_p13 = por %p114_p0, %p3652_p3  ;;  %s214_s29 = sand.u32 1, %s3496_s19  }
  0x36   : > { %p3722_p2 = por %p108_p10, %p5319_p11  ;;  %s2871_s17 = sshll.u32 %s3524_s25, 1 }
  0x37   : > { %s5565_s6 = smov (%p41_p12, %s5563_s6), 0  ;;  %s5323_s30 = sadd.s32 1, %s3532_s27 }
  0x38   : > { %5322 = sst [smem:[#allocation24_spill]] %s5565_s6  ;;  %s5567_s30 = smov (!%p41_p12, %s5323_s30), %s3532_s27 }
  0x39   : > { %s69_s14 = ssub.s32 %s3528_s26, %s5565_s6  ;;  %p45_p4 = scmp.ge.s32.totalorder %s5567_s30, 2 }
  0x3a   : > { %s2870_s8 = sshll.u32 %s214_s29, 4  ;;  %s224_s7 = sadd.s32 %s2871_s17, %s2868_s16 }
  0x3b   : > { %s5569_s30 = smov (%p45_p4, %s5567_s30), 0  ;;  %s2873_s9 = sshll.u32 %s224_s7, 7 }
  0x3c   : > { %s218_s15 = scalar_lea.vmem [#allocation11], %s2870_s8  ;;  %s68_s1 = ssub.s32 %s3532_s27, %s5569_s30 }
  0x3d   : > { %s228_s5 = sshll.u32 %s218_s15, 4  ;;  %s226_s24 = scalar_lea.hbm %s5196_s2, %s2873_s9  ;;  %s229_s5 = int_to_ptr.vmem [resolvable:$true] %s228_s5 }
  0x3e   : > { %s70_s6 = sor.u32 %s69_s14, %s68_s1  ;;  %s98_s26 = sor.u32 %s97_s11, %s68_s1 }
  0x3f   : > { %p71_p3 = scmp.eq.s32.totalorder %s70_s6, 0  ;;  %p99_p6 = scmp.eq.s32.totalorder %s98_s26, 0 }
  0x40   : > { %p5324_p5 = scmp.lt.s32.totalorder %s3536_s28, 8  ;;  %s5326_s17 = sadd.s32 1, %s3508_s22 }
  0x41   : > { %s3761_s8 = scalar_select %p71_p3, %s3508_s22, %s5326_s17  }
  0x42   : > { %p3754_p9 = pnand %p5324_p5, %p3722_p2  ;;  %s5327_s7 = sadd.s32 1, %s3496_s19 }
  0x43   : > { %s3766_s15 = scalar_select %p99_p6, %s3496_s19, %s5327_s7  }
  0x44   : > { %s215_s25 = scalar_lea.sflag [#allocation12], %s214_s29  ;;  %p3370_p10 = pneg %p3754_p9 }
  0x45   : > { %s3381_s1 = scalar_lea.vmem %s229_s5, 256  ;;  %s3539_s26 = smov [#allocation11]  }
  0x46   : > { %p3382_p0 = scmp.ne.s32.totalorder %s229_s5, %s3381_s1  ;;  %s3386_s20 = sshll.u32 %s3539_s26, 4  ;;  %s3387_s20 = int_to_ptr.vmem [resolvable:$false] %s3386_s20 }
  0x47   : > { %s3388_s6 = scalar_lea.vmem %s3387_s20, 512  ;;  %p3389_p2 = scmp.lt.s32.totalorder %s229_s5, %s3387_s20 }
  0x48   : > { %p3384_p11 = pnand %p3382_p0, %p3370_p10  ;;  %p3390_p4 = scmp.lt.s32.totalorder %s3388_s6, %s3381_s1 }
  0x4a   : > { %p3385_p12 = pneg %p3384_p11  ;;  %p3391_p5 = por %p3390_p4, %p3389_p2 }
  0x4c   : > { %p3392_p8 = pnand %p3391_p5, %p3385_p12 }
  0x4e   : > { %3395 = shalt.err (!%p3392_p8)
}
  0x4f   : > { %2926 = dma.hbm_to_vmem [thread:$0]  (!%p3754_p9), %s226_s24, 256, %s229_s5, %s215_s25  }
  0x50   : > { %237 = sbr.rel (%p3703_p1) target bundleno = 1844 (0x734), region = 36 }
  0x55   : > { %s3775_s11 = sand.u32 1, %s3504_s21  }
  0x56   : > { %s2875_s12 = sshll.u32 %s3775_s11, 4  ;;  %s240_s29 = scalar_lea.sflag [#allocation9], %s3775_s11 }
  0x57   : > { %s243_s14 = scalar_lea.vmem [#allocation8], %s2875_s12 }
  0x58   : > { %3475 = dma.done.wait (%p3664_p7), %s240_s29, 256  }
  0x59   : > { %3477 = vsyncadd (%p3664_p7), %s240_s29, 4294967040  ;;  %s248_s24 = sand.u32 1, %s3492_s18  }
  0x5a   : > { %s3784_s5 = sshll.u32 %s248_s24, 4  ;;  %s249_s4 = scalar_lea.sflag [#allocation12], %s248_s24 }
  0x5b   : > { %s252_s9 = scalar_lea.vmem [#allocation11], %s3784_s5 }
  0x5c   : > { %3479 = dma.done.wait (%p3728_p13), %s249_s4, 256  }
  0x5d   : > { %3481 = vsyncadd (%p3728_p13), %s249_s4, 4294967040  ;;  %s2877_s16 = sshll.u32 %s3775_s11, 5  ;;  %v3795_v0 = vld [vmem:[%s5197_s3] sm:$0xff]  ;;  %v3800_v1 = vld [vmem:[%s5197_s3 + $0x8] sm:$0xff]  ;;  %p2878_p7 = scmp.ne.s32.totalorder %s3512_s23, 0 }
  0x5e   : > { %s3802_s1 = scalar_lea.vmem [#allocation13], %s2877_s16 }
  0x5f   : > { %291 = sbr.rel (%p2878_p7) target bundleno = 351 (0x15f), region = 48 }
  0x64   : > { %v293_v2 = vld [vmem:[%s243_s14 + $0x8] sm:$0xff]  ;;  %v3805_v3 = vld [vmem:[%s243_s14] sm:$0xff]  ;;  %vm464_vm0 = vcmask 7168   ;;  %vm529_vm1 = vcmask 130048   ;;  %v3540_v4 = vmov 0.0   ;;  %vm294_vm2 = vcmask 64512  }
  0x65   : > { %331 = vmatprep.subr.mxu0 %v293_v2  ;;  %2912 = vmatprep.subr.mxu1 %v293_v2  ;;  %497 = vst.msk [vmem:[#allocation6] sm:$0xff] %vm464_vm0, %v3540_v4  ;;  %498 = vst.msk [vmem:[#allocation6 + $0x8] sm:$0xff] %vm464_vm0, %v3540_v4  ;;  %v3541_v5 = vmov -inf  }
  0x66   : > { %499 = vst.msk [vmem:[#allocation6 + $0x10] sm:$0xff] %vm464_vm0, %v3540_v4  ;;  %500 = vst.msk [vmem:[#allocation6 + $0x18] sm:$0xff] %vm464_vm0, %v3540_v4  ;;  %332 = vmatpush1.msra.mxu0 %v3805_v3  ;;  %2913 = vmatpush1.msra.mxu1 %v3805_v3 }
  0x67   : > { %501 = vst.msk [vmem:[#allocation6 + $0x20] sm:$0xff] %vm464_vm0, %v3540_v4  ;;  %502 = vst.msk [vmem:[#allocation6 + $0x28] sm:$0xff] %vm464_vm0, %v3540_v4  ;;  %365 = vmatprep.mubr.f32.mxu0 %v3540_v4  ;;  %371 = vmatprep.mubr.f32.mxu1 %v3540_v4 }
  0x68   : > { %503 = vst.msk [vmem:[#allocation6 + $0x30] sm:$0xff] %vm464_vm0, %v3540_v4  ;;  %504 = vst.msk [vmem:[#allocation6 + $0x38] sm:$0xff] %vm464_vm0, %v3540_v4  ;;  %2879 = vmatmul.mubr.msk.f32.vlgmr.msra.gmra.mxu0 %vm294_vm2, %v3795_v0  ;;  %2880 = vmatmul.mubr.msk.f32.vlgmr.msra.gmra.mxu1 %vm294_vm2, %v3800_v1 }
  0x69   : > { %505 = vst.msk [vmem:[#allocation6 + $0x40] sm:$0xff] %vm464_vm0, %v3540_v4  ;;  %506 = vst.msk [vmem:[#allocation6 + $0x48] sm:$0xff] %vm464_vm0, %v3540_v4 }
  0x6a   : > { %507 = vst.msk [vmem:[#allocation6 + $0x50] sm:$0xff] %vm464_vm0, %v3540_v4  ;;  %508 = vst.msk [vmem:[#allocation6 + $0x58] sm:$0xff] %vm464_vm0, %v3540_v4 }
  0x6b   : > { %509 = vst.msk [vmem:[#allocation6 + $0x60] sm:$0xff] %vm464_vm0, %v3540_v4  ;;  %510 = vst.msk [vmem:[#allocation6 + $0x68] sm:$0xff] %vm464_vm0, %v3540_v4 }
  0x6c   : > { %511 = vst.msk [vmem:[#allocation6 + $0x70] sm:$0xff] %vm464_vm0, %v3540_v4  ;;  %512 = vst.msk [vmem:[#allocation6 + $0x78] sm:$0xff] %vm464_vm0, %v3540_v4 }
  0x6d   : > { %513 = vst.msk [vmem:[#allocation6 + $0x80] sm:$0xff] %vm464_vm0, %v3540_v4  ;;  %514 = vst.msk [vmem:[#allocation6 + $0x88] sm:$0xff] %vm464_vm0, %v3540_v4 }
  0x6e   : > { %515 = vst.msk [vmem:[#allocation6 + $0x90] sm:$0xff] %vm464_vm0, %v3540_v4  ;;  %516 = vst.msk [vmem:[#allocation6 + $0x98] sm:$0xff] %vm464_vm0, %v3540_v4 }
  0x6f   : > { %517 = vst.msk [vmem:[#allocation6 + $0xa0] sm:$0xff] %vm464_vm0, %v3540_v4  ;;  %518 = vst.msk [vmem:[#allocation6 + $0xa8] sm:$0xff] %vm464_vm0, %v3540_v4 }
  0x70   : > { %519 = vst.msk [vmem:[#allocation6 + $0xb0] sm:$0xff] %vm464_vm0, %v3540_v4  ;;  %520 = vst.msk [vmem:[#allocation6 + $0xb8] sm:$0xff] %vm464_vm0, %v3540_v4 }
  0x71   : > { %521 = vst.msk [vmem:[#allocation6 + $0xc0] sm:$0xff] %vm464_vm0, %v3540_v4  ;;  %522 = vst.msk [vmem:[#allocation6 + $0xc8] sm:$0xff] %vm464_vm0, %v3540_v4 }
  0x72   : > { %523 = vst.msk [vmem:[#allocation6 + $0xd0] sm:$0xff] %vm464_vm0, %v3540_v4  ;;  %524 = vst.msk [vmem:[#allocation6 + $0xd8] sm:$0xff] %vm464_vm0, %v3540_v4 }
  0x73   : > { %525 = vst.msk [vmem:[#allocation6 + $0xe0] sm:$0xff] %vm464_vm0, %v3540_v4  ;;  %526 = vst.msk [vmem:[#allocation6 + $0xe8] sm:$0xff] %vm464_vm0, %v3540_v4 }
  0x74   : > { %527 = vst.msk [vmem:[#allocation6 + $0xf0] sm:$0xff] %vm464_vm0, %v3540_v4  ;;  %528 = vst.msk [vmem:[#allocation6 + $0xf8] sm:$0xff] %vm464_vm0, %v3540_v4 }
  0x75   : > { %530 = vst.msk [vmem:[#allocation4] sm:$0xff] %vm529_vm1, %v3540_v4  ;;  %531 = vst.msk [vmem:[#allocation4 + $0x8] sm:$0xff] %vm529_vm1, %v3540_v4 }
  0x76   : > { %532 = vst.msk [vmem:[#allocation4 + $0x10] sm:$0xff] %vm529_vm1, %v3540_v4  ;;  %533 = vst.msk [vmem:[#allocation4 + $0x18] sm:$0xff] %vm529_vm1, %v3540_v4 }
  0x77   : > { %534 = vst.msk [vmem:[#allocation4 + $0x20] sm:$0xff] %vm529_vm1, %v3540_v4  ;;  %535 = vst.msk [vmem:[#allocation4 + $0x28] sm:$0xff] %vm529_vm1, %v3540_v4 }
  0x78   : > { %536 = vst.msk [vmem:[#allocation4 + $0x30] sm:$0xff] %vm529_vm1, %v3540_v4  ;;  %537 = vst.msk [vmem:[#allocation4 + $0x38] sm:$0xff] %vm529_vm1, %v3540_v4 }
  0x79   : > { %538 = vst.msk [vmem:[#allocation4 + $0x40] sm:$0xff] %vm529_vm1, %v3540_v4  ;;  %539 = vst.msk [vmem:[#allocation4 + $0x48] sm:$0xff] %vm529_vm1, %v3540_v4 }
  0x7a   : > { %540 = vst.msk [vmem:[#allocation4 + $0x50] sm:$0xff] %vm529_vm1, %v3540_v4  ;;  %541 = vst.msk [vmem:[#allocation4 + $0x58] sm:$0xff] %vm529_vm1, %v3540_v4 }
  0x7b   : > { %542 = vst.msk [vmem:[#allocation4 + $0x60] sm:$0xff] %vm529_vm1, %v3540_v4  ;;  %543 = vst.msk [vmem:[#allocation4 + $0x68] sm:$0xff] %vm529_vm1, %v3540_v4 }
  0x7c   : > { %544 = vst.msk [vmem:[#allocation4 + $0x70] sm:$0xff] %vm529_vm1, %v3540_v4  ;;  %545 = vst.msk [vmem:[#allocation4 + $0x78] sm:$0xff] %vm529_vm1, %v3540_v4 }
  0x7d   : > { %546 = vst.msk [vmem:[#allocation4 + $0x80] sm:$0xff] %vm529_vm1, %v3540_v4  ;;  %547 = vst.msk [vmem:[#allocation4 + $0x88] sm:$0xff] %vm529_vm1, %v3540_v4 }
  0x7e   : > { %548 = vst.msk [vmem:[#allocation4 + $0x90] sm:$0xff] %vm529_vm1, %v3540_v4  ;;  %549 = vst.msk [vmem:[#allocation4 + $0x98] sm:$0xff] %vm529_vm1, %v3540_v4 }
  0x7f   : > { %550 = vst.msk [vmem:[#allocation4 + $0xa0] sm:$0xff] %vm529_vm1, %v3540_v4  ;;  %551 = vst.msk [vmem:[#allocation4 + $0xa8] sm:$0xff] %vm529_vm1, %v3540_v4 }
  0x80   : > { %552 = vst.msk [vmem:[#allocation4 + $0xb0] sm:$0xff] %vm529_vm1, %v3540_v4  ;;  %553 = vst.msk [vmem:[#allocation4 + $0xb8] sm:$0xff] %vm529_vm1, %v3540_v4 }
  0x81   : > { %554 = vst.msk [vmem:[#allocation4 + $0xc0] sm:$0xff] %vm529_vm1, %v3540_v4  ;;  %555 = vst.msk [vmem:[#allocation4 + $0xc8] sm:$0xff] %vm529_vm1, %v3540_v4 }
  0x82   : > { %556 = vst.msk [vmem:[#allocation4 + $0xd0] sm:$0xff] %vm529_vm1, %v3540_v4  ;;  %557 = vst.msk [vmem:[#allocation4 + $0xd8] sm:$0xff] %vm529_vm1, %v3540_v4 }
  0x83   : > { %558 = vst.msk [vmem:[#allocation4 + $0xe0] sm:$0xff] %vm529_vm1, %v3540_v4  ;;  %559 = vst.msk [vmem:[#allocation4 + $0xe8] sm:$0xff] %vm529_vm1, %v3540_v4 }
  0x84   : > { %560 = vst.msk [vmem:[#allocation4 + $0xf0] sm:$0xff] %vm529_vm1, %v3540_v4  ;;  %561 = vst.msk [vmem:[#allocation4 + $0xf8] sm:$0xff] %vm529_vm1, %v3540_v4 }
  0x85   : > { %465 = vst.msk [vmem:[#allocation5] sm:$0xff] %vm464_vm0, %v3541_v5  ;;  %466 = vst.msk [vmem:[#allocation5 + $0x8] sm:$0xff] %vm464_vm0, %v3541_v5 }
  0x86   : > { %467 = vst.msk [vmem:[#allocation5 + $0x10] sm:$0xff] %vm464_vm0, %v3541_v5  ;;  %468 = vst.msk [vmem:[#allocation5 + $0x18] sm:$0xff] %vm464_vm0, %v3541_v5 }
  0x87   : > { %469 = vst.msk [vmem:[#allocation5 + $0x20] sm:$0xff] %vm464_vm0, %v3541_v5  ;;  %470 = vst.msk [vmem:[#allocation5 + $0x28] sm:$0xff] %vm464_vm0, %v3541_v5 }
  0x88   : > { %471 = vst.msk [vmem:[#allocation5 + $0x30] sm:$0xff] %vm464_vm0, %v3541_v5  ;;  %472 = vst.msk [vmem:[#allocation5 + $0x38] sm:$0xff] %vm464_vm0, %v3541_v5 }
  0x89   : > { %473 = vst.msk [vmem:[#allocation5 + $0x40] sm:$0xff] %vm464_vm0, %v3541_v5  ;;  %474 = vst.msk [vmem:[#allocation5 + $0x48] sm:$0xff] %vm464_vm0, %v3541_v5 }
  0x8a   : > { %475 = vst.msk [vmem:[#allocation5 + $0x50] sm:$0xff] %vm464_vm0, %v3541_v5  ;;  %476 = vst.msk [vmem:[#allocation5 + $0x58] sm:$0xff] %vm464_vm0, %v3541_v5 }
  0x8b   : > { %477 = vst.msk [vmem:[#allocation5 + $0x60] sm:$0xff] %vm464_vm0, %v3541_v5  ;;  %478 = vst.msk [vmem:[#allocation5 + $0x68] sm:$0xff] %vm464_vm0, %v3541_v5 }
  0x8c   : > { %479 = vst.msk [vmem:[#allocation5 + $0x70] sm:$0xff] %vm464_vm0, %v3541_v5  ;;  %480 = vst.msk [vmem:[#allocation5 + $0x78] sm:$0xff] %vm464_vm0, %v3541_v5 }
  0x8d   : > { %481 = vst.msk [vmem:[#allocation5 + $0x80] sm:$0xff] %vm464_vm0, %v3541_v5  ;;  %482 = vst.msk [vmem:[#allocation5 + $0x88] sm:$0xff] %vm464_vm0, %v3541_v5 }
  0x8e   : > { %483 = vst.msk [vmem:[#allocation5 + $0x90] sm:$0xff] %vm464_vm0, %v3541_v5  ;;  %484 = vst.msk [vmem:[#allocation5 + $0x98] sm:$0xff] %vm464_vm0, %v3541_v5 }
  0x8f   : > { %485 = vst.msk [vmem:[#allocation5 + $0xa0] sm:$0xff] %vm464_vm0, %v3541_v5  ;;  %486 = vst.msk [vmem:[#allocation5 + $0xa8] sm:$0xff] %vm464_vm0, %v3541_v5 }
  0x90   : > { %487 = vst.msk [vmem:[#allocation5 + $0xb0] sm:$0xff] %vm464_vm0, %v3541_v5  ;;  %488 = vst.msk [vmem:[#allocation5 + $0xb8] sm:$0xff] %vm464_vm0, %v3541_v5 }
  0x91   : > { %489 = vst.msk [vmem:[#allocation5 + $0xc0] sm:$0xff] %vm464_vm0, %v3541_v5  ;;  %490 = vst.msk [vmem:[#allocation5 + $0xc8] sm:$0xff] %vm464_vm0, %v3541_v5 }
  0x92   : > { %491 = vst.msk [vmem:[#allocation5 + $0xd0] sm:$0xff] %vm464_vm0, %v3541_v5  ;;  %492 = vst.msk [vmem:[#allocation5 + $0xd8] sm:$0xff] %vm464_vm0, %v3541_v5 }
  0x93   : > { %493 = vst.msk [vmem:[#allocation5 + $0xe0] sm:$0xff] %vm464_vm0, %v3541_v5  ;;  %494 = vst.msk [vmem:[#allocation5 + $0xe8] sm:$0xff] %vm464_vm0, %v3541_v5 }
  0x94   : > { %495 = vst.msk [vmem:[#allocation5 + $0xf0] sm:$0xff] %vm464_vm0, %v3541_v5  ;;  %496 = vst.msk [vmem:[#allocation5 + $0xf8] sm:$0xff] %vm464_vm0, %v3541_v5 }
 0x128   : > { %v3973_v6 = vpop.f32.mrf.mxu0  ;;  %v3975_v7 = vpop.f32.mrf.mxu1 }
 0x129   : > { %v378_v8 = vand.u32 2147483647, %v3973_v6  ;;  %v380_v9 = vand.u32 2147483647, %v3975_v7  ;;  %vm422_vm3 = vcmp.ge.f32.partialorder %v3973_v6, 0.0  ;;  %vm424_vm4 = vcmp.ge.f32.partialorder %v3975_v7, 0.0 }
 0x12a   : > { %v3979_v10 = vpop.f32.mrf.mxu0  ;;  %v3981_v11 = vpop.f32.mrf.mxu1 }
 0x12b   : > { %v382_v12 = vsub.f32 0.0, %v378_v8  ;;  %v384_v13 = vsub.f32 0.0, %v380_v9  ;;  %v379_v14 = vand.u32 2147483647, %v3979_v10  ;;  %v381_v15 = vand.u32 2147483647, %v3981_v11 }
 0x12c   : > { %vm423_vm5 = vcmp.ge.f32.partialorder %v3979_v10, 0.0  ;;  %vm425_vm6 = vcmp.ge.f32.partialorder %v3981_v11, 0.0 }
 0x12d   : > { %v386_v16 = vmul.f32 1.442695, %v382_v12  ;;  %v390_v17 = vmul.f32 1.442695, %v384_v13  ;;  %v383_v18 = vsub.f32 0.0, %v379_v14  ;;  %v385_v19 = vsub.f32 0.0, %v381_v15 }
 0x12f   : > { %3045 = vpow2.f32 %v386_v16  ;;  %v388_v20 = vmul.f32 1.442695, %v383_v18  ;;  %v392_v21 = vmul.f32 1.442695, %v385_v19 }
 0x130   : > { %3047 = vpow2.f32 %v390_v17 }
 0x131   : > { %3049 = vpow2.f32 %v388_v20 }
 0x132   : > { %3051 = vpow2.f32 %v392_v21 }
 0x13c   : > { %v3046_v22 = vpop.eup %3045 }
 0x13d   : > { %v3048_v23 = vpop.eup %3047  ;;  %v394_v24 = vmul.f32 2.0, %v3046_v22  ;;  %v410_v25 = vmul.f32 %v3046_v22, %v3046_v22 }
 0x13e   : > { %v3050_v26 = vpop.eup %3049  ;;  %v396_v27 = vmul.f32 2.0, %v3048_v23  ;;  %v412_v28 = vmul.f32 %v3048_v23, %v3048_v23 }
 0x13f   : > { %v398_v29 = vadd.f32 1.0, %v394_v24  ;;  %v402_v30 = vmul.f32 %v3046_v22, %v394_v24  ;;  %v414_v31 = vadd.f32 %v410_v25, %v394_v24  ;;  %v395_v32 = vmul.f32 2.0, %v3050_v26  ;;  %v3052_v33 = vpop.eup %3051 }
 0x140   : > { %v400_v34 = vadd.f32 1.0, %v396_v27  ;;  %v404_v35 = vmul.f32 %v3048_v23, %v396_v27  ;;  %v416_v36 = vadd.f32 %v412_v28, %v396_v27  ;;  %v411_v37 = vmul.f32 %v3050_v26, %v3050_v26 }
 0x141   : > { %v406_v38 = vadd.f32 %v402_v30, %v398_v29  ;;  %v418_v39 = vadd.f32 2.0, %v414_v31  ;;  %v399_v40 = vadd.f32 1.0, %v395_v32  ;;  %v403_v43 = vmul.f32 %v3050_v26, %v395_v32 }
 0x142   : > { %v408_v41 = vadd.f32 %v404_v35, %v400_v34  ;;  %v420_v42 = vadd.f32 2.0, %v416_v36  ;;  %v415_v45 = vadd.f32 %v411_v37, %v395_v32  ;;  %v397_v46 = vmul.f32 2.0, %v3052_v33 }
 0x143   : > { %v430_v44 = vsel %vm422_vm3, %v406_v38, %v418_v39  ;;  %v413_v47 = vmul.f32 %v3052_v33, %v3052_v33  ;;  %v407_v49 = vadd.f32 %v403_v43, %v399_v40  ;;  %v426_v59 = vsel %vm422_vm3, %v398_v29, %v414_v31 }
 0x144   : > { %3053 = vrcp.f32 %v430_v44  ;;  %v432_v48 = vsel %vm424_vm4, %v408_v41, %v420_v42  ;;  %v419_v50 = vadd.f32 2.0, %v415_v45  ;;  %v401_v51 = vadd.f32 1.0, %v397_v46 }
 0x145   : > { %3055 = vrcp.f32 %v432_v48  ;;  %v405_v52 = vmul.f32 %v3052_v33, %v397_v46  ;;  %v417_v53 = vadd.f32 %v413_v47, %v397_v46  ;;  %v428_v62 = vsel %vm424_vm4, %v400_v34, %v416_v36 }
 0x146   : > { %v431_v54 = vsel %vm423_vm5, %v407_v49, %v419_v50  ;;  %v427_v5 = vsel %vm423_vm5, %v399_v40, %v415_v45 }
 0x147   : > { %3057 = vrcp.f32 %v431_v54  ;;  %v409_v55 = vadd.f32 %v405_v52, %v401_v51  ;;  %v421_v56 = vadd.f32 2.0, %v417_v53  ;;  %v429_v13 = vsel %vm425_vm6, %v401_v51, %v417_v53 }
 0x149   : > { %v433_v57 = vsel %vm425_vm6, %v409_v55, %v421_v56 }
 0x14a   : > { %3059 = vrcp.f32 %v433_v57 }
 0x151   : > { %v3054_v58 = vpop.eup %3053 }
 0x152   : > { %v3056_v60 = vpop.eup %3055  ;;  %v435_v61 = vmul.f32 %v3054_v58, %v426_v59 }
 0x153   : > { %v439_v63 = vmul.f32 %v3056_v60, %v428_v62 }
 0x154   : > { %v442_v2 = vmul.f32 %v435_v61, %v3973_v6  ;;  %v3058_v3 = vpop.eup %3057 }
 0x155   : > { %v444_v4 = vmul.f32 %v439_v63, %v3975_v7  ;;  %v437_v8 = vmul.f32 %v3058_v3, %v427_v5 }
 0x156   : > { %446 = vst [vmem:[#allocation2 + $0x10] sm:$0xff] %v442_v2 }
 0x157   : > { %448 = vst [vmem:[#allocation2 + $0x18] sm:$0xff] %v444_v4  ;;  %v3060_v9 = vpop.eup %3059  ;;  %v443_v12 = vmul.f32 %v437_v8, %v3979_v10 }
 0x158   : > { %v441_v14 = vmul.f32 %v3060_v9, %v429_v13 }
 0x159   : > { %447 = vst [vmem:[#allocation2] sm:$0xff] %v443_v12  ;;  %v2910_v15 = vpack.c.bf16 %v443_v12, %v442_v2 }
 0x15a   : > { %v445_v6 = vmul.f32 %v441_v14, %v3981_v11 }
 0x15b   : > { %462 = vst [vmem:[#allocation3] sm:$0xff] %v2910_v15 }
 0x15c   : > { %449 = vst [vmem:[#allocation2 + $0x8] sm:$0xff] %v445_v6  ;;  %v2911_v7 = vpack.c.bf16 %v445_v6, %v444_v4 }
 0x15e   : > { %463 = vst [vmem:[#allocation3 + $0x8] sm:$0xff] %v2911_v7 }
 0x15f PF: > { %v563_v16 = vld [vmem:[%s252_s9 + $0x8] sm:$0xff]  ;;  %v562_v17 = vld [vmem:[%s252_s9] sm:$0xff]  ;;  %vm564_vm7 = vcmask 64512   ;;  %v3542_v10 = vmov 0.0   ;;  %v3543_v19 = vmov 0   ;;  %vm762_vm12 = vcmask 130048  }
 0x160   : > { %601 = vmatprep.subr.mxu0 %v563_v16  ;;  %635 = vmatprep.mubr.f32.mxu0 %v3542_v10  ;;  %vm1804_vm13 = vcmask 7168   ;;  %p2903_p8 = scmp.ne.s32.totalorder %s3512_s23, 1 }
 0x161   : > { %602 = vmatpush1.msra.mxu0 %v562_v17  ;;  %843 = vmatprep.mubr.bf16.mxu1 %v3543_v19  ;;  %s2642_s23 = sld [smem:[#allocation7]] (!%p2903_p8) }
 0x162   : > { %2883 = vmatmul.mubr.msk.f32.vlgmr.msra.gmra.mxu0 %vm564_vm7, %v3795_v0  ;;  %3062 = vset.pattern.permute.xlu1 %v3543_v19 }
 0x163   : > { %641 = vmatprep.mubr.f32.mxu0 %v3542_v10 }
 0x165   : > { %v3063_v18 = vld [vmem:[#allocation3] ss:$8 sps:$4 sm:$0xff]   ;;  %v3065_v11 = vld [vmem:[#allocation3 + $0x4] ss:$8 sps:$4 sm:$0xff]  }
 0x166   : > { %730 = vxpose.xlu0.c.b16.start.end [1/1] (short) %v3063_v18, 128  ;;  %2884 = vmatmul.mubr.msk.f32.gmra.mxu0 %vm564_vm7, %v3800_v1 }
 0x183   : > { %746 = vxpose.xlu0.c.b16.start.end [1/1] (short) %v3065_v11, 128 }
 0x18c   : > { %3061 = vset.pattern.permute.xlu0 %v3543_v19 }
 0x222   : > { %v4018_v20 = vpop.f32.mrf.mxu0 }
 0x223   : > { %v648_v21 = vand.u32 2147483647, %v4018_v20  ;;  %vm692_vm8 = vcmp.ge.f32.partialorder %v4018_v20, 0.0 }
 0x224   : > { %v4021_v22 = vpop.f32.mrf.mxu0 }
 0x225   : > { %v652_v0 = vsub.f32 0.0, %v648_v21  ;;  %v649_v23 = vand.u32 2147483647, %v4021_v22  ;;  %vm693_vm9 = vcmp.ge.f32.partialorder %v4021_v22, 0.0 }
 0x226   : > { %v4024_v24 = vpop.f32.mrf.mxu0 }
 0x227   : > { %v656_v1 = vmul.f32 1.442695, %v652_v0  ;;  %v653_v25 = vsub.f32 0.0, %v649_v23  ;;  %v650_v26 = vand.u32 2147483647, %v4024_v24  ;;  %vm694_vm10 = vcmp.ge.f32.partialorder %v4024_v24, 0.0 }
 0x228   : > { %v4027_v27 = vpop.f32.mrf.mxu0 }
 0x229   : > { %3066 = vpow2.f32 %v656_v1  ;;  %v658_v28 = vmul.f32 1.442695, %v653_v25  ;;  %v654_v29 = vsub.f32 0.0, %v650_v26  ;;  %v651_v30 = vand.u32 2147483647, %v4027_v27 }
 0x22a   : > { %vm695_vm11 = vcmp.ge.f32.partialorder %v4027_v27, 0.0 }
 0x22b   : > { %3068 = vpow2.f32 %v658_v28  ;;  %v660_v31 = vmul.f32 1.442695, %v654_v29  ;;  %v655_v32 = vsub.f32 0.0, %v651_v30  ;;  %v738_v29 = vpop.trf.xlu0 }
 0x22d   : > { %3070 = vpow2.f32 %v660_v31  ;;  %v662_v33 = vmul.f32 1.442695, %v655_v32 }
 0x22f   : > { %3072 = vpow2.f32 %v662_v33  ;;  %v739_v30 = vpop.trf.xlu0 }
 0x236   : > { %v3067_v34 = vpop.eup %3066 }
 0x237   : > { %v664_v35 = vmul.f32 2.0, %v3067_v34  ;;  %v680_v36 = vmul.f32 %v3067_v34, %v3067_v34 }
 0x238   : > { %v3069_v37 = vpop.eup %3068 }
 0x239   : > { %v668_v38 = vadd.f32 1.0, %v664_v35  ;;  %v672_v39 = vmul.f32 %v3067_v34, %v664_v35  ;;  %v684_v40 = vadd.f32 %v680_v36, %v664_v35  ;;  %v665_v41 = vmul.f32 2.0, %v3069_v37 }
 0x23a   : > { %v3071_v42 = vpop.eup %3070  ;;  %v681_v43 = vmul.f32 %v3069_v37, %v3069_v37 }
 0x23b   : > { %v676_v44 = vadd.f32 %v672_v39, %v668_v38  ;;  %v688_v45 = vadd.f32 2.0, %v684_v40  ;;  %v669_v46 = vadd.f32 1.0, %v665_v41  ;;  %v673_v48 = vmul.f32 %v3069_v37, %v665_v41 }
 0x23c   : > { %v3073_v47 = vpop.eup %3072  ;;  %v685_v49 = vadd.f32 %v681_v43, %v665_v41  ;;  %v666_v50 = vmul.f32 2.0, %v3071_v42  ;;  %v682_v51 = vmul.f32 %v3071_v42, %v3071_v42  ;;  %v696_v6 = vsel %vm692_vm8, %v668_v38, %v684_v40 }
 0x23d   : > { %v667_v52 = vmul.f32 2.0, %v3073_v47  ;;  %v683_v53 = vmul.f32 %v3073_v47, %v3073_v47  ;;  %v700_v54 = vsel %vm692_vm8, %v676_v44, %v688_v45  ;;  %v677_v55 = vadd.f32 %v673_v48, %v669_v46 }
 0x23e   : > { %v689_v56 = vadd.f32 2.0, %v685_v49  ;;  %v670_v57 = vadd.f32 1.0, %v666_v50  ;;  %v674_v58 = vmul.f32 %v3071_v42, %v666_v50  ;;  %v686_v59 = vadd.f32 %v682_v51, %v666_v50 }
 0x23f   : > { %v671_v60 = vadd.f32 1.0, %v667_v52  ;;  %v675_v62 = vmul.f32 %v3073_v47, %v667_v52  ;;  %v687_v63 = vadd.f32 %v683_v53, %v667_v52  ;;  %v697_v14 = vsel %vm693_vm9, %v669_v46, %v685_v49 }
 0x240   : > { %v701_v61 = vsel %vm693_vm9, %v677_v55, %v689_v56  ;;  %v678_v2 = vadd.f32 %v674_v58, %v670_v57  ;;  %v690_v3 = vadd.f32 2.0, %v686_v59  ;;  %v698_v7 = vsel %vm694_vm10, %v670_v57, %v686_v59 }
 0x241   : > { %3074 = vrcp.f32 %v701_v61  ;;  %v679_v4 = vadd.f32 %v675_v62, %v671_v60  ;;  %v691_v5 = vadd.f32 2.0, %v687_v63  ;;  %v699_v10 = vsel %vm695_vm11, %v671_v60, %v687_v63 }
 0x242   : > { %3076 = vrcp.f32 %v700_v54  ;;  %v702_v8 = vsel %vm694_vm10, %v678_v2, %v690_v3 }
 0x243   : > { %3078 = vrcp.f32 %v702_v8  ;;  %v703_v9 = vsel %vm695_vm11, %v679_v4, %v691_v5 }
 0x244   : > { %3080 = vrcp.f32 %v703_v9 }
 0x24e   : > { %v3075_v12 = vpop.eup %3074 }
 0x24f   : > { %v3077_v13 = vpop.eup %3076  ;;  %v707_v16 = vmul.f32 %v3075_v12, %v697_v14 }
 0x250   : > { %v3079_v15 = vpop.eup %3078  ;;  %v705_v18 = vmul.f32 %v3077_v13, %v696_v6 }
 0x251   : > { %v3081_v17 = vpop.eup %3080  ;;  %v709_v11 = vmul.f32 %v3079_v15, %v698_v7  ;;  %v713_v23 = vmul.f32 %v707_v16, %v4021_v22  ;;  %v740_v22 = vpop.trf.xlu0 }
 0x252   : > { %v711_v21 = vmul.f32 %v3081_v17, %v699_v10  ;;  %v712_v25 = vmul.f32 %v705_v18, %v4018_v20 }
 0x253   : > { %v714_v0 = vmul.f32 %v709_v11, %v4024_v24 }
 0x254   : > { %v715_v1 = vmul.f32 %v711_v21, %v4027_v27 }
 0x255   : > { %v716_v28 = vpack.c.bf16 %v714_v0, %v712_v25  ;;  %v741_v20 = vpop.trf.xlu0 }
 0x256   : > { %v717_v26 = vpack.c.bf16 %v715_v1, %v713_v23 }
 0x258   : > { %825 = vmatprep.subr.bf16.mxu1 %v717_v26  ;;  %2107 = vmatprep.subr.bf16.mxu0 %v717_v26 }
 0x259   : > { %826 = vmatpush1.bf16.msra.mxu1 %v716_v28  ;;  %2108 = vmatpush1.bf16.xpose.msra.mxu0 %v716_v28  ;;  %v742_v24 = vpop.trf.xlu0 }
 0x25c   : > { %2887 = vmatmul.mubr.msk.bf16.vlgmr.msra.gmra.mxu1 %vm762_vm12, %v738_v29 }
 0x25d   : > { %853 = vmatprep.mubr.bf16.mxu1 %v3543_v19  ;;  %v743_v27 = vpop.trf.xlu0 }
 0x261   : > { %v744_v31 = vpop.trf.xlu0 }
 0x264   : > { %2888 = vmatmul.mubr.msk.bf16.gmra.mxu1 %vm762_vm12, %v739_v30 }
 0x265   : > { %863 = vmatprep.mubr.bf16.mxu1 %v3543_v19  ;;  %v745_v32 = vpop.trf.xlu0 }
 0x269   : > { %v754_v33 = vpop.trf.xlu0 }
 0x26c   : > { %2889 = vmatmul.mubr.msk.bf16.gmra.mxu1 %vm762_vm12, %v740_v22 }
 0x26d   : > { %873 = vmatprep.mubr.bf16.mxu1 %v3543_v19  ;;  %v755_v34 = vpop.trf.xlu0 }
 0x271   : > { %v756_v35 = vpop.trf.xlu0 }
 0x274   : > { %2890 = vmatmul.mubr.msk.bf16.gmra.mxu1 %vm762_vm12, %v741_v20 }
 0x275   : > { %883 = vmatprep.mubr.bf16.mxu1 %v3543_v19  ;;  %v757_v36 = vpop.trf.xlu0 }
 0x279   : > { %v758_v37 = vpop.trf.xlu0 }
 0x27c   : > { %2891 = vmatmul.mubr.msk.bf16.gmra.mxu1 %vm762_vm12, %v742_v24 }
 0x27d   : > { %893 = vmatprep.mubr.bf16.mxu1 %v3543_v19  ;;  %v759_v38 = vpop.trf.xlu0 }
 0x281   : > { %v760_v39 = vpop.trf.xlu0 }
 0x284   : > { %2892 = vmatmul.mubr.msk.bf16.gmra.mxu1 %vm762_vm12, %v743_v27 }
 0x285   : > { %903 = vmatprep.mubr.bf16.mxu1 %v3543_v19  ;;  %v761_v40 = vpop.trf.xlu0 }
 0x28c   : > { %2893 = vmatmul.mubr.msk.bf16.gmra.mxu1 %vm762_vm12, %v744_v31 }
 0x28d   : > { %913 = vmatprep.mubr.bf16.mxu1 %v3543_v19 }
 0x294   : > { %2894 = vmatmul.mubr.msk.bf16.gmra.mxu1 %vm762_vm12, %v745_v32 }
 0x295   : > { %923 = vmatprep.mubr.bf16.mxu1 %v3543_v19 }
 0x29c   : > { %2895 = vmatmul.mubr.msk.bf16.gmra.mxu1 %vm762_vm12, %v754_v33 }
 0x29d   : > { %933 = vmatprep.mubr.bf16.mxu1 %v3543_v19 }
 0x2a4   : > { %2896 = vmatmul.mubr.msk.bf16.gmra.mxu1 %vm762_vm12, %v755_v34 }
 0x2a5   : > { %943 = vmatprep.mubr.bf16.mxu1 %v3543_v19 }
 0x2ac   : > { %2897 = vmatmul.mubr.msk.bf16.gmra.mxu1 %vm762_vm12, %v756_v35 }
 0x2ad   : > { %953 = vmatprep.mubr.bf16.mxu1 %v3543_v19 }
 0x2b4   : > { %2898 = vmatmul.mubr.msk.bf16.gmra.mxu1 %vm762_vm12, %v757_v36 }
 0x2b5   : > { %963 = vmatprep.mubr.bf16.mxu1 %v3543_v19 }
 0x2bc   : > { %2899 = vmatmul.mubr.msk.bf16.gmra.mxu1 %vm762_vm12, %v758_v37 }
 0x2bd   : > { %973 = vmatprep.mubr.bf16.mxu1 %v3543_v19 }
 0x2c4   : > { %2900 = vmatmul.mubr.msk.bf16.gmra.mxu1 %vm762_vm12, %v759_v38 }
 0x2c5   : > { %983 = vmatprep.mubr.bf16.mxu1 %v3543_v19 }
 0x2cc   : > { %2901 = vmatmul.mubr.msk.bf16.gmra.mxu1 %vm762_vm12, %v760_v39 }
 0x2cd   : > { %993 = vmatprep.mubr.bf16.mxu1 %v3543_v19 }
 0x2d4   : > { %2902 = vmatmul.mubr.msk.bf16.gmra.mxu1 %vm762_vm12, %v761_v40 }
 0x31c   : > { %v4077_v41 = vpop.f32.mrf.mxu1 }
 0x31e   : > { %v4079_v42 = vpop.f32.mrf.mxu1 }
 0x31f   : > { %v1036_v43 = vmax.f32 %v4077_v41, %v4079_v42 }
 0x320   : > { %v4083_v44 = vpop.f32.mrf.mxu1 }
 0x321   : > { %1037 = vmax.xlane.f32.xlu1 %v1036_v43 }
 0x322   : > { %v4085_v45 = vpop.f32.mrf.mxu1 }
 0x323   : > { %v1039_v46 = vmax.f32 %v4083_v44, %v4085_v45 }
 0x324   : > { %v4089_v47 = vpop.f32.mrf.mxu1 }
 0x325   : > { %1040 = vmax.xlane.f32.xlu1 %v1039_v46 }
 0x326   : > { %v4091_v19 = vpop.f32.mrf.mxu1 }
 0x327   : > { %v1042_v48 = vmax.f32 %v4089_v47, %v4091_v19 }
 0x328   : > { %v4095_v49 = vpop.f32.mrf.mxu1 }
 0x329   : > { %1043 = vmax.xlane.f32.xlu1 %v1042_v48 }
 0x32a   : > { %v4097_v50 = vpop.f32.mrf.mxu1 }
 0x32b   : > { %v1045_v51 = vmax.f32 %v4095_v49, %v4097_v50 }
 0x32c   : > { %v4101_v52 = vpop.f32.mrf.mxu1 }
 0x32d   : > { %1046 = vmax.xlane.f32.xlu1 %v1045_v51 }
 0x32e   : > { %v4103_v53 = vpop.f32.mrf.mxu1 }
 0x32f   : > { %v1048_v54 = vmax.f32 %v4101_v52, %v4103_v53 }
 0x330   : > { %v4107_v55 = vpop.f32.mrf.mxu1 }
 0x331   : > { %1049 = vmax.xlane.f32.xlu1 %v1048_v54 }
 0x332   : > { %v4109_v56 = vpop.f32.mrf.mxu1 }
 0x333   : > { %v1051_v57 = vmax.f32 %v4107_v55, %v4109_v56 }
 0x334   : > { %v4113_v58 = vpop.f32.mrf.mxu1 }
 0x335   : > { %1052 = vmax.xlane.f32.xlu1 %v1051_v57 }
 0x336   : > { %v4115_v59 = vpop.f32.mrf.mxu1 }
 0x337   : > { %v1054_v60 = vmax.f32 %v4113_v58, %v4115_v59 }
 0x338   : > { %v4119_v61 = vpop.f32.mrf.mxu1 }
 0x339   : > { %1055 = vmax.xlane.f32.xlu1 %v1054_v60 }
 0x33a   : > { %v4121_v62 = vpop.f32.mrf.mxu1 }
 0x33b   : > { %v1057_v63 = vmax.f32 %v4119_v61, %v4121_v62 }
 0x33c   : > { %v4125_v2 = vpop.f32.mrf.mxu1 }
 0x33d   : > { %1058 = vmax.xlane.f32.xlu1 %v1057_v63 }
 0x33e   : > { %v4127_v3 = vpop.f32.mrf.mxu1 }
 0x33f   : > { %v1060_v4 = vmax.f32 %v4125_v2, %v4127_v3 }
 0x340   : > { %v4131_v5 = vpop.f32.mrf.mxu1 }
 0x341   : > { %1061 = vmax.xlane.f32.xlu1 %v1060_v4 }
 0x342   : > { %v4133_v8 = vpop.f32.mrf.mxu1 }
 0x343   : > { %v1063_v9 = vmax.f32 %v4131_v5, %v4133_v8 }
 0x344   : > { %v4137_v12 = vpop.f32.mrf.mxu1 }
 0x345   : > { %1064 = vmax.xlane.f32.xlu0 %v1063_v9 }
 0x346   : > { %v4139_v13 = vpop.f32.mrf.mxu1 }
 0x347   : > { %v1066_v14 = vmax.f32 %v4137_v12, %v4139_v13 }
 0x348   : > { %v4143_v15 = vpop.f32.mrf.mxu1 }
 0x349   : > { %1067 = vmax.xlane.f32.xlu1 %v1066_v14 }
 0x34a   : > { %v4145_v6 = vpop.f32.mrf.mxu1 }
 0x34b   : > { %v1069_v7 = vmax.f32 %v4143_v15, %v4145_v6 }
 0x34c   : > { %v4149_v16 = vpop.f32.mrf.mxu1 }
 0x34d   : > { %5328 = vst [vmem:[#allocation25_spill] sm:$0xff] %v4149_v16  ;;  %1070 = vmax.xlane.f32.xlu1 %v1069_v7 }
 0x34e   : > { %v4151_v17 = vpop.f32.mrf.mxu1 }
 0x34f   : > { %5329 = vst [vmem:[#allocation26_spill] sm:$0xff] %v4151_v17  ;;  %v1072_v10 = vmax.f32 %v4149_v16, %v4151_v17 }
 0x350   : > { %v4155_v18 = vpop.f32.mrf.mxu1 }
 0x351   : > { %5330 = vst [vmem:[#allocation27_spill] sm:$0xff] %v4155_v18  ;;  %1073 = vmax.xlane.f32.xlu1 %v1072_v10 }
 0x352   : > { %v4157_v11 = vpop.f32.mrf.mxu1 }
 0x353   : > { %5331 = vst [vmem:[#allocation28_spill] sm:$0xff] %v4157_v11  ;;  %v1075_v21 = vmax.f32 %v4155_v18, %v4157_v11  ;;  %v4411_v11 = vld [vmem:[#allocation5 + $0x80] sm:$0xff] }
 0x354   : > { %v4161_v0 = vpop.f32.mrf.mxu1  ;;  %5373 = vst [vmem:[#allocation70_spill] sm:$0xff] %v4411_v11 }
 0x355   : > { %5332 = vst [vmem:[#allocation29_spill] sm:$0xff] %v4161_v0  ;;  %1076 = vmax.xlane.f32.xlu1 %v1075_v21 }
 0x356   : > { %v4163_v23 = vpop.f32.mrf.mxu1 }
 0x357   : > { %5333 = vst [vmem:[#allocation30_spill] sm:$0xff] %v4163_v23  ;;  %v1078_v1 = vmax.f32 %v4161_v0, %v4163_v23 }
 0x358   : > { %v4167_v25 = vpop.f32.mrf.mxu1 }
 0x359   : > { %5334 = vst [vmem:[#allocation31_spill] sm:$0xff] %v4167_v25  ;;  %1079 = vmax.xlane.f32.xlu1 %v1078_v1 }
 0x35a   : > { %v4169_v26 = vpop.f32.mrf.mxu1 }
 0x35b   : > { %5335 = vst [vmem:[#allocation32_spill] sm:$0xff] %v4169_v26  ;;  %v1081_v28 = vmax.f32 %v4167_v25, %v4169_v26  ;;  %v4391_v25 = vld [vmem:[#allocation5 + $0x70] sm:$0xff] }
 0x35c   : > { %v4173_v29 = vpop.f32.mrf.mxu1  ;;  %5370 = vst [vmem:[#allocation67_spill] sm:$0xff] %v4391_v25 }
 0x35d   : > { %5336 = vst [vmem:[#allocation33_spill] sm:$0xff] %v4173_v29  ;;  %1082 = vmax.xlane.f32.xlu1 %v1081_v28 }
 0x35e   : > { %v4175_v30 = vpop.f32.mrf.mxu1 }
 0x35f   : > { %5337 = vst [vmem:[#allocation34_spill] sm:$0xff] %v4175_v30  ;;  %v1084_v22 = vmax.f32 %v4173_v29, %v4175_v30 }
 0x360   : > { %v4179_v20 = vpop.f32.mrf.mxu1 }
 0x361   : > { %5338 = vst [vmem:[#allocation35_spill] sm:$0xff] %v4179_v20  ;;  %1085 = vmax.xlane.f32.xlu1 %v1084_v22 }
 0x362   : > { %v4181_v24 = vpop.f32.mrf.mxu1 }
 0x363   : > { %5339 = vst [vmem:[#allocation36_spill] sm:$0xff] %v4181_v24  ;;  %v1087_v27 = vmax.f32 %v4179_v20, %v4181_v24  ;;  %v4372_v20 = vld [vmem:[#allocation5 + $0x60] sm:$0xff] }
 0x364   : > { %v4185_v31 = vpop.f32.mrf.mxu1  ;;  %5367 = vst [vmem:[#allocation64_spill] sm:$0xff] %v4372_v20 }
 0x365   : > { %5340 = vst [vmem:[#allocation37_spill] sm:$0xff] %v4185_v31  ;;  %1088 = vmax.xlane.f32.xlu1 %v1087_v27 }
 0x366   : > { %v4187_v32 = vpop.f32.mrf.mxu1 }
 0x367   : > { %5341 = vst [vmem:[#allocation38_spill] sm:$0xff] %v4187_v32  ;;  %v1090_v33 = vmax.f32 %v4185_v31, %v4187_v32  ;;  %v4352_v31 = vld [vmem:[#allocation5 + $0x50] sm:$0xff] }
 0x368   : > { %v4191_v34 = vpop.f32.mrf.mxu1 }
 0x369   : > { %5342 = vst [vmem:[#allocation39_spill] sm:$0xff] %v4191_v34  ;;  %1091 = vmax.xlane.f32.xlu1 %v1090_v33 }
 0x36a   : > { %v4193_v35 = vpop.f32.mrf.mxu1 }
 0x36b   : > { %5343 = vst [vmem:[#allocation40_spill] sm:$0xff] %v4193_v35  ;;  %v1093_v36 = vmax.f32 %v4191_v34, %v4193_v35  ;;  %v4332_v34 = vld [vmem:[#allocation5 + $0x40] sm:$0xff] }
 0x36c   : > { %v4197_v37 = vpop.f32.mrf.mxu1 }
 0x36d   : > { %5344 = vst [vmem:[#allocation41_spill] sm:$0xff] %v4197_v37  ;;  %1094 = vmax.xlane.f32.xlu1 %v1093_v36 }
 0x36e   : > { %v4199_v38 = vpop.f32.mrf.mxu1 }
 0x36f   : > { %5345 = vst [vmem:[#allocation42_spill] sm:$0xff] %v4199_v38  ;;  %v1096_v39 = vmax.f32 %v4197_v37, %v4199_v38  ;;  %v4312_v37 = vld [vmem:[#allocation5 + $0x30] sm:$0xff] }
 0x370   : > { %v4203_v40 = vpop.f32.mrf.mxu1 }
 0x371   : > { %5346 = vst [vmem:[#allocation43_spill] sm:$0xff] %v4203_v40  ;;  %1097 = vmax.xlane.f32.xlu1 %v1096_v39 }
 0x372   : > { %v4205_v43 = vpop.f32.mrf.mxu1 }
 0x373   : > { %5347 = vst [vmem:[#allocation44_spill] sm:$0xff] %v4205_v43  ;;  %v1099_v46 = vmax.f32 %v4203_v40, %v4205_v43  ;;  %v4302_v40 = vld [vmem:[#allocation5 + $0x28] sm:$0xff] }
 0x374   : > { %v4209_v48 = vpop.f32.mrf.mxu1 }
 0x375   : > { %5348 = vst [vmem:[#allocation45_spill] sm:$0xff] %v4209_v48  ;;  %1100 = vmax.xlane.f32.xlu0 %v1099_v46 }
 0x376   : > { %v4211_v51 = vpop.f32.mrf.mxu1 }
 0x377   : > { %5349 = vst [vmem:[#allocation46_spill] sm:$0xff] %v4211_v51  ;;  %v1102_v54 = vmax.f32 %v4209_v48, %v4211_v51  ;;  %v4382_v48 = vld [vmem:[#allocation5 + $0x68] sm:$0xff] }
 0x378   : > { %v4215_v57 = vpop.f32.mrf.mxu1  ;;  %5368 = vst [vmem:[#allocation65_spill] sm:$0xff] %v4382_v48 }
 0x379   : > { %5350 = vst [vmem:[#allocation47_spill] sm:$0xff] %v4215_v57  ;;  %1103 = vmax.xlane.f32.xlu0 %v1102_v54 }
 0x37a   : > { %v4217_v60 = vpop.f32.mrf.mxu1 }
 0x37b   : > { %5351 = vst [vmem:[#allocation48_spill] sm:$0xff] %v4217_v60  ;;  %v1105_v63 = vmax.f32 %v4215_v57, %v4217_v60  ;;  %v4292_v57 = vld [vmem:[#allocation5 + $0x20] sm:$0xff] }
 0x37c   : > { %v4221_v4 = vpop.f32.mrf.mxu1 }
 0x37d   : > { %5352 = vst [vmem:[#allocation49_spill] sm:$0xff] %v4221_v4  ;;  %1106 = vmax.xlane.f32.xlu1 %v1105_v63 }
 0x37e   : > { %v4223_v9 = vpop.f32.mrf.mxu1 }
 0x37f   : > { %5353 = vst [vmem:[#allocation50_spill] sm:$0xff] %v4223_v9  ;;  %v1108_v14 = vmax.f32 %v4221_v4, %v4223_v9  ;;  %v4362_v4 = vld [vmem:[#allocation5 + $0x58] sm:$0xff] }
 0x380   : > { %v4227_v7 = vpop.f32.mrf.mxu1  ;;  %5365 = vst [vmem:[#allocation62_spill] sm:$0xff] %v4362_v4 }
 0x381   : > { %5354 = vst [vmem:[#allocation51_spill] sm:$0xff] %v4227_v7  ;;  %1109 = vmax.xlane.f32.xlu0 %v1108_v14 }
 0x382   : > { %v4229_v10 = vpop.f32.mrf.mxu1 }
 0x383   : > { %5355 = vst [vmem:[#allocation52_spill] sm:$0xff] %v4229_v10  ;;  %v1111_v21 = vmax.f32 %v4227_v7, %v4229_v10  ;;  %v4282_v7 = vld [vmem:[#allocation5 + $0x18] sm:$0xff] }
 0x384   : > { %v4233_v1 = vpop.f32.mrf.mxu1 }
 0x385   : > { %5356 = vst [vmem:[#allocation53_spill] sm:$0xff] %v4233_v1  ;;  %1112 = vmax.xlane.f32.xlu1 %v1111_v21 }
 0x386   : > { %v4235_v28 = vpop.f32.mrf.mxu1 }
 0x387   : > { %5357 = vst [vmem:[#allocation54_spill] sm:$0xff] %v4235_v28  ;;  %v1114_v22 = vmax.f32 %v4233_v1, %v4235_v28  ;;  %v4342_v1 = vld [vmem:[#allocation5 + $0x48] sm:$0xff] }
 0x388   : > { %v4239_v27 = vpop.f32.mrf.mxu1 }
 0x389   : > { %5358 = vst [vmem:[#allocation55_spill] sm:$0xff] %v4239_v27  ;;  %1115 = vmax.xlane.f32.xlu0 %v1114_v22  ;;  %v4257_v22 = vld [vmem:[#allocation5] sm:$0xff] }
 0x38a   : > { %v4241_v33 = vpop.f32.mrf.mxu1 }
 0x38b   : > { %5359 = vst [vmem:[#allocation56_spill] sm:$0xff] %v4241_v33  ;;  %v1117_v36 = vmax.f32 %v4239_v27, %v4241_v33  ;;  %v4262_v27 = vld [vmem:[#allocation5 + $0x8] sm:$0xff] }
 0x38c   : > { %v4245_v39 = vpop.f32.mrf.mxu1 }
 0x38d   : > { %5360 = vst [vmem:[#allocation57_spill] sm:$0xff] %v4245_v39  ;;  %1118 = vmax.xlane.f32.xlu1 %v1117_v36 }
 0x38e   : > { %v4247_v46 = vpop.f32.mrf.mxu1 }
 0x38f   : > { %5361 = vst [vmem:[#allocation58_spill] sm:$0xff] %v4247_v46  ;;  %v1120_v54 = vmax.f32 %v4245_v39, %v4247_v46  ;;  %v4322_v39 = vld [vmem:[#allocation5 + $0x38] sm:$0xff] }
 0x390   : > { %v4251_v63 = vpop.f32.mrf.mxu1 }
 0x391   : > { %5362 = vst [vmem:[#allocation59_spill] sm:$0xff] %v4251_v63  ;;  %1121 = vmax.xlane.f32.xlu0 %v1120_v54 }
 0x392   : > { %v4253_v14 = vpop.f32.mrf.mxu1 }
 0x393   : > { %5363 = vst [vmem:[#allocation60_spill] sm:$0xff] %v4253_v14  ;;  %v1123_v21 = vmax.f32 %v4251_v63, %v4253_v14  ;;  %v4272_v14 = vld [vmem:[#allocation5 + $0x10] sm:$0xff] }
 0x394   : > { %v4402_v23 = vpop.f32.mrf.mxu1 }
 0x395   : > { %1124 = vmax.xlane.f32.xlu1 %v1123_v21  ;;  %5372 = vst [vmem:[#allocation69_spill] sm:$0xff] %v4402_v23 }
 0x396   : > { %v4413_v18 = vpop.f32.mrf.mxu1 }
 0x397   : > { %5374 = vst [vmem:[#allocation71_spill] sm:$0xff] %v4413_v18  ;;  %v1126_v16 = vmax.f32 %v4402_v23, %v4413_v18 }
 0x3aa   : > { %v1038_v33 = vpop.xlane.xlu1 %1037 }
 0x3ab   : > { %v4260_v36 = vmax.f32 %v4257_v22, %v1038_v33 }
 0x3ad   : > { %2318 = vst.msk [vmem:[#allocation5] sm:$0xff] %vm1804_vm13, %v4260_v36  ;;  %1262 = vperm.xlu0 %3061, %v4260_v36  }
 0x3ae   : > { %v1041_v54 = vpop.xlane.xlu1 %1040 }
 0x3af   : > { %v4270_v21 = vmax.f32 %v4262_v27, %v1041_v54 }
 0x3b1   : > { %2319 = vst.msk [vmem:[#allocation5 + $0x8] sm:$0xff] %vm1804_vm13, %v4270_v21  ;;  %1267 = vperm.xlu1 %3062, %v4270_v21  }
 0x3b2   : > { %v1044_v10 = vpop.xlane.xlu1 %1043 }
 0x3b3   : > { %v4280_v63 = vmax.f32 %v4272_v14, %v1044_v10 }
 0x3b5   : > { %2320 = vst.msk [vmem:[#allocation5 + $0x10] sm:$0xff] %vm1804_vm13, %v4280_v63  ;;  %1272 = vperm.xlu1 %3062, %v4280_v63  }
 0x3b6   : > { %v1047_v33 = vpop.xlane.xlu1 %1046 }
 0x3b7   : > { %v4290_v60 = vmax.f32 %v4282_v7, %v1047_v33 }
 0x3b9   : > { %2321 = vst.msk [vmem:[#allocation5 + $0x18] sm:$0xff] %vm1804_vm13, %v4290_v60  ;;  %1277 = vperm.xlu1 %3062, %v4290_v60  }
 0x3ba   : > { %v1050_v54 = vpop.xlane.xlu1 %1049 }
 0x3bb   : > { %v4300_v43 = vmax.f32 %v4292_v57, %v1050_v54 }
 0x3bd   : > { %2322 = vst.msk [vmem:[#allocation5 + $0x20] sm:$0xff] %vm1804_vm13, %v4300_v43  ;;  %1282 = vperm.xlu0 %3061, %v4300_v43  }
 0x3be   : > { %v1053_v10 = vpop.xlane.xlu1 %1052 }
 0x3bf   : > { %v4310_v38 = vmax.f32 %v4302_v40, %v1053_v10 }
 0x3c1   : > { %2323 = vst.msk [vmem:[#allocation5 + $0x28] sm:$0xff] %vm1804_vm13, %v4310_v38  ;;  %1287 = vperm.xlu0 %3061, %v4310_v38  }
 0x3c2   : > { %v1056_v33 = vpop.xlane.xlu1 %1055 }
 0x3c3   : > { %v4320_v46 = vmax.f32 %v4312_v37, %v1056_v33 }
 0x3c5   : > { %2324 = vst.msk [vmem:[#allocation5 + $0x30] sm:$0xff] %vm1804_vm13, %v4320_v46  ;;  %1292 = vperm.xlu1 %3062, %v4320_v46  }
 0x3c6   : > { %v1059_v54 = vpop.xlane.xlu1 %1058 }
 0x3c7   : > { %v4330_v35 = vmax.f32 %v4322_v39, %v1059_v54 }
 0x3c9   : > { %2325 = vst.msk [vmem:[#allocation5 + $0x38] sm:$0xff] %vm1804_vm13, %v4330_v35  ;;  %1297 = vperm.xlu1 %3062, %v4330_v35  }
 0x3ca   : > { %v1062_v10 = vpop.xlane.xlu1 %1061 }
 0x3cb   : > { %v4340_v28 = vmax.f32 %v4332_v34, %v1062_v10 }
 0x3cd   : > { %2326 = vst.msk [vmem:[#allocation5 + $0x40] sm:$0xff] %vm1804_vm13, %v4340_v28  ;;  %1302 = vperm.xlu0 %3061, %v4340_v28  }
 0x3ce   : > { %v1065_v33 = vpop.xlane.xlu0 %1064 }
 0x3cf   : > { %v4350_v32 = vmax.f32 %v4342_v1, %v1065_v33 }
 0x3d1   : > { %2327 = vst.msk [vmem:[#allocation5 + $0x48] sm:$0xff] %vm1804_vm13, %v4350_v32  ;;  %1307 = vperm.xlu0 %3061, %v4350_v32  }
 0x3d2   : > { %v1068_v54 = vpop.xlane.xlu1 %1067 }
 0x3d3   : > { %v4360_v9 = vmax.f32 %v4352_v31, %v1068_v54 }
 0x3d5   : > { %5364 = vst [vmem:[#allocation61_spill] sm:$0xff] %v4360_v9  ;;  %2328 = vst.msk [vmem:[#allocation5 + $0x50] sm:$0xff] %vm1804_vm13, %v4360_v9  ;;  %1312 = vperm.xlu1 %3062, %v4360_v9   ;;  %v4475_v9 = vld [vmem:[#allocation5 + $0xb0] sm:$0xff] }
 0x3d6   : > { %v1071_v10 = vpop.xlane.xlu1 %1070  ;;  %5387 = vst [vmem:[#allocation84_spill] sm:$0xff] %v4475_v9 }
 0x3d7   : > { %v4370_v24 = vmax.f32 %v4362_v4, %v1071_v10  ;;  %v4400_v10 = vld [vmem:[#allocation5 + $0x78] sm:$0xff]  ;;  %v4466_v4 = vld [vmem:[#allocation5 + $0xa8] sm:$0xff] }
 0x3d8   : > { %5371 = vst [vmem:[#allocation68_spill] sm:$0xff] %v4400_v10  ;;  %5385 = vst [vmem:[#allocation82_spill] sm:$0xff] %v4466_v4 }
 0x3d9   : > { %5366 = vst [vmem:[#allocation63_spill] sm:$0xff] %v4370_v24  ;;  %2329 = vst.msk [vmem:[#allocation5 + $0x58] sm:$0xff] %vm1804_vm13, %v4370_v24  ;;  %1317 = vperm.xlu1 %3062, %v4370_v24  }
 0x3da   : > { %v1074_v33 = vpop.xlane.xlu1 %1073 }
 0x3db   : > { %v4380_v51 = vmax.f32 %v4372_v20, %v1074_v33  ;;  %v4455_v20 = vld [vmem:[#allocation5 + $0xa0] sm:$0xff] }
 0x3dc   : > { %5383 = vst [vmem:[#allocation80_spill] sm:$0xff] %v4455_v20 }
 0x3dd   : > { %2330 = vst.msk [vmem:[#allocation5 + $0x60] sm:$0xff] %vm1804_vm13, %v4380_v51 }
 0x3de   : > { %v1077_v26 = vpop.xlane.xlu1 %1076 }
 0x3df   : > { %v4389_v54 = vmax.f32 %v4382_v48, %v1077_v26 }
 0x3e1   : > { %5369 = vst [vmem:[#allocation66_spill] sm:$0xff] %v4389_v54  ;;  %2331 = vst.msk [vmem:[#allocation5 + $0x68] sm:$0xff] %vm1804_vm13, %v4389_v54 }
 0x3e2   : > { %v1080_v33 = vpop.xlane.xlu1 %1079 }
 0x3e3   : > { %v4398_v29 = vmax.f32 %v4391_v25, %v1080_v33  ;;  %v4424_v25 = vld [vmem:[#allocation5 + $0x88] sm:$0xff] }
 0x3e4   : > { %5376 = vst [vmem:[#allocation73_spill] sm:$0xff] %v4424_v25 }
 0x3e5   : > { %2332 = vst.msk [vmem:[#allocation5 + $0x70] sm:$0xff] %vm1804_vm13, %v4398_v29 }
 0x3e6   : > { %v1083_v0 = vpop.xlane.xlu1 %1082 }
 0x3e7   : > { %v4409_v30 = vmax.f32 %v4400_v10, %v1083_v0  ;;  %v4433_v10 = vld [vmem:[#allocation5 + $0x90] sm:$0xff]  ;;  %v4442_v0 = vpop.f32.mrf.mxu1 }
 0x3e8   : > { %5377 = vst [vmem:[#allocation74_spill] sm:$0xff] %v4433_v10  ;;  %5379 = vst [vmem:[#allocation76_spill] sm:$0xff] %v4442_v0 }
 0x3e9   : > { %2333 = vst.msk [vmem:[#allocation5 + $0x78] sm:$0xff] %vm1804_vm13, %v4409_v30 }
 0x3ea   : > { %v1086_v17 = vpop.xlane.xlu1 %1085 }
 0x3eb   : > { %v4420_v26 = vmax.f32 %v4411_v11, %v1086_v17  ;;  %v4444_v11 = vld [vmem:[#allocation5 + $0x98] sm:$0xff] }
 0x3ec   : > { %5380 = vst [vmem:[#allocation77_spill] sm:$0xff] %v4444_v11 }
 0x3ed   : > { %5375 = vst [vmem:[#allocation72_spill] sm:$0xff] %v4420_v26  ;;  %2334 = vst.msk [vmem:[#allocation5 + $0x80] sm:$0xff] %vm1804_vm13, %v4420_v26 }
 0x3ee   : > { %v1089_v48 = vpop.xlane.xlu1 %1088 }
 0x3ef   : > { %v4431_v33 = vmax.f32 %v4424_v25, %v1089_v48  ;;  %v4453_v25 = vpop.f32.mrf.mxu1 }
 0x3f0   : > { %1127 = vmax.xlane.f32.xlu0 %v1126_v16  ;;  %5382 = vst [vmem:[#allocation79_spill] sm:$0xff] %v4453_v25  ;;  %v1129_v48 = vmax.f32 %v4442_v0, %v4453_v25 }
 0x3f1   : > { %2335 = vst.msk [vmem:[#allocation5 + $0x88] sm:$0xff] %vm1804_vm13, %v4431_v33 }
 0x3f2   : > { %v1092_v18 = vpop.xlane.xlu1 %1091 }
 0x3f3   : > { %v4440_v23 = vmax.f32 %v4433_v10, %v1092_v18 }
 0x3f5   : > { %5378 = vst [vmem:[#allocation75_spill] sm:$0xff] %v4440_v23  ;;  %2336 = vst.msk [vmem:[#allocation5 + $0x90] sm:$0xff] %vm1804_vm13, %v4440_v23 }
 0x3f6   : > { %v1095_v16 = vpop.xlane.xlu1 %1094 }
 0x3f7   : > { %v4451_v17 = vmax.f32 %v4444_v11, %v1095_v16  ;;  %v4484_v16 = vld [vmem:[#allocation5 + $0xb8] sm:$0xff] }
 0x3f8   : > { %5389 = vst [vmem:[#allocation86_spill] sm:$0xff] %v4484_v16 }
 0x3f9   : > { %5381 = vst [vmem:[#allocation78_spill] sm:$0xff] %v4451_v17  ;;  %2337 = vst.msk [vmem:[#allocation5 + $0x98] sm:$0xff] %vm1804_vm13, %v4451_v17 }
 0x3fa   : > { %v1098_v24 = vpop.xlane.xlu1 %1097 }
 0x3fb   : > { %v4464_v10 = vmax.f32 %v4455_v20, %v1098_v24  ;;  %v4504_v20 = vld [vmem:[#allocation5 + $0xc8] sm:$0xff] }
 0x3fc   : > { %5392 = vst [vmem:[#allocation89_spill] sm:$0xff] %v4504_v20 }
 0x3fd   : > { %5384 = vst [vmem:[#allocation81_spill] sm:$0xff] %v4464_v10  ;;  %1130 = vmax.xlane.f32.xlu1 %v1129_v48  ;;  %2338 = vst.msk [vmem:[#allocation5 + $0xa0] sm:$0xff] %vm1804_vm13, %v4464_v10 }
 0x3fe   : > { %v1101_v18 = vpop.xlane.xlu0 %1100 }
 0x3ff   : > { %v4473_v11 = vmax.f32 %v4466_v4, %v1101_v18  ;;  %v4494_v4 = vld [vmem:[#allocation5 + $0xc0] sm:$0xff] }
 0x400   : > { %5390 = vst [vmem:[#allocation87_spill] sm:$0xff] %v4494_v4 }
 0x401   : > { %5386 = vst [vmem:[#allocation83_spill] sm:$0xff] %v4473_v11  ;;  %2339 = vst.msk [vmem:[#allocation5 + $0xa8] sm:$0xff] %vm1804_vm13, %v4473_v11 }
 0x402   : > { %v1104_v24 = vpop.xlane.xlu0 %1103 }
 0x403   : > { %v4482_v48 = vmax.f32 %v4475_v9, %v1104_v24 }
 0x405   : > { %5388 = vst [vmem:[#allocation85_spill] sm:$0xff] %v4482_v48  ;;  %2340 = vst.msk [vmem:[#allocation5 + $0xb0] sm:$0xff] %vm1804_vm13, %v4482_v48 }
 0x406   : > { %1322 = vperm.xlu0 %3061, %v4380_v51   ;;  %v1107_v18 = vpop.xlane.xlu1 %1106 }
 0x407   : > { %v4492_v25 = vmax.f32 %v4484_v16, %v1107_v18 }
 0x409   : > { %2341 = vst.msk [vmem:[#allocation5 + $0xb8] sm:$0xff] %vm1804_vm13, %v4492_v25 }
 0x40a   : > { %1327 = vperm.xlu0 %3061, %v4389_v54   ;;  %v1110_v0 = vpop.xlane.xlu0 %1109  ;;  %v4515_v54 = vld [vmem:[#allocation5 + $0xd0] sm:$0xff] }
 0x40b   : > { %v4502_v9 = vmax.f32 %v4494_v4, %v1110_v0  ;;  %5393 = vst [vmem:[#allocation90_spill] sm:$0xff] %v4515_v54 }
 0x40d   : > { %5391 = vst [vmem:[#allocation88_spill] sm:$0xff] %v4502_v9  ;;  %2342 = vst.msk [vmem:[#allocation5 + $0xc0] sm:$0xff] %vm1804_vm13, %v4502_v9 }
 0x40e   : > { %1332 = vperm.xlu0 %3061, %v4398_v29   ;;  %1342 = vperm.xlu1 %3062, %v4420_v26   ;;  %v1113_v24 = vpop.xlane.xlu1 %1112  ;;  %v4526_v26 = vld [vmem:[#allocation5 + $0xd8] sm:$0xff] }
 0x40f   : > { %v4513_v16 = vmax.f32 %v4504_v20, %v1113_v24  ;;  %5395 = vst [vmem:[#allocation92_spill] sm:$0xff] %v4526_v26 }
 0x411   : > { %2343 = vst.msk [vmem:[#allocation5 + $0xc8] sm:$0xff] %vm1804_vm13, %v4513_v16 }
 0x412   : > { %1337 = vperm.xlu0 %3061, %v4409_v30   ;;  %1372 = vperm.xlu1 %3062, %v4482_v48   ;;  %v1116_v18 = vpop.xlane.xlu0 %1115  ;;  %v4537_v48 = vld [vmem:[#allocation5 + $0xe0] sm:$0xff] }
 0x413   : > { %v4524_v4 = vmax.f32 %v4515_v54, %v1116_v18  ;;  %5396 = vst [vmem:[#allocation93_spill] sm:$0xff] %v4537_v48 }
 0x415   : > { %5394 = vst [vmem:[#allocation91_spill] sm:$0xff] %v4524_v4  ;;  %2344 = vst.msk [vmem:[#allocation5 + $0xd0] sm:$0xff] %vm1804_vm13, %v4524_v4 }
 0x416   : > { %1347 = vperm.xlu0 %3061, %v4431_v33   ;;  %1382 = vperm.xlu1 %3062, %v4502_v9   ;;  %v1119_v0 = vpop.xlane.xlu1 %1118  ;;  %v4548_v9 = vld [vmem:[#allocation5 + $0xe8] sm:$0xff] }
 0x417   : > { %v4535_v20 = vmax.f32 %v4526_v26, %v1119_v0  ;;  %5398 = vst [vmem:[#allocation95_spill] sm:$0xff] %v4548_v9 }
 0x419   : > { %2345 = vst.msk [vmem:[#allocation5 + $0xd8] sm:$0xff] %vm1804_vm13, %v4535_v20 }
 0x41a   : > { %1352 = vperm.xlu0 %3061, %v4440_v23   ;;  %1392 = vperm.xlu1 %3062, %v4524_v4   ;;  %v1122_v24 = vpop.xlane.xlu0 %1121 }
 0x41b   : > { %v4546_v54 = vmax.f32 %v4537_v48, %v1122_v24 }
 0x41d   : > { %5397 = vst [vmem:[#allocation94_spill] sm:$0xff] %v4546_v54  ;;  %2346 = vst.msk [vmem:[#allocation5 + $0xe0] sm:$0xff] %vm1804_vm13, %v4546_v54 }
 0x41e   : > { %1357 = vperm.xlu0 %3061, %v4451_v17   ;;  %1402 = vperm.xlu1 %3062, %v4546_v54   ;;  %v1125_v18 = vpop.xlane.xlu1 %1124 }
 0x41f   : > { %v4557_v26 = vmax.f32 %v4548_v9, %v1125_v18 }
 0x421   : > { %2347 = vst.msk [vmem:[#allocation5 + $0xe8] sm:$0xff] %vm1804_vm13, %v4557_v26 }
 0x422   : > { %1362 = vperm.xlu0 %3061, %v4464_v10  }
 0x426   : > { %1367 = vperm.xlu0 %3061, %v4473_v11  }
 0x428   : > { %v1263_v0 = vpop.permute.xlu0 %1262 }
 0x429   : > { %v1420_v48 = vsub.f32 %v4077_v41, %v1263_v0  ;;  %v1421_v4 = vsub.f32 %v4079_v42, %v1263_v0 }
 0x42a   : > { %1377 = vperm.xlu0 %3061, %v4492_v25  }
 0x42b   : > { %v1484_v54 = vmul.f32 1.442695, %v1420_v48  ;;  %v1486_v18 = vmul.f32 1.442695, %v1421_v4 }
 0x42c   : > { %v1268_v17 = vpop.permute.xlu1 %1267 }
 0x42d   : > { %3082 = vpow2.f32 %v1484_v54  ;;  %v1422_v24 = vsub.f32 %v4083_v44, %v1268_v17  ;;  %v1423_v9 = vsub.f32 %v4085_v45, %v1268_v17 }
 0x42e   : > { %3084 = vpow2.f32 %v1486_v18  ;;  %1387 = vperm.xlu0 %3061, %v4513_v16  }
 0x42f   : > { %v1488_v10 = vmul.f32 1.442695, %v1422_v24  ;;  %v1490_v11 = vmul.f32 1.442695, %v1423_v9 }
 0x430   : > { %v1273_v23 = vpop.permute.xlu1 %1272 }
 0x431   : > { %3086 = vpow2.f32 %v1488_v10  ;;  %v1424_v41 = vsub.f32 %v4089_v47, %v1273_v23  ;;  %v1425_v42 = vsub.f32 %v4091_v19, %v1273_v23 }
 0x432   : > { %3088 = vpow2.f32 %v1490_v11  ;;  %1397 = vperm.xlu0 %3061, %v4535_v20  }
 0x433   : > { %v1492_v4 = vmul.f32 1.442695, %v1424_v41  ;;  %v1494_v54 = vmul.f32 1.442695, %v1425_v42 }
 0x434   : > { %v1278_v48 = vpop.permute.xlu1 %1277 }
 0x435   : > { %3090 = vpow2.f32 %v1492_v4  ;;  %v1426_v44 = vsub.f32 %v4095_v49, %v1278_v48  ;;  %v1427_v45 = vsub.f32 %v4097_v50, %v1278_v48 }
 0x436   : > { %3092 = vpow2.f32 %v1494_v54  ;;  %1407 = vperm.xlu0 %3061, %v4557_v26  }
 0x437   : > { %v1496_v9 = vmul.f32 1.442695, %v1426_v44  ;;  %v1498_v10 = vmul.f32 1.442695, %v1427_v45 }
 0x438   : > { %v1283_v17 = vpop.permute.xlu0 %1282 }
 0x439   : > { %3094 = vpow2.f32 %v1496_v9  ;;  %v1428_v47 = vsub.f32 %v4101_v52, %v1283_v17  ;;  %v1429_v19 = vsub.f32 %v4103_v53, %v1283_v17 }
 0x43a   : > { %v3083_v11 = vpop.eup %3082  ;;  %3096 = vpow2.f32 %v1498_v10 }
 0x43b   : > { %v3085_v23 = vpop.eup %3084  ;;  %v1500_v0 = vmul.f32 1.442695, %v1428_v47  ;;  %v1502_v24 = vmul.f32 1.442695, %v1429_v19 }
 0x43c   : > { %v1288_v18 = vpop.permute.xlu0 %1287  ;;  %v4579_v49 = vadd.f32 %v3085_v23, %v3083_v11 }
 0x43d   : > { %3098 = vpow2.f32 %v1500_v0  ;;  %v1430_v50 = vsub.f32 %v4107_v55, %v1288_v18  ;;  %v1431_v41 = vsub.f32 %v4109_v56, %v1288_v18 }
 0x43e   : > { %v3087_v42 = vpop.eup %3086  ;;  %3100 = vpow2.f32 %v1502_v24 }
 0x43f   : > { %v3089_v4 = vpop.eup %3088  ;;  %v1504_v54 = vmul.f32 1.442695, %v1430_v50  ;;  %v1506_v52 = vmul.f32 1.442695, %v1431_v41  ;;  %v2061_v48 = vpack.c.bf16 %v3087_v42, %v3083_v11 }
 0x440   : > { %v1293_v53 = vpop.permute.xlu1 %1292  ;;  %v2062_v44 = vpack.c.bf16 %v3089_v4, %v3085_v23  ;;  %v4583_v45 = vadd.f32 %v3089_v4, %v3087_v42 }
 0x441   : > { %3102 = vpow2.f32 %v1504_v54  ;;  %v1432_v9 = vsub.f32 %v4113_v58, %v1293_v53  ;;  %v1433_v10 = vsub.f32 %v4115_v59, %v1293_v53 }
 0x442   : > { %v3091_v17 = vpop.eup %3090  ;;  %3104 = vpow2.f32 %v1506_v52  ;;  %2125 = vmatprep.mubr.bf16.mxu0 %v2062_v44 }
 0x443   : > { %v3093_v55 = vpop.eup %3092  ;;  %v1508_v56 = vmul.f32 1.442695, %v1432_v9  ;;  %v1510_v47 = vmul.f32 1.442695, %v1433_v10  ;;  %2126 = vmatmul.mubr.bf16.vlgmr.msra.gmra.mxu0 %v2061_v48 }
 0x444   : > { %v1298_v19 = vpop.permute.xlu1 %1297  ;;  %v4587_v0 = vadd.f32 %v3093_v55, %v3091_v17 }
 0x445   : > { %3106 = vpow2.f32 %v1508_v56  ;;  %v1434_v11 = vsub.f32 %v4119_v61, %v1298_v19  ;;  %v1435_v23 = vsub.f32 %v4121_v62, %v1298_v19 }
 0x446   : > { %v3095_v24 = vpop.eup %3094  ;;  %3108 = vpow2.f32 %v1510_v47 }
 0x447   : > { %v3097_v58 = vpop.eup %3096  ;;  %v1512_v18 = vmul.f32 1.442695, %v1434_v11  ;;  %v1514_v59 = vmul.f32 1.442695, %v1435_v23  ;;  %v2063_v50 = vpack.c.bf16 %v3095_v24, %v3091_v17 }
 0x448   : > { %v1303_v41 = vpop.permute.xlu0 %1302  ;;  %v2064_v42 = vpack.c.bf16 %v3097_v58, %v3093_v55  ;;  %v4591_v4 = vadd.f32 %v3097_v58, %v3095_v24 }
 0x449   : > { %3110 = vpow2.f32 %v1512_v18  ;;  %v1436_v54 = vsub.f32 %v4125_v2, %v1303_v41  ;;  %v1437_v52 = vsub.f32 %v4127_v3, %v1303_v41 }
 0x44a   : > { %v3099_v48 = vpop.eup %3098  ;;  %3112 = vpow2.f32 %v1514_v59  ;;  %2133 = vmatprep.mubr.bf16.mxu0 %v2064_v42 }
 0x44b   : > { %v3101_v61 = vpop.eup %3100  ;;  %v1516_v62 = vmul.f32 1.442695, %v1436_v54  ;;  %v1518_v53 = vmul.f32 1.442695, %v1437_v52  ;;  %2134 = vmatmul.mubr.bf16.gmra.mxu0 %v2063_v50 }
 0x44c   : > { %v1308_v44 = vpop.permute.xlu0 %1307  ;;  %v4595_v9 = vadd.f32 %v3101_v61, %v3099_v48 }
 0x44d   : > { %3114 = vpow2.f32 %v1516_v62  ;;  %v1438_v10 = vsub.f32 %v4131_v5, %v1308_v44  ;;  %v1439_v17 = vsub.f32 %v4133_v8, %v1308_v44 }
 0x44e   : > { %v3103_v55 = vpop.eup %3102  ;;  %3116 = vpow2.f32 %v1518_v53 }
 0x44f   : > { %v3105_v2 = vpop.eup %3104  ;;  %v1520_v56 = vmul.f32 1.442695, %v1438_v10  ;;  %v1522_v3 = vmul.f32 1.442695, %v1439_v17  ;;  %v2065_v47 = vpack.c.bf16 %v3103_v55, %v3099_v48 }
 0x450   : > { %v1313_v19 = vpop.permute.xlu1 %1312  ;;  %v2066_v11 = vpack.c.bf16 %v3105_v2, %v3101_v61  ;;  %v4599_v23 = vadd.f32 %v3105_v2, %v3103_v55 }
 0x451   : > { %3118 = vpow2.f32 %v1520_v56  ;;  %v1440_v24 = vsub.f32 %v4137_v12, %v1313_v19  ;;  %v1441_v58 = vsub.f32 %v4139_v13, %v1313_v19 }
 0x452   : > { %v3107_v18 = vpop.eup %3106  ;;  %3120 = vpow2.f32 %v1522_v3  ;;  %2141 = vmatprep.mubr.bf16.mxu0 %v2066_v11 }
 0x453   : > { %v3109_v5 = vpop.eup %3108  ;;  %v1524_v8 = vmul.f32 1.442695, %v1440_v24  ;;  %v1526_v59 = vmul.f32 1.442695, %v1441_v58  ;;  %2142 = vmatmul.mubr.bf16.gmra.mxu0 %v2065_v47 }
 0x454   : > { %v1318_v50 = vpop.permute.xlu1 %1317  ;;  %v4603_v41 = vadd.f32 %v3109_v5, %v3107_v18 }
 0x455   : > { %3122 = vpow2.f32 %v1524_v8  ;;  %v1442_v42 = vsub.f32 %v4143_v15, %v1318_v50  ;;  %v1443_v54 = vsub.f32 %v4145_v6, %v1318_v50  ;;  %v5399_v8 = vsub.f32 %v4262_v27, %v4270_v21 }
 0x456   : > { %v3111_v52 = vpop.eup %3110  ;;  %3124 = vpow2.f32 %v1526_v59  ;;  %v5400_v50 = vsub.f32 %v4257_v22, %v4260_v36  ;;  %v5404_v27 = vsub.f32 %v4302_v40, %v4310_v38  ;;  %v5405_v22 = vsub.f32 %v4312_v37, %v4320_v46  ;;  %v5409_v37 = vld [vmem:[#allocation61_spill] sm:$0xff] }
 0x457   : > { %v3113_v12 = vpop.eup %3112  ;;  %v1528_v48 = vmul.f32 1.442695, %v1442_v42  ;;  %v1530_v13 = vmul.f32 1.442695, %v1443_v54  ;;  %v2067_v61 = vpack.c.bf16 %v3111_v52, %v3107_v18  ;;  %v1198_v59 = vmul.f32 1.442695, %v5399_v8 }
 0x458   : > { %v2068_v62 = vpack.c.bf16 %v3113_v12, %v3109_v5  ;;  %v4607_v53 = vadd.f32 %v3113_v12, %v3111_v52  ;;  %v1196_v42 = vmul.f32 1.442695, %v5400_v50  ;;  %v5401_v54 = vsub.f32 %v4272_v14, %v4280_v63  ;;  %v5423_v8 = vld [vmem:[#allocation70_spill] sm:$0xff] }
 0x459   : > { %3126 = vpow2.f32 %v1528_v48  ;;  %v5402_v12 = vsub.f32 %v4282_v7, %v4290_v60  ;;  %v1206_v21 = vmul.f32 1.442695, %v5404_v27  ;;  %v1208_v63 = vmul.f32 1.442695, %v5405_v22  ;;  %v4644_v7 = vld [vmem:[#allocation5 + $0xf0] sm:$0xff]  ;;  %v5431_v22 = vld [vmem:[#allocation25_spill] sm:$0xff] }
 0x45a   : > { %v3115_v44 = vpop.eup %3114  ;;  %3128 = vpow2.f32 %v1530_v13  ;;  %2149 = vmatprep.mubr.bf16.mxu0 %v2068_v62  ;;  %v1200_v52 = vmul.f32 1.442695, %v5401_v54  ;;  %v5403_v13 = vsub.f32 %v4292_v57, %v4300_v43  ;;  %v5406_v14 = vsub.f32 %v4322_v39, %v4330_v35  ;;  %v5411_v35 = vld [vmem:[#allocation62_spill] sm:$0xff]  ;;  %v5412_v39 = vld [vmem:[#allocation63_spill] sm:$0xff]  ;;  %v5426_v54 = vld [vmem:[#allocation73_spill] sm:$0xff] }
 0x45b   : > { %v3117_v10 = vpop.eup %3116  ;;  %2150 = vmatmul.mubr.bf16.gmra.mxu0 %v2067_v61  ;;  %3130 = vpow2.f32 %v1198_v59  ;;  %v1202_v48 = vmul.f32 1.442695, %v5402_v12  ;;  %v5407_v43 = vsub.f32 %v4332_v34, %v4340_v28  ;;  %v5408_v38 = vsub.f32 %v4342_v1, %v4350_v32  ;;  %v5414_v28 = vld [vmem:[#allocation64_spill] sm:$0xff]  ;;  %v5416_v1 = vld [vmem:[#allocation65_spill] sm:$0xff] }
 0x45c   : > { %v4609_v17 = vadd.f32 %v3117_v10, %v3115_v44  ;;  %v1204_v61 = vmul.f32 1.442695, %v5403_v13  ;;  %3132 = vpow2.f32 %v1196_v42  ;;  %v1210_v60 = vmul.f32 1.442695, %v5406_v14  ;;  %v5424_v59 = vld [vmem:[#allocation72_spill] sm:$0xff]  ;;  %v5432_v14 = vld [vmem:[#allocation26_spill] sm:$0xff] }
 0x45d   : > { %3134 = vpow2.f32 %v1200_v52  ;;  %v1212_v57 = vmul.f32 1.442695, %v5407_v43  ;;  %v1214_v40 = vmul.f32 1.442695, %v5408_v38  ;;  %v5410_v46 = vsub.f32 %v4352_v31, %v5409_v37 }
 0x45e   : > { %v3119_v15 = vpop.eup %3118  ;;  %3136 = vpow2.f32 %v1202_v48  ;;  %v5425_v50 = vsub.f32 %v5423_v8, %v5424_v59  ;;  %v5427_v52 = vsub.f32 %v5426_v54, %v4431_v33  ;;  %v5428_v48 = vld [vmem:[#allocation74_spill] sm:$0xff]  ;;  %v5433_v33 = vld [vmem:[#allocation77_spill] sm:$0xff] }
 0x45f   : > { %v3121_v55 = vpop.eup %3120  ;;  %v2069_v6 = vpack.c.bf16 %v3119_v15, %v3115_v44  ;;  %3138 = vpow2.f32 %v1204_v61  ;;  %v1216_v36 = vmul.f32 1.442695, %v5410_v46  ;;  %v5413_v44 = vsub.f32 %v5411_v35, %v5412_v39  ;;  %v5437_v39 = vld [vmem:[#allocation80_spill] sm:$0xff] }
 0x460   : > { %v2070_v2 = vpack.c.bf16 %v3121_v55, %v3117_v10  ;;  %v4611_v56 = vadd.f32 %v3121_v55, %v3119_v15  ;;  %3140 = vpow2.f32 %v1206_v21  ;;  %v5415_v15 = vsub.f32 %v5414_v28, %v4380_v51  ;;  %v5417_v55 = vld [vmem:[#allocation66_spill] sm:$0xff]  ;;  %v5421_v51 = vld [vmem:[#allocation68_spill] sm:$0xff] }
 0x461   : > { %3142 = vpow2.f32 %v1208_v63  ;;  %v1218_v10 = vmul.f32 1.442695, %v5413_v44  ;;  %v1228_v42 = vmul.f32 1.442695, %v5425_v50  ;;  %v1230_v12 = vmul.f32 1.442695, %v5427_v52 }
 0x462   : > { %v3123_v3 = vpop.eup %3122  ;;  %2157 = vmatprep.mubr.bf16.mxu0 %v2070_v2  ;;  %3144 = vpow2.f32 %v1210_v60  ;;  %v1220_v32 = vmul.f32 1.442695, %v5415_v15  ;;  %v5438_v44 = vld [vmem:[#allocation81_spill] sm:$0xff]  ;;  %v5449_v52 = vld [vmem:[#allocation87_spill] sm:$0xff] }
 0x463   : > { %v3125_v47 = vpop.eup %3124  ;;  %2158 = vmatmul.mubr.bf16.gmra.mxu0 %v2069_v6  ;;  %3146 = vpow2.f32 %v1212_v57  ;;  %v5418_v6 = vsub.f32 %v5416_v1, %v5417_v55  ;;  %v5434_v57 = vld [vmem:[#allocation78_spill] sm:$0xff]  ;;  %v5441_v1 = vld [vmem:[#allocation27_spill] sm:$0xff] }
 0x464   : > { %v4613_v19 = vadd.f32 %v3125_v47, %v3123_v3  ;;  %3148 = vpow2.f32 %v1214_v40  ;;  %v5435_v38 = vsub.f32 %v5433_v33, %v5434_v57 }
 0x465   : > { %v1222_v31 = vmul.f32 1.442695, %v5418_v6  ;;  %3150 = vpow2.f32 %v1216_v36  ;;  %v5442_v6 = vld [vmem:[#allocation28_spill] sm:$0xff] }
 0x466   : > { %v3127_v11 = vpop.eup %3126  ;;  %3152 = vpow2.f32 %v1218_v10  ;;  %v1234_v40 = vmul.f32 1.442695, %v5435_v38  ;;  %v5439_v10 = vsub.f32 %v5437_v39, %v5438_v44  ;;  %v5456_v38 = vld [vmem:[#allocation33_spill] sm:$0xff] }
 0x467   : > { %v3129_v24 = vpop.eup %3128  ;;  %v2071_v58 = vpack.c.bf16 %v3127_v11, %v3123_v3  ;;  %v5419_v3 = vld [vmem:[#allocation67_spill] sm:$0xff]  ;;  %3154 = vpow2.f32 %v1220_v32 }
 0x468   : > { %v2072_v18 = vpack.c.bf16 %v3129_v24, %v3125_v47  ;;  %v4615_v5 = vadd.f32 %v3129_v24, %v3127_v11  ;;  %v5420_v47 = vsub.f32 %v5419_v3, %v4398_v29  ;;  %v5422_v24 = vsub.f32 %v5421_v51, %v4409_v30  ;;  %v5429_v30 = vld [vmem:[#allocation75_spill] sm:$0xff] }
 0x469   : > { %3156 = vpow2.f32 %v1222_v31  ;;  %v5430_v13 = vsub.f32 %v5428_v48, %v5429_v30  ;;  %v1236_v28 = vmul.f32 1.442695, %v5439_v10 }
 0x46a   : > { %2165 = vmatprep.mubr.bf16.mxu0 %v2072_v18  ;;  %v1224_v11 = vmul.f32 1.442695, %v5420_v47  ;;  %v4675_v18 = vpop.eup %3130 }
 0x46b   : > { %2166 = vmatmul.mubr.bf16.gmra.mxu0 %v2071_v58  ;;  %v1226_v58 = vmul.f32 1.442695, %v5422_v24  ;;  %v4684_v29 = vpop.eup %3132  ;;  %v1232_v61 = vmul.f32 1.442695, %v5430_v13  ;;  %v5445_v24 = vld [vmem:[#allocation84_spill] sm:$0xff] }
 0x46c   : > { %3158 = vpow2.f32 %v1224_v11  ;;  %v4689_v21 = vpop.eup %3134 }
 0x46d   : > { %3160 = vpow2.f32 %v1226_v58  ;;  %v4693_v43 = vpop.eup %3136  ;;  %v5446_v58 = vld [vmem:[#allocation85_spill] sm:$0xff] }
 0x46e   : > { %3162 = vpow2.f32 %v1228_v42  ;;  %v4698_v37 = vpop.eup %3138  ;;  %v5447_v8 = vsub.f32 %v5445_v24, %v5446_v58  ;;  %v5462_v24 = vld [vmem:[#allocation32_spill] sm:$0xff] }
 0x46f   : > { %5436 = vst [vmem:[#allocation61_spill] sm:$0xff] %v4698_v37  ;;  %3164 = vpow2.f32 %v1230_v12  ;;  %v4703_v35 = vpop.eup %3140  ;;  %v5450_v12 = vld [vmem:[#allocation88_spill] sm:$0xff] }
 0x470   : > { %3166 = vpow2.f32 %v1232_v61  ;;  %v4708_v32 = vpop.eup %3142  ;;  %v1240_v59 = vmul.f32 1.442695, %v5447_v8  ;;  %v5451_v48 = vsub.f32 %v5449_v52, %v5450_v12  ;;  %v5465_v52 = vld [vmem:[#allocation46_spill] sm:$0xff] }
 0x471   : > { %5440 = vst [vmem:[#allocation62_spill] sm:$0xff] %v4708_v32  ;;  %v4712_v47 = vpop.eup %3144 }
 0x472   : > { %5443 = vst [vmem:[#allocation63_spill] sm:$0xff] %v4712_v47  ;;  %v4717_v51 = vpop.eup %3146  ;;  %v1244_v30 = vmul.f32 1.442695, %v5451_v48 }
 0x473   : > { %5444 = vst [vmem:[#allocation64_spill] sm:$0xff] %v4717_v51  ;;  %v4723_v54 = vpop.eup %3148 }
 0x474   : > { %5448 = vst [vmem:[#allocation65_spill] sm:$0xff] %v4723_v54 }
 0x479   : > { %v1128_v62 = vpop.xlane.xlu0 %1127 }
 0x47a   : > { %v4656_v34 = vmax.f32 %v4644_v7, %v1128_v62  ;;  %v4701_v62 = vld [vmem:[#allocation5 + $0xf8] sm:$0xff] }
 0x47c   : > { %2348 = vst.msk [vmem:[#allocation5 + $0xf0] sm:$0xff] %vm1804_vm13, %v4656_v34  ;;  %1412 = vperm.xlu1 %3062, %v4656_v34  }
 0x480   : > { %1876 = vperm.xlu1 %3062, %v4675_v18  }
 0x481   : > { %v1323_v27 = vpop.permute.xlu0 %1322 }
 0x482   : > { %v1444_v63 = vsub.f32 %v5431_v22, %v1323_v27  ;;  %v1445_v60 = vsub.f32 %v5432_v14, %v1323_v27  ;;  %v4733_v27 = vpop.eup %3150  ;;  %v5453_v22 = vld [vmem:[#allocation29_spill] sm:$0xff]  ;;  %v5454_v14 = vld [vmem:[#allocation30_spill] sm:$0xff] }
 0x483   : > { %5452 = vst [vmem:[#allocation66_spill] sm:$0xff] %v4733_v27  ;;  %v4737_v57 = vpop.eup %3152 }
 0x484   : > { %v1532_v46 = vmul.f32 1.442695, %v1444_v63  ;;  %v1534_v36 = vmul.f32 1.442695, %v1445_v60  ;;  %1881 = vperm.xlu1 %3062, %v4689_v21   ;;  %5455 = vst [vmem:[#allocation67_spill] sm:$0xff] %v4737_v57  ;;  %v4741_v39 = vpop.eup %3154 }
 0x485   : > { %v1328_v15 = vpop.permute.xlu0 %1327  ;;  %5458 = vst [vmem:[#allocation68_spill] sm:$0xff] %v4741_v39 }
 0x486   : > { %3168 = vpow2.f32 %v1532_v46  ;;  %v1446_v55 = vsub.f32 %v5441_v1, %v1328_v15  ;;  %v1447_v31 = vsub.f32 %v5442_v6, %v1328_v15  ;;  %v1131_v3 = vpop.xlane.xlu1 %1130  ;;  %v5457_v46 = vld [vmem:[#allocation34_spill] sm:$0xff] }
 0x487   : > { %3170 = vpow2.f32 %v1534_v36  ;;  %v4715_v11 = vmax.f32 %v4701_v62, %v1131_v3 }
 0x488   : > { %3172 = vpow2.f32 %v1234_v40  ;;  %v1536_v50 = vmul.f32 1.442695, %v1446_v55  ;;  %v1538_v42 = vmul.f32 1.442695, %v1447_v31  ;;  %1891 = vperm.xlu1 %3062, %v4698_v37   ;;  %v5461_v31 = vld [vmem:[#allocation31_spill] sm:$0xff] }
 0x489   : > { %3174 = vpow2.f32 %v1236_v28  ;;  %2349 = vst.msk [vmem:[#allocation5 + $0xf8] sm:$0xff] %vm1804_vm13, %v4715_v11  ;;  %v1333_v61 = vpop.permute.xlu0 %1332  ;;  %1417 = vperm.xlu0 %3061, %v4715_v11   ;;  %v4744_v28 = vpop.eup %3156 }
 0x48a   : > { %3176 = vpow2.f32 %v1536_v50  ;;  %v1448_v63 = vsub.f32 %v5453_v22, %v1333_v61  ;;  %v1449_v60 = vsub.f32 %v5454_v14, %v1333_v61  ;;  %v1343_v33 = vpop.permute.xlu1 %1342  ;;  %5459 = vst [vmem:[#allocation70_spill] sm:$0xff] %v4744_v28  ;;  %v4747_v6 = vpop.eup %3158  ;;  %v5464_v50 = vld [vmem:[#allocation45_spill] sm:$0xff] }
 0x48b   : > { %3178 = vpow2.f32 %v1538_v42  ;;  %v1452_v40 = vsub.f32 %v5456_v38, %v1343_v33  ;;  %v1453_v36 = vsub.f32 %v5457_v46, %v1343_v33  ;;  %5460 = vst [vmem:[#allocation72_spill] sm:$0xff] %v4747_v6  ;;  %v5469_v38 = vld [vmem:[#allocation35_spill] sm:$0xff]  ;;  %v5470_v46 = vld [vmem:[#allocation36_spill] sm:$0xff] }
 0x48c   : > { %3180 = vpow2.f32 %v1240_v59  ;;  %v1540_v44 = vmul.f32 1.442695, %v1448_v63  ;;  %v1542_v10 = vmul.f32 1.442695, %v1449_v60  ;;  %1901 = vperm.xlu1 %3062, %v4708_v32   ;;  %v4751_v59 = vpop.eup %3160 }
 0x48d   : > { %3182 = vpow2.f32 %v1244_v30  ;;  %v1548_v15 = vmul.f32 1.442695, %v1452_v40  ;;  %v1550_v1 = vmul.f32 1.442695, %v1453_v36  ;;  %v1338_v55 = vpop.permute.xlu0 %1337  ;;  %1871 = vperm.xlu0 %3061, %v4684_v29   ;;  %5463 = vst [vmem:[#allocation73_spill] sm:$0xff] %v4751_v59  ;;  %v4755_v48 = vpop.eup %3162 }
 0x48e   : > { %3184 = vpow2.f32 %v1540_v44  ;;  %v1450_v3 = vsub.f32 %v5461_v31, %v1338_v55  ;;  %v1451_v58 = vsub.f32 %v5462_v24, %v1338_v55  ;;  %v1373_v8 = vpop.permute.xlu1 %1372  ;;  %5466 = vst [vmem:[#allocation74_spill] sm:$0xff] %v4755_v48  ;;  %v4758_v22 = vpop.eup %3164  ;;  %v5472_v31 = vld [vmem:[#allocation50_spill] sm:$0xff] }
 0x48f   : > { %3186 = vpow2.f32 %v1542_v10  ;;  %v1464_v42 = vsub.f32 %v5464_v50, %v1373_v8  ;;  %v1465_v12 = vsub.f32 %v5465_v52, %v1373_v8  ;;  %5467 = vst [vmem:[#allocation75_spill] sm:$0xff] %v4758_v22  ;;  %v4761_v33 = vpop.eup %3166 }
 0x490   : > { %3188 = vpow2.f32 %v1548_v15  ;;  %v1544_v30 = vmul.f32 1.442695, %v1450_v3  ;;  %v1546_v61 = vmul.f32 1.442695, %v1451_v58  ;;  %1911 = vperm.xlu1 %3062, %v4717_v51   ;;  %5468 = vst [vmem:[#allocation25_spill] sm:$0xff] %v4761_v33  ;;  %v5471_v15 = vld [vmem:[#allocation49_spill] sm:$0xff] }
 0x491   : > { %3190 = vpow2.f32 %v1550_v1  ;;  %v1572_v63 = vmul.f32 1.442695, %v1464_v42  ;;  %v1574_v14 = vmul.f32 1.442695, %v1465_v12  ;;  %v1348_v60 = vpop.permute.xlu0 %1347  ;;  %1886 = vperm.xlu0 %3061, %v4693_v43  }
 0x492   : > { %3192 = vpow2.f32 %v1544_v30  ;;  %v1454_v40 = vsub.f32 %v5469_v38, %v1348_v60  ;;  %v1455_v36 = vsub.f32 %v5470_v46, %v1348_v60  ;;  %v1383_v44 = vpop.permute.xlu1 %1382 }
 0x493   : > { %v3169_v10 = vpop.eup %3168  ;;  %3194 = vpow2.f32 %v1546_v61  ;;  %v1468_v55 = vsub.f32 %v5471_v15, %v1383_v44  ;;  %v1469_v3 = vsub.f32 %v5472_v31, %v1383_v44  ;;  %v5474_v61 = vld [vmem:[#allocation37_spill] sm:$0xff] }
 0x494   : > { %v3171_v1 = vpop.eup %3170  ;;  %3196 = vpow2.f32 %v1572_v63  ;;  %v1552_v24 = vmul.f32 1.442695, %v1454_v40  ;;  %v1554_v58 = vmul.f32 1.442695, %v1455_v36  ;;  %1921 = vperm.xlu1 %3062, %v4733_v27   ;;  %v5475_v63 = vld [vmem:[#allocation38_spill] sm:$0xff]  ;;  %v5476_v36 = vld [vmem:[#allocation53_spill] sm:$0xff] }
 0x495   : > { %v4768_v8 = vpop.eup %3172  ;;  %3198 = vpow2.f32 %v1574_v14  ;;  %v1580_v50 = vmul.f32 1.442695, %v1468_v55  ;;  %v1582_v42 = vmul.f32 1.442695, %v1469_v3  ;;  %v1353_v52 = vpop.permute.xlu0 %1352  ;;  %1896 = vperm.xlu0 %3061, %v4703_v35   ;;  %v4771_v12 = vadd.f32 %v3171_v1, %v3169_v10  ;;  %v5477_v14 = vld [vmem:[#allocation54_spill] sm:$0xff] }
 0x496   : > { %v4773_v30 = vpop.eup %3174  ;;  %3200 = vpow2.f32 %v1552_v24  ;;  %v1456_v60 = vsub.f32 %v5474_v61, %v1353_v52  ;;  %v1457_v38 = vsub.f32 %v5475_v63, %v1353_v52  ;;  %v1393_v40 = vpop.permute.xlu1 %1392 }
 0x497   : > { %5473 = vst [vmem:[#allocation26_spill] sm:$0xff] %v4773_v30  ;;  %v3177_v46 = vpop.eup %3176  ;;  %3202 = vpow2.f32 %v1554_v58  ;;  %v1472_v44 = vsub.f32 %v5476_v36, %v1393_v40  ;;  %v1473_v15 = vsub.f32 %v5477_v14, %v1393_v40  ;;  %v5480_v40 = vld [vmem:[#allocation39_spill] sm:$0xff] }
 0x498   : > { %v3179_v55 = vpop.eup %3178  ;;  %3204 = vpow2.f32 %v1580_v50  ;;  %v1556_v31 = vmul.f32 1.442695, %v1456_v60  ;;  %v1558_v3 = vmul.f32 1.442695, %v1457_v38  ;;  %1931 = vperm.xlu1 %3062, %v4741_v39   ;;  %v2073_v13 = vpack.c.bf16 %v3177_v46, %v3169_v10  ;;  %v5481_v50 = vld [vmem:[#allocation40_spill] sm:$0xff] }
 0x499   : > { %v4780_v2 = vpop.eup %3180  ;;  %3206 = vpow2.f32 %v1582_v42  ;;  %v1588_v24 = vmul.f32 1.442695, %v1472_v44  ;;  %v1590_v61 = vmul.f32 1.442695, %v1473_v15  ;;  %v1358_v52 = vpop.permute.xlu0 %1357  ;;  %1906 = vperm.xlu0 %3061, %v4712_v47   ;;  %v2074_v58 = vpack.c.bf16 %v3179_v55, %v3171_v1  ;;  %v5482_v42 = vld [vmem:[#allocation57_spill] sm:$0xff]  ;;  %v5483_v15 = vld [vmem:[#allocation58_spill] sm:$0xff] }
 0x49a   : > { %5478 = vst [vmem:[#allocation77_spill] sm:$0xff] %v4780_v2  ;;  %v4783_v63 = vpop.eup %3182  ;;  %3208 = vpow2.f32 %v1556_v31  ;;  %v1458_v36 = vsub.f32 %v5480_v40, %v1358_v52  ;;  %v1459_v60 = vsub.f32 %v5481_v50, %v1358_v52  ;;  %v1403_v38 = vpop.permute.xlu1 %1402  ;;  %v4787_v14 = vadd.f32 %v3179_v55, %v3177_v46  ;;  %v5484_v40 = vld [vmem:[#allocation41_spill] sm:$0xff] }
 0x49b   : > { %5479 = vst [vmem:[#allocation78_spill] sm:$0xff] %v4783_v63  ;;  %v3185_v10 = vpop.eup %3184  ;;  %3210 = vpow2.f32 %v1558_v3  ;;  %2173 = vmatprep.mubr.bf16.mxu0 %v2074_v58  ;;  %v1476_v44 = vsub.f32 %v5482_v42, %v1403_v38  ;;  %v1477_v39 = vsub.f32 %v5483_v15, %v1403_v38  ;;  %v5487_v38 = vld [vmem:[#allocation83_spill] sm:$0xff] }
 0x49c   : > { %v3187_v27 = vpop.eup %3186  ;;  %3212 = vpow2.f32 %v1588_v24  ;;  %v1560_v1 = vmul.f32 1.442695, %v1458_v36  ;;  %v1562_v51 = vmul.f32 1.442695, %v1459_v60  ;;  %2174 = vmatmul.mubr.bf16.gmra.mxu0 %v2073_v13  ;;  %1941 = vperm.xlu1 %3062, %v4747_v6   ;;  %v5485_v24 = vld [vmem:[#allocation42_spill] sm:$0xff] }
 0x49d   : > { %v4792_v31 = vpop.eup %3188  ;;  %3214 = vpow2.f32 %v1590_v61  ;;  %v1596_v52 = vmul.f32 1.442695, %v1476_v44  ;;  %v1598_v46 = vmul.f32 1.442695, %v1477_v39  ;;  %v1363_v55 = vpop.permute.xlu0 %1362  ;;  %1916 = vperm.xlu0 %3061, %v4723_v54   ;;  %v4795_v3 = vadd.f32 %v3187_v27, %v3185_v10  ;;  %v5486_v13 = vld [vmem:[#allocation82_spill] sm:$0xff] }
 0x49e   : > { %v3191_v58 = vpop.eup %3190  ;;  %3216 = vpow2.f32 %v1560_v1  ;;  %v1460_v50 = vsub.f32 %v5484_v40, %v1363_v55  ;;  %v1461_v36 = vsub.f32 %v5485_v24, %v1363_v55  ;;  %v5488_v42 = vsub.f32 %v5486_v13, %v5487_v38  ;;  %v5489_v40 = vld [vmem:[#allocation90_spill] sm:$0xff]  ;;  %v5490_v55 = vld [vmem:[#allocation91_spill] sm:$0xff] }
 0x49f   : > { %v3193_v60 = vpop.eup %3192  ;;  %3218 = vpow2.f32 %v1562_v51  ;;  %v4803_v61 = vadd.f32 %v3191_v58, %v4792_v31  ;;  %v5491_v24 = vsub.f32 %v5489_v40, %v5490_v55  ;;  %v5494_v55 = vld [vmem:[#allocation86_spill] sm:$0xff] }
 0x4a0   : > { %v1238_v15 = vmul.f32 1.442695, %v5488_v42  ;;  %v3195_v39 = vpop.eup %3194  ;;  %3220 = vpow2.f32 %v1596_v52  ;;  %v1564_v44 = vmul.f32 1.442695, %v1460_v50  ;;  %v1566_v6 = vmul.f32 1.442695, %v1461_v36  ;;  %1951 = vperm.xlu1 %3062, %v4755_v48  }
 0x4a1   : > { %v2075_v1 = vpack.c.bf16 %v3193_v60, %v3185_v10  ;;  %v4806_v32 = vpop.eup %3196  ;;  %v1248_v54 = vmul.f32 1.442695, %v5491_v24  ;;  %3222 = vpow2.f32 %v1598_v46  ;;  %v1368_v13 = vpop.permute.xlu0 %1367  ;;  %1926 = vperm.xlu0 %3061, %v4737_v57   ;;  %v2076_v51 = vpack.c.bf16 %v3195_v39, %v3187_v27  ;;  %v5492_v52 = vld [vmem:[#allocation43_spill] sm:$0xff]  ;;  %v5493_v36 = vld [vmem:[#allocation44_spill] sm:$0xff] }
 0x4a2   : > { %v4812_v38 = vadd.f32 %v3195_v39, %v3193_v60  ;;  %v4814_v42 = vpop.eup %3198  ;;  %3224 = vpow2.f32 %v1564_v44  ;;  %v1462_v50 = vsub.f32 %v5492_v52, %v1368_v13  ;;  %v1463_v10 = vsub.f32 %v5493_v36, %v1368_v13  ;;  %v5497_v13 = vld [vmem:[#allocation94_spill] sm:$0xff] }
 0x4a3   : > { %v3201_v48 = vpop.eup %3200  ;;  %3226 = vpow2.f32 %v1566_v6  ;;  %2181 = vmatprep.mubr.bf16.mxu0 %v2076_v51  ;;  %v4820_v40 = vadd.f32 %v4814_v42, %v4806_v32  ;;  %v5495_v27 = vsub.f32 %v5494_v55, %v4492_v25  ;;  %v5496_v6 = vld [vmem:[#allocation93_spill] sm:$0xff] }
 0x4a4   : > { %v3203_v46 = vpop.eup %3202  ;;  %3228 = vpow2.f32 %v1238_v15  ;;  %v1568_v39 = vmul.f32 1.442695, %v1462_v50  ;;  %v1570_v24 = vmul.f32 1.442695, %v1463_v10  ;;  %2182 = vmatmul.mubr.bf16.gmra.mxu0 %v2075_v1  ;;  %1961 = vperm.xlu1 %3062, %v4761_v33   ;;  %v5498_v51 = vsub.f32 %v5496_v6, %v5497_v13  ;;  %v5499_v50 = vld [vmem:[#allocation47_spill] sm:$0xff]  ;;  %v5500_v10 = vld [vmem:[#allocation48_spill] sm:$0xff] }
 0x4a5   : > { %v1242_v60 = vmul.f32 1.442695, %v5495_v27  ;;  %v4826_v44 = vpop.eup %3204  ;;  %3230 = vpow2.f32 %v1248_v54  ;;  %v1378_v36 = vpop.permute.xlu0 %1377  ;;  %1936 = vperm.xlu0 %3061, %v4744_v28   ;;  %v2078_v15 = vpack.c.bf16 %v3203_v46, %v3191_v58  ;;  %v4832_v57 = vadd.f32 %v3203_v46, %v3201_v48 }
 0x4a6   : > { %v1252_v52 = vmul.f32 1.442695, %v5498_v51  ;;  %v4834_v25 = vpop.eup %3206  ;;  %3232 = vpow2.f32 %v1568_v39  ;;  %v1466_v1 = vsub.f32 %v5499_v50, %v1378_v36  ;;  %v1467_v55 = vsub.f32 %v5500_v10, %v1378_v36  ;;  %v5501_v39 = vld [vmem:[#allocation89_spill] sm:$0xff]  ;;  %v5504_v10 = vld [vmem:[#allocation52_spill] sm:$0xff] }
 0x4a7   : > { %v4838_v27 = vpop.eup %3208  ;;  %3234 = vpow2.f32 %v1570_v24  ;;  %2189 = vmatprep.mubr.bf16.mxu0 %v2078_v15  ;;  %v4842_v54 = vadd.f32 %v4834_v25, %v4826_v44  ;;  %v5502_v51 = vsub.f32 %v5501_v39, %v4513_v16 }
 0x4a8   : > { %v3211_v6 = vpop.eup %3210  ;;  %3236 = vpow2.f32 %v1242_v60  ;;  %v1576_v58 = vmul.f32 1.442695, %v1466_v1  ;;  %v1578_v46 = vmul.f32 1.442695, %v1467_v55  ;;  %1971 = vperm.xlu1 %3062, %v4773_v30   ;;  %v5503_v60 = vld [vmem:[#allocation51_spill] sm:$0xff]  ;;  %v2077_v30 = vpack.c.bf16 %v3201_v48, %v4792_v31 }
 0x4a9   : > { %v4845_v13 = vpop.eup %3212  ;;  %3238 = vpow2.f32 %v1252_v52  ;;  %v1246_v36 = vmul.f32 1.442695, %v5502_v51  ;;  %v1388_v50 = vpop.permute.xlu0 %1387  ;;  %1946 = vperm.xlu0 %3061, %v4751_v59   ;;  %v4852_v24 = vadd.f32 %v3211_v6, %v4838_v27 }
 0x4aa   : > { %v4854_v15 = vpop.eup %3214  ;;  %3240 = vpow2.f32 %v1576_v58  ;;  %v1470_v1 = vsub.f32 %v5503_v60, %v1388_v50  ;;  %v1471_v55 = vsub.f32 %v5504_v10, %v1388_v50  ;;  %v5505_v58 = vld [vmem:[#allocation92_spill] sm:$0xff] }
 0x4ab   : > { %v3217_v52 = vpop.eup %3216  ;;  %3242 = vpow2.f32 %v1578_v46  ;;  %v4861_v16 = vadd.f32 %v4854_v15, %v4845_v13  ;;  %v5506_v50 = vsub.f32 %v5505_v58, %v4535_v20 }
 0x4ac   : > { %v3219_v39 = vpop.eup %3218  ;;  %v1584_v51 = vmul.f32 1.442695, %v1470_v1  ;;  %v1586_v33 = vmul.f32 1.442695, %v1471_v55  ;;  %2190 = vmatmul.mubr.bf16.gmra.mxu0 %v2077_v30  ;;  %1981 = vperm.xlu1 %3062, %v4780_v2   ;;  %3244 = vpow2.f32 %v1246_v36  ;;  %v5507_v1 = vld [vmem:[#allocation55_spill] sm:$0xff]  ;;  %v5508_v55 = vld [vmem:[#allocation56_spill] sm:$0xff] }
 0x4ad   : > { %v4864_v59 = vpop.eup %3220  ;;  %v1250_v60 = vmul.f32 1.442695, %v5506_v50  ;;  %v1398_v48 = vpop.permute.xlu0 %1397  ;;  %1956 = vperm.xlu0 %3061, %v4758_v22   ;;  %v2080_v31 = vpack.c.bf16 %v3219_v39, %v3211_v6  ;;  %v4870_v46 = vadd.f32 %v3219_v39, %v3217_v52  ;;  %v5509_v39 = vld [vmem:[#allocation95_spill] sm:$0xff] }
 0x4ae   : > { %v4872_v10 = vpop.eup %3222  ;;  %3246 = vpow2.f32 %v1584_v51  ;;  %v1474_v30 = vsub.f32 %v5507_v1, %v1398_v48  ;;  %v1475_v2 = vsub.f32 %v5508_v55, %v1398_v48  ;;  %v5510_v51 = vsub.f32 %v5509_v39, %v4557_v26  ;;  %v5512_v55 = vld [vmem:[#allocation59_spill] sm:$0xff] }
 0x4af   : > { %v3225_v28 = vpop.eup %3224  ;;  %3248 = vpow2.f32 %v1586_v33  ;;  %2197 = vmatprep.mubr.bf16.mxu0 %v2080_v31  ;;  %v4878_v20 = vadd.f32 %v4872_v10, %v4864_v59 }
 0x4b0   : > { %v3227_v36 = vpop.eup %3226  ;;  %v1592_v58 = vmul.f32 1.442695, %v1474_v30  ;;  %v1594_v50 = vmul.f32 1.442695, %v1475_v2  ;;  %1991 = vperm.xlu1 %3062, %v4783_v63   ;;  %3250 = vpow2.f32 %v1250_v60  ;;  %v1254_v1 = vmul.f32 1.442695, %v5510_v51 }
 0x4b1   : > { %v4881_v6 = vpop.eup %3228  ;;  %v1408_v48 = vpop.permute.xlu0 %1407  ;;  %1966 = vperm.xlu0 %3061, %v4768_v8   ;;  %v4887_v33 = vadd.f32 %v3227_v36, %v3225_v28  ;;  %v5513_v2 = vld [vmem:[#allocation60_spill] sm:$0xff]  ;;  %v2079_v63 = vpack.c.bf16 %v3217_v52, %v4838_v27 }
 0x4b2   : > { %v4889_v31 = vpop.eup %3230  ;;  %3252 = vpow2.f32 %v1592_v58  ;;  %v1478_v30 = vsub.f32 %v5512_v55, %v1408_v48  ;;  %v1479_v22 = vsub.f32 %v5513_v2, %v1408_v48 }
 0x4b3   : > { %5511 = vst [vmem:[#allocation80_spill] sm:$0xff] %v4889_v31  ;;  %v3233_v37 = vpop.eup %3232  ;;  %3254 = vpow2.f32 %v1594_v50 }
 0x4b4   : > { %v3235_v60 = vpop.eup %3234  ;;  %v1600_v47 = vmul.f32 1.442695, %v1478_v30  ;;  %v1602_v26 = vmul.f32 1.442695, %v1479_v22  ;;  %2198 = vmatmul.mubr.bf16.gmra.mxu0 %v2079_v63  ;;  %2001 = vperm.xlu1 %3062, %v4889_v31   ;;  %3256 = vpow2.f32 %v1254_v1  ;;  %v2081_v50 = vpack.c.bf16 %v3233_v37, %v3225_v28 }
 0x4b5   : > { %v4895_v39 = vpop.eup %3236  ;;  %1976 = vperm.xlu0 %3061, %v4881_v6   ;;  %v2082_v58 = vpack.c.bf16 %v3235_v60, %v3227_v36  ;;  %v4898_v51 = vadd.f32 %v3235_v60, %v3233_v37 }
 0x4b6   : > { %v4900_v55 = vpop.eup %3238  ;;  %3258 = vpow2.f32 %v1600_v47 }
 0x4b7   : > { %5514 = vst [vmem:[#allocation81_spill] sm:$0xff] %v4900_v55  ;;  %v3241_v27 = vpop.eup %3240  ;;  %3260 = vpow2.f32 %v1602_v26  ;;  %2205 = vmatprep.mubr.bf16.mxu0 %v2082_v58 }
 0x4b8   : > { %v3243_v52 = vpop.eup %3242  ;;  %2011 = vperm.xlu1 %3062, %v4900_v55   ;;  %v2083_v37 = vpack.c.bf16 %v3241_v27, %v4806_v32 }
 0x4b9   : > { %1986 = vperm.xlu0 %3061, %v4895_v39   ;;  %v4904_v22 = vadd.f32 %v3243_v52, %v3241_v27  ;;  %v4906_v63 = vpop.eup %3244  ;;  %v2084_v36 = vpack.c.bf16 %v3243_v52, %v4814_v42 }
 0x4bb   : > { %v3247_v1 = vpop.eup %3246 }
 0x4bc   : > { %v3249_v48 = vpop.eup %3248  ;;  %2206 = vmatmul.mubr.bf16.gmra.mxu0 %v2081_v50 }
 0x4bd   : > { %2213 = vmatprep.mubr.bf16.mxu0 %v2084_v36  ;;  %1996 = vperm.xlu0 %3061, %v4906_v63   ;;  %v4910_v47 = vadd.f32 %v3249_v48, %v3247_v1  ;;  %v4912_v30 = vpop.eup %3250  ;;  %v2086_v42 = vpack.c.bf16 %v3249_v48, %v4834_v25  ;;  %v2085_v36 = vpack.c.bf16 %v3247_v1, %v4826_v44  ;;  %v1837_v44 = vld [vmem:[#allocation4] sm:$0xff]  ;;  %v1840_v1 = vld [vmem:[#allocation4 + $0x18] sm:$0xff] }
 0x4bf   : > { %v3253_v2 = vpop.eup %3252 }
 0x4c0   : > { %v3255_v60 = vpop.eup %3254  ;;  %v2087_v31 = vpack.c.bf16 %v3253_v2, %v4845_v13  ;;  %v1839_v13 = vld [vmem:[#allocation4 + $0x10] sm:$0xff] }
 0x4c1   : > { %2006 = vperm.xlu0 %3061, %v4912_v30   ;;  %v4915_v26 = vadd.f32 %v3255_v60, %v3253_v2  ;;  %v4917_v58 = vpop.eup %3256  ;;  %v2088_v55 = vpack.c.bf16 %v3255_v60, %v4854_v15 }
 0x4c3   : > { %v3259_v28 = vpop.eup %3258 }
 0x4c4   : > { %v3261_v52 = vpop.eup %3260  ;;  %2214 = vmatmul.mubr.bf16.gmra.mxu0 %v2083_v37  ;;  %v2089_v25 = vpack.c.bf16 %v3259_v28, %v4864_v59 }
 0x4c5   : > { %2221 = vmatprep.mubr.bf16.mxu0 %v2086_v42  ;;  %2016 = vperm.xlu0 %3061, %v4917_v58   ;;  %v4922_v50 = vadd.f32 %v3261_v52, %v3259_v28  ;;  %v2090_v32 = vpack.c.bf16 %v3261_v52, %v4872_v10  ;;  %v1841_v28 = vld [vmem:[#allocation4 + $0x20] sm:$0xff] }
 0x4cc   : > { %2222 = vmatmul.mubr.bf16.gmra.mxu0 %v2085_v36 }
 0x4cd   : > { %2229 = vmatprep.mubr.bf16.mxu0 %v2088_v55 }
 0x4d4   : > { %2230 = vmatmul.mubr.bf16.gmra.mxu0 %v2087_v31 }
 0x4d5   : > { %2237 = vmatprep.mubr.bf16.mxu0 %v2090_v32 }
 0x4dc   : > { %2238 = vmatmul.mubr.bf16.gmra.mxu0 %v2089_v25  ;;  %1677 = vadd.xlane.f32.xlu1 %v4579_v49 }
 0x4e0   : > { %1686 = vadd.xlane.f32.xlu1 %v4591_v4  ;;  %v5516_v4 = vld [vmem:[#allocation71_spill] sm:$0xff] }
 0x4e4   : > { %1692 = vadd.xlane.f32.xlu1 %v4599_v23  ;;  %1680 = vadd.xlane.f32.xlu0 %v4583_v45  ;;  %v5515_v45 = vld [vmem:[#allocation69_spill] sm:$0xff] }
 0x4e8   : > { %1698 = vadd.xlane.f32.xlu1 %v4607_v53  ;;  %1683 = vadd.xlane.f32.xlu0 %v4587_v0  ;;  %v1838_v53 = vld [vmem:[#allocation4 + $0x8] sm:$0xff] }
 0x4ec   : > { %1704 = vadd.xlane.f32.xlu1 %v4611_v56  ;;  %1689 = vadd.xlane.f32.xlu0 %v4595_v9 }
 0x4f0   : > { %1710 = vadd.xlane.f32.xlu1 %v4615_v5  ;;  %1695 = vadd.xlane.f32.xlu0 %v4603_v41 }
 0x4f4   : > { %1716 = vadd.xlane.f32.xlu1 %v4787_v14  ;;  %1701 = vadd.xlane.f32.xlu0 %v4609_v17 }
 0x4f7   : > { %v1413_v49 = vpop.permute.xlu1 %1412 }
 0x4f8   : > { %1722 = vadd.xlane.f32.xlu1 %v4812_v38  ;;  %1707 = vadd.xlane.f32.xlu0 %v4613_v19  ;;  %v1480_v0 = vsub.f32 %v5515_v45, %v1413_v49  ;;  %v1481_v9 = vsub.f32 %v5516_v4, %v1413_v49 }
 0x4fa   : > { %v1604_v41 = vmul.f32 1.442695, %v1480_v0  ;;  %v1606_v56 = vmul.f32 1.442695, %v1481_v9 }
 0x4fb   : > { %v1877_v23 = vpop.permute.xlu1 %1876 }
 0x4fc   : > { %1728 = vadd.xlane.f32.xlu1 %v4832_v57  ;;  %1713 = vadd.xlane.f32.xlu0 %v4771_v12  ;;  %v5517_v57 = vld [vmem:[#allocation76_spill] sm:$0xff]  ;;  %v5518_v12 = vld [vmem:[#allocation79_spill] sm:$0xff]  ;;  %v2030_v38 = vmul.f32 %v1877_v23, %v1838_v53  ;;  %3262 = vpow2.f32 %v1604_v41 }
 0x4fd   : > { %3264 = vpow2.f32 %v1606_v56 }
 0x500   : > { %1734 = vadd.xlane.f32.xlu1 %v4870_v46  ;;  %1719 = vadd.xlane.f32.xlu0 %v4795_v3  ;;  %v1882_v3 = vpop.permute.xlu1 %1881 }
 0x501   : > { %v2031_v27 = vmul.f32 %v1882_v3, %v1839_v13 }
 0x503   : > { %v2127_v17 = vpop.f32.mrf.mxu0 }
 0x504   : > { %1740 = vadd.xlane.f32.xlu1 %v4898_v51  ;;  %v1418_v19 = vpop.permute.xlu0 %1417  ;;  %1725 = vadd.xlane.f32.xlu0 %v4803_v61  ;;  %v1892_v42 = vpop.permute.xlu1 %1891 }
 0x505   : > { %v2129_v5 = vpop.f32.mrf.mxu0  ;;  %v1482_v59 = vsub.f32 %v5517_v57, %v1418_v19  ;;  %v1483_v14 = vsub.f32 %v5518_v12, %v1418_v19  ;;  %v2033_v25 = vmul.f32 %v1892_v42, %v1841_v28 }
 0x507   : > { %v1608_v15 = vmul.f32 1.442695, %v1482_v59  ;;  %v1610_v46 = vmul.f32 1.442695, %v1483_v14  ;;  %v2130_v10 = vpop.f32.mrf.mxu0  ;;  %v1844_v14 = vld [vmem:[#allocation4 + $0x38] sm:$0xff] }
 0x508   : > { %v2255_v31 = vadd.f32 %v2130_v10, %v2030_v38  ;;  %1746 = vadd.xlane.f32.xlu1 %v4904_v22  ;;  %v1872_v51 = vpop.permute.xlu0 %1871  ;;  %1731 = vadd.xlane.f32.xlu0 %v4852_v24  ;;  %v1902_v53 = vpop.permute.xlu1 %1901 }
 0x509   : > { %3266 = vpow2.f32 %v1608_v15  ;;  %v2132_v61 = vpop.f32.mrf.mxu0  ;;  %v2029_v55 = vmul.f32 %v1872_v51, %v1837_v44  ;;  %v3263_v45 = vpop.eup %3262 }
 0x50a   : > { %3268 = vpow2.f32 %v1610_v46  ;;  %2287 = vst.msk [vmem:[#allocation4 + $0x8] sm:$0xff] %vm762_vm12, %v2255_v31  ;;  %v3265_v4 = vpop.eup %3264  ;;  %v1846_v61 = vld [vmem:[#allocation4 + $0x48] sm:$0xff] }
 0x50b   : > { %v2254_v48 = vadd.f32 %v2127_v17, %v2029_v55  ;;  %v2135_v2 = vpop.f32.mrf.mxu0 }
 0x50c   : > { %v2256_v60 = vadd.f32 %v2135_v2, %v2031_v27  ;;  %1752 = vadd.xlane.f32.xlu1 %v4910_v47  ;;  %v1887_v37 = vpop.permute.xlu0 %1886  ;;  %1737 = vadd.xlane.f32.xlu0 %v4887_v33  ;;  %v1842_v47 = vld [vmem:[#allocation4 + $0x28] sm:$0xff]  ;;  %v1912_v15 = vpop.permute.xlu1 %1911 }
 0x50d   : > { %2286 = vst.msk [vmem:[#allocation4] sm:$0xff] %vm762_vm12, %v2254_v48  ;;  %v2137_v22 = vpop.f32.mrf.mxu0  ;;  %v2032_v24 = vmul.f32 %v1887_v37, %v1840_v1  ;;  %v1847_v37 = vld [vmem:[#allocation4 + $0x50] sm:$0xff] }
 0x50e   : > { %2288 = vst.msk [vmem:[#allocation4 + $0x10] sm:$0xff] %vm762_vm12, %v2256_v60 }
 0x50f   : > { %v2138_v52 = vpop.f32.mrf.mxu0 }
 0x510   : > { %v2257_v36 = vadd.f32 %v2138_v52, %v2032_v24  ;;  %1758 = vadd.xlane.f32.xlu1 %v4915_v26  ;;  %1743 = vadd.xlane.f32.xlu0 %v4820_v40  ;;  %v1897_v33 = vpop.permute.xlu0 %1896  ;;  %v1843_v26 = vld [vmem:[#allocation4 + $0x30] sm:$0xff]  ;;  %v1922_v22 = vpop.permute.xlu1 %1921 }
 0x511   : > { %v2140_v32 = vpop.f32.mrf.mxu0  ;;  %v2034_v41 = vmul.f32 %v1897_v33, %v1842_v47  ;;  %v2035_v12 = vmul.f32 %v1902_v53, %v1843_v26 }
 0x512   : > { %2289 = vst.msk [vmem:[#allocation4 + $0x18] sm:$0xff] %vm762_vm12, %v2257_v36  ;;  %v2039_v36 = vmul.f32 %v1922_v22, %v1847_v37  ;;  %v1848_v32 = vld [vmem:[#allocation4 + $0x58] sm:$0xff] }
 0x513   : > { %v2143_v49 = vpop.f32.mrf.mxu0 }
 0x514   : > { %v2258_v0 = vadd.f32 %v2143_v49, %v2033_v25  ;;  %1764 = vadd.xlane.f32.xlu1 %v4922_v50  ;;  %1749 = vadd.xlane.f32.xlu0 %v4842_v54  ;;  %v5519_v50 = vsub.f32 %v4644_v7, %v4656_v34  ;;  %v1907_v38 = vpop.permute.xlu0 %1906  ;;  %v1766_v7 = vadd.f32 %v3265_v4, %v3263_v45  ;;  %v1845_v34 = vld [vmem:[#allocation4 + $0x40] sm:$0xff] }
 0x515   : > { %v2145_v9 = vpop.f32.mrf.mxu0  ;;  %v2036_v3 = vmul.f32 %v1907_v38, %v1844_v14  ;;  %v2037_v51 = vmul.f32 %v1912_v15, %v1845_v34  ;;  %v1850_v38 = vld [vmem:[#allocation4 + $0x68] sm:$0xff]  ;;  %v1851_v34 = vld [vmem:[#allocation4 + $0x70] sm:$0xff] }
 0x516   : > { %v3267_v23 = vpop.eup %3266  ;;  %2290 = vst.msk [vmem:[#allocation4 + $0x20] sm:$0xff] %vm762_vm12, %v2258_v0  ;;  %v1256_v54 = vmul.f32 1.442695, %v5519_v50  ;;  %v1932_v0 = vpop.permute.xlu1 %1931 }
 0x517   : > { %v3269_v40 = vpop.eup %3268  ;;  %v2146_v17 = vpop.f32.mrf.mxu0  ;;  %v2091_v56 = vpack.c.bf16 %v3267_v23, %v3263_v45 }
 0x518   : > { %v2259_v19 = vadd.f32 %v2146_v17, %v2034_v41  ;;  %1755 = vadd.xlane.f32.xlu0 %v4861_v16  ;;  %v1769_v5 = vadd.f32 %v3269_v40, %v3267_v23  ;;  %v2092_v57 = vpack.c.bf16 %v3269_v40, %v3265_v4  ;;  %3270 = vpow2.f32 %v1256_v54  ;;  %v1917_v55 = vpop.permute.xlu0 %1916 }
 0x519   : > { %v2148_v59 = vpop.f32.mrf.mxu0  ;;  %v2038_v60 = vmul.f32 %v1917_v55, %v1846_v61 }
 0x51a   : > { %2291 = vst.msk [vmem:[#allocation4 + $0x28] sm:$0xff] %vm762_vm12, %v2259_v19  ;;  %1770 = vadd.xlane.f32.xlu1 %v1769_v5  ;;  %2245 = vmatprep.mubr.bf16.mxu0 %v2092_v57  ;;  %v1942_v23 = vpop.permute.xlu1 %1941  ;;  %v1849_v59 = vld [vmem:[#allocation4 + $0x60] sm:$0xff] }
 0x51b   : > { %v2151_v44 = vpop.f32.mrf.mxu0  ;;  %2246 = vmatmul.mubr.bf16.gmra.mxu0 %v2091_v56  ;;  %v2043_v61 = vmul.f32 %v1942_v23, %v1851_v34 }
 0x51c   : > { %v2260_v13 = vadd.f32 %v2151_v44, %v2035_v12  ;;  %1761 = vadd.xlane.f32.xlu0 %v4878_v20  ;;  %v5520_v20 = vsub.f32 %v4701_v62, %v4715_v11  ;;  %v1927_v25 = vpop.permute.xlu0 %1926  ;;  %v2041_v12 = vmul.f32 %v1932_v0, %v1849_v59  ;;  %v1614_v59 = vld [vmem:[#allocation6 + $0x10] sm:$0xff] }
 0x51d   : > { %v2153_v16 = vpop.f32.mrf.mxu0  ;;  %v2040_v33 = vmul.f32 %v1927_v25, %v1848_v32 }
 0x51e   : > { %2292 = vst.msk [vmem:[#allocation4 + $0x30] sm:$0xff] %vm762_vm12, %v2260_v13  ;;  %v1258_v1 = vmul.f32 1.442695, %v5520_v20  ;;  %v1952_v40 = vpop.permute.xlu1 %1951 }
 0x51f   : > { %v2154_v46 = vpop.f32.mrf.mxu0 }
 0x520   : > { %v2261_v10 = vadd.f32 %v2154_v46, %v2036_v3  ;;  %1767 = vadd.xlane.f32.xlu0 %v1766_v7  ;;  %3272 = vpow2.f32 %v1258_v1  ;;  %v1937_v41 = vpop.permute.xlu0 %1936 }
 0x521   : > { %v2156_v31 = vpop.f32.mrf.mxu0  ;;  %v2042_v7 = vmul.f32 %v1937_v41, %v1850_v38 }
 0x522   : > { %2293 = vst.msk [vmem:[#allocation4 + $0x38] sm:$0xff] %vm762_vm12, %v2261_v10  ;;  %v4987_v53 = vpop.permute.xlu1 %1961  ;;  %v1612_v31 = vld [vmem:[#allocation6] sm:$0xff] }
 0x523   : > { %v2159_v27 = vpop.f32.mrf.mxu0  ;;  %v1644_v1 = vmul.f32 %v4684_v29, %v1612_v31  ;;  %v1617_v29 = vld [vmem:[#allocation6 + $0x28] sm:$0xff] }
 0x524   : > { %v2262_v48 = vadd.f32 %v2159_v27, %v2037_v51  ;;  %v1947_v26 = vpop.permute.xlu0 %1946  ;;  %v1852_v27 = vld [vmem:[#allocation4 + $0x78] sm:$0xff]  ;;  %v1649_v23 = vmul.f32 %v4703_v35, %v1617_v29  ;;  %v5521_v35 = vld [vmem:[#allocation63_spill] sm:$0xff] }
 0x525   : > { %v2161_v2 = vpop.f32.mrf.mxu0  ;;  %v4978_v52 = vpop.eup %3270 }
 0x526   : > { %2294 = vst.msk [vmem:[#allocation4 + $0x40] sm:$0xff] %vm762_vm12, %v2262_v48  ;;  %v4989_v56 = vpop.permute.xlu1 %1971 }
 0x527   : > { %v2162_v24 = vpop.f32.mrf.mxu0 }
 0x528   : > { %v2263_v28 = vadd.f32 %v2162_v24, %v2038_v60  ;;  %v1957_v17 = vpop.permute.xlu0 %1956  ;;  %v1615_v60 = vld [vmem:[#allocation6 + $0x18] sm:$0xff]  ;;  %v2044_v24 = vmul.f32 %v1947_v26, %v1852_v27 }
 0x529   : > { %v2164_v42 = vpop.f32.mrf.mxu0 }
 0x52a   : > { %2295 = vst.msk [vmem:[#allocation4 + $0x48] sm:$0xff] %vm762_vm12, %v2263_v28  ;;  %v4993_v5 = vpop.permute.xlu1 %1981  ;;  %v1853_v28 = vld [vmem:[#allocation4 + $0x80] sm:$0xff] }
 0x52b   : > { %v2167_v62 = vpop.f32.mrf.mxu0  ;;  %2021 = vperm.xlu1 %3062, %v4978_v52  }
 0x52c   : > { %v2264_v11 = vadd.f32 %v2167_v62, %v2039_v36  ;;  %v4991_v19 = vpop.permute.xlu0 %1966  ;;  %v1647_v36 = vmul.f32 %v4693_v43, %v1615_v60 }
 0x52d   : > { %v2169_v47 = vpop.f32.mrf.mxu0  ;;  %v4984_v9 = vpop.eup %3272 }
 0x52e   : > { %2296 = vst.msk [vmem:[#allocation4 + $0x50] sm:$0xff] %vm762_vm12, %v2264_v11  ;;  %v4997_v50 = vpop.permute.xlu1 %1991  ;;  %v1613_v11 = vld [vmem:[#allocation6 + $0x8] sm:$0xff] }
 0x52f   : > { %v2170_v49 = vpop.f32.mrf.mxu0 }
 0x530   : > { %v2265_v45 = vadd.f32 %v2170_v49, %v2040_v33  ;;  %v4995_v57 = vpop.permute.xlu0 %1976  ;;  %v2045_v49 = vmul.f32 %v1952_v40, %v1853_v28  ;;  %v1855_v40 = vld [vmem:[#allocation4 + $0x90] sm:$0xff] }
 0x531   : > { %v2172_v4 = vpop.f32.mrf.mxu0 }
 0x532   : > { %2297 = vst.msk [vmem:[#allocation4 + $0x58] sm:$0xff] %vm762_vm12, %v2265_v45  ;;  %v5001_v14 = vpop.permute.xlu1 %2001  ;;  %v1854_v45 = vld [vmem:[#allocation4 + $0x88] sm:$0xff]  ;;  %v1645_v4 = vmul.f32 %v4675_v18, %v1613_v11  ;;  %v1646_v18 = vmul.f32 %v4689_v21, %v1614_v59 }
 0x533   : > { %v1625_v59 = vld [vmem:[#allocation6 + $0x68] sm:$0xff] }
 0x534   : > { %v4999_v54 = vpop.permute.xlu0 %1986 }
 0x536   : > { %2026 = vperm.xlu0 %3061, %v4984_v9   ;;  %v5006_v46 = vpop.permute.xlu1 %2011 }
 0x538   : > { %v5003_v13 = vpop.permute.xlu0 %1996 }
 0x53c   : > { %v5008_v55 = vpop.permute.xlu0 %2006 }
 0x540   : > { %v5015_v32 = vpop.permute.xlu0 %2016 }
 0x55c   : > { %v2175_v44 = vpop.f32.mrf.mxu0 }
 0x55d   : > { %v2266_v16 = vadd.f32 %v2175_v44, %v2041_v12  ;;  %v1619_v12 = vld [vmem:[#allocation6 + $0x38] sm:$0xff] }
 0x55e   : > { %v2177_v3 = vpop.f32.mrf.mxu0  ;;  %v1651_v34 = vmul.f32 %v5521_v35, %v1619_v12 }
 0x55f   : > { %2298 = vst.msk [vmem:[#allocation4 + $0x60] sm:$0xff] %vm762_vm12, %v2266_v16  ;;  %v2046_v3 = vmul.f32 %v1957_v17, %v1854_v45 }
 0x560   : > { %v2178_v15 = vpop.f32.mrf.mxu0 }
 0x561   : > { %v2267_v10 = vadd.f32 %v2178_v15, %v2042_v7 }
 0x562   : > { %v2180_v51 = vpop.f32.mrf.mxu0 }
 0x563   : > { %2299 = vst.msk [vmem:[#allocation4 + $0x68] sm:$0xff] %vm762_vm12, %v2267_v10  ;;  %v1616_v51 = vld [vmem:[#allocation6 + $0x20] sm:$0xff] }
 0x564   : > { %v2183_v20 = vpop.f32.mrf.mxu0 }
 0x565   : > { %v2268_v48 = vadd.f32 %v2183_v20, %v2043_v61  ;;  %v1678_v2 = vpop.xlane.xlu1 %1677  ;;  %v1621_v61 = vld [vmem:[#allocation6 + $0x48] sm:$0xff] }
 0x566   : > { %v2185_v37 = vpop.f32.mrf.mxu0  ;;  %v1772_v22 = vadd.f32 %v1678_v2, %v1644_v1  ;;  %v2047_v1 = vmul.f32 %v4987_v53, %v1855_v40  ;;  %v5522_v2 = vld [vmem:[#allocation61_spill] sm:$0xff]  ;;  %v5526_v40 = vld [vmem:[#allocation64_spill] sm:$0xff] }
 0x567   : > { %2300 = vst.msk [vmem:[#allocation4 + $0x70] sm:$0xff] %vm762_vm12, %v2268_v48  ;;  %v1856_v48 = vld [vmem:[#allocation4 + $0x98] sm:$0xff]  ;;  %v1648_v60 = vmul.f32 %v5522_v2, %v1616_v51  ;;  %v5523_v37 = vld [vmem:[#allocation65_spill] sm:$0xff] }
 0x568   : > { %1805 = vst.msk [vmem:[#allocation6] sm:$0xff] %vm1804_vm13, %v1772_v22  ;;  %v2186_v42 = vpop.f32.mrf.mxu0  ;;  %v1653_v22 = vmul.f32 %v5523_v37, %v1621_v61  ;;  %v2048_v29 = vmul.f32 %v4991_v19, %v1856_v48  ;;  %v1627_v51 = vld [vmem:[#allocation6 + $0x78] sm:$0xff]  ;;  %v5528_v48 = vld [vmem:[#allocation66_spill] sm:$0xff]  ;;  %v5529_v2 = vld [vmem:[#allocation73_spill] sm:$0xff] }
 0x569   : > { %v2269_v25 = vadd.f32 %v2186_v42, %v2044_v24  ;;  %v1687_v62 = vpop.xlane.xlu1 %1686 }
 0x56a   : > { %v2188_v47 = vpop.f32.mrf.mxu0  ;;  %v1775_v33 = vadd.f32 %v1687_v62, %v1647_v36  ;;  %v1618_v36 = vld [vmem:[#allocation6 + $0x30] sm:$0xff] }
 0x56b   : > { %2301 = vst.msk [vmem:[#allocation4 + $0x78] sm:$0xff] %vm762_vm12, %v2269_v25  ;;  %v1623_v25 = vld [vmem:[#allocation6 + $0x58] sm:$0xff]  ;;  %v1857_v47 = vld [vmem:[#allocation4 + $0xa0] sm:$0xff] }
 0x56c   : > { %1808 = vst.msk [vmem:[#allocation6 + $0x18] sm:$0xff] %vm1804_vm13, %v1775_v33  ;;  %v2191_v0 = vpop.f32.mrf.mxu0 }
 0x56d   : > { %v2270_v43 = vadd.f32 %v2191_v0, %v2045_v49  ;;  %v1681_v41 = vpop.xlane.xlu0 %1680  ;;  %v1693_v26 = vpop.xlane.xlu1 %1692  ;;  %v5524_v49 = vld [vmem:[#allocation62_spill] sm:$0xff]  ;;  %v5525_v0 = vld [vmem:[#allocation67_spill] sm:$0xff] }
 0x56e   : > { %v1773_v38 = vadd.f32 %v1681_v41, %v1645_v4  ;;  %v2193_v44 = vpop.f32.mrf.mxu0  ;;  %v1777_v16 = vadd.f32 %v1693_v26, %v1649_v23  ;;  %v1650_v45 = vmul.f32 %v5524_v49, %v1618_v36  ;;  %v1655_v4 = vmul.f32 %v5525_v0, %v1623_v25  ;;  %v1620_v26 = vld [vmem:[#allocation6 + $0x40] sm:$0xff] }
 0x56f   : > { %2302 = vst.msk [vmem:[#allocation4 + $0x80] sm:$0xff] %vm762_vm12, %v2270_v43  ;;  %v2049_v44 = vmul.f32 %v4989_v56, %v1857_v47 }
 0x570   : > { %1806 = vst.msk [vmem:[#allocation6 + $0x8] sm:$0xff] %vm1804_vm13, %v1773_v38  ;;  %1810 = vst.msk [vmem:[#allocation6 + $0x28] sm:$0xff] %vm1804_vm13, %v1777_v16  ;;  %v2194_v7 = vpop.f32.mrf.mxu0  ;;  %v1858_v16 = vld [vmem:[#allocation4 + $0xa8] sm:$0xff] }
 0x571   : > { %v2271_v15 = vadd.f32 %v2194_v7, %v2046_v3  ;;  %v1684_v10 = vpop.xlane.xlu0 %1683  ;;  %v1699_v31 = vpop.xlane.xlu1 %1698  ;;  %v1652_v7 = vmul.f32 %v5526_v40, %v1620_v26 }
 0x572   : > { %v1774_v27 = vadd.f32 %v1684_v10, %v1646_v18  ;;  %v2196_v20 = vpop.f32.mrf.mxu0  ;;  %v1779_v17 = vadd.f32 %v1699_v31, %v1651_v34  ;;  %v5527_v18 = vld [vmem:[#allocation70_spill] sm:$0xff]  ;;  %v1622_v31 = vld [vmem:[#allocation6 + $0x50] sm:$0xff] }
 0x573   : > { %2303 = vst.msk [vmem:[#allocation4 + $0x88] sm:$0xff] %vm762_vm12, %v2271_v15  ;;  %v1657_v35 = vmul.f32 %v5527_v18, %v1625_v59  ;;  %v2050_v20 = vmul.f32 %v4995_v57, %v1858_v16  ;;  %v1628_v18 = vld [vmem:[#allocation6 + $0x80] sm:$0xff] }
 0x574   : > { %1807 = vst.msk [vmem:[#allocation6 + $0x10] sm:$0xff] %vm1804_vm13, %v1774_v27  ;;  %1812 = vst.msk [vmem:[#allocation6 + $0x38] sm:$0xff] %vm1804_vm13, %v1779_v17  ;;  %v2199_v21 = vpop.f32.mrf.mxu0  ;;  %v1859_v17 = vld [vmem:[#allocation4 + $0xb0] sm:$0xff] }
 0x575   : > { %v2272_v24 = vadd.f32 %v2199_v21, %v2047_v1  ;;  %v1690_v28 = vpop.xlane.xlu0 %1689  ;;  %v1705_v42 = vpop.xlane.xlu1 %1704  ;;  %v1654_v21 = vmul.f32 %v5528_v48, %v1622_v31  ;;  %v1862_v31 = vld [vmem:[#allocation4 + $0xc8] sm:$0xff]  ;;  %v1635_v48 = vld [vmem:[#allocation6 + $0xb8] sm:$0xff] }
 0x576   : > { %v1776_v62 = vadd.f32 %v1690_v28, %v1648_v60  ;;  %v2201_v11 = vpop.f32.mrf.mxu0  ;;  %v1781_v53 = vadd.f32 %v1705_v42, %v1653_v22  ;;  %v1659_v60 = vmul.f32 %v5529_v2, %v1627_v51  ;;  %v1624_v28 = vld [vmem:[#allocation6 + $0x60] sm:$0xff]  ;;  %v1629_v42 = vld [vmem:[#allocation6 + $0x88] sm:$0xff] }
 0x577   : > { %2304 = vst.msk [vmem:[#allocation4 + $0x90] sm:$0xff] %vm762_vm12, %v2272_v24  ;;  %v1860_v11 = vld [vmem:[#allocation4 + $0xb8] sm:$0xff] }
 0x578   : > { %1809 = vst.msk [vmem:[#allocation6 + $0x20] sm:$0xff] %vm1804_vm13, %v1776_v62  ;;  %1814 = vst.msk [vmem:[#allocation6 + $0x48] sm:$0xff] %vm1804_vm13, %v1781_v53  ;;  %v2202_v33 = vpop.f32.mrf.mxu0  ;;  %v2051_v62 = vmul.f32 %v4993_v5, %v1859_v17  ;;  %v2052_v59 = vmul.f32 %v4999_v54, %v1860_v11 }
 0x579   : > { %v2273_v23 = vadd.f32 %v2202_v33, %v2048_v29  ;;  %v1696_v43 = vpop.xlane.xlu0 %1695  ;;  %v1711_v41 = vpop.xlane.xlu1 %1710  ;;  %v5530_v29 = vld [vmem:[#allocation68_spill] sm:$0xff]  ;;  %v5531_v33 = vld [vmem:[#allocation75_spill] sm:$0xff] }
 0x57a   : > { %v1778_v12 = vadd.f32 %v1696_v43, %v1650_v45  ;;  %v2204_v38 = vpop.f32.mrf.mxu0  ;;  %v1783_v19 = vadd.f32 %v1711_v41, %v1655_v4  ;;  %v1656_v47 = vmul.f32 %v5530_v29, %v1624_v28  ;;  %v1661_v49 = vmul.f32 %v5531_v33, %v1629_v42  ;;  %v1631_v43 = vld [vmem:[#allocation6 + $0x98] sm:$0xff] }
 0x57b   : > { %2305 = vst.msk [vmem:[#allocation4 + $0x98] sm:$0xff] %vm762_vm12, %v2273_v23  ;;  %v1626_v23 = vld [vmem:[#allocation6 + $0x70] sm:$0xff]  ;;  %v1663_v16 = vmul.f32 %v4768_v8, %v1631_v43  ;;  %v1667_v28 = vmul.f32 %v4895_v39, %v1635_v48  ;;  %v1643_v48 = vld [vmem:[#allocation6 + $0xf8] sm:$0xff] }
 0x57c   : > { %1811 = vst.msk [vmem:[#allocation6 + $0x30] sm:$0xff] %vm1804_vm13, %v1778_v12  ;;  %1816 = vst.msk [vmem:[#allocation6 + $0x58] sm:$0xff] %vm1804_vm13, %v1783_v19  ;;  %v2207_v3 = vpop.f32.mrf.mxu0  ;;  %v1861_v12 = vld [vmem:[#allocation4 + $0xc0] sm:$0xff]  ;;  %v5532_v19 = vld [vmem:[#allocation72_spill] sm:$0xff] }
 0x57d   : > { %v2274_v34 = vadd.f32 %v2207_v3, %v2049_v44  ;;  %v1702_v15 = vpop.xlane.xlu0 %1701  ;;  %v1717_v10 = vpop.xlane.xlu1 %1716  ;;  %v1658_v44 = vmul.f32 %v5532_v19, %v1626_v23  ;;  %v1634_v43 = vld [vmem:[#allocation6 + $0xb0] sm:$0xff]  ;;  %v5536_v19 = vld [vmem:[#allocation77_spill] sm:$0xff] }
 0x57e   : > { %v1780_v61 = vadd.f32 %v1702_v15, %v1652_v7  ;;  %v2209_v27 = vpop.f32.mrf.mxu0  ;;  %v1785_v56 = vadd.f32 %v1717_v10, %v1657_v35  ;;  %v1633_v35 = vld [vmem:[#allocation6 + $0xa8] sm:$0xff]  ;;  %v2053_v10 = vmul.f32 %v4997_v50, %v1861_v12  ;;  %v1865_v12 = vld [vmem:[#allocation4 + $0xe0] sm:$0xff] }
 0x57f   : > { %2306 = vst.msk [vmem:[#allocation4 + $0xa0] sm:$0xff] %vm762_vm12, %v2274_v34  ;;  %v1665_v27 = vmul.f32 %v4881_v6, %v1633_v35 }
 0x580   : > { %1813 = vst.msk [vmem:[#allocation6 + $0x40] sm:$0xff] %vm1804_vm13, %v1780_v61  ;;  %1818 = vst.msk [vmem:[#allocation6 + $0x68] sm:$0xff] %vm1804_vm13, %v1785_v56  ;;  %v2210_v1 = vpop.f32.mrf.mxu0  ;;  %v5533_v61 = vld [vmem:[#allocation74_spill] sm:$0xff] }
 0x581   : > { %v2275_v37 = vadd.f32 %v2210_v1, %v2050_v20  ;;  %v1708_v22 = vpop.xlane.xlu0 %1707  ;;  %v1723_v24 = vpop.xlane.xlu1 %1722  ;;  %v1660_v8 = vmul.f32 %v5533_v61, %v1628_v18  ;;  %v1630_v1 = vld [vmem:[#allocation6 + $0x90] sm:$0xff]  ;;  %v1641_v18 = vld [vmem:[#allocation6 + $0xe8] sm:$0xff] }
 0x582   : > { %v1782_v36 = vadd.f32 %v1708_v22, %v1654_v21  ;;  %v2212_v25 = vpop.f32.mrf.mxu0  ;;  %v1787_v57 = vadd.f32 %v1723_v24, %v1659_v60  ;;  %v2054_v60 = vmul.f32 %v5003_v13, %v1862_v31  ;;  %v5534_v24 = vld [vmem:[#allocation25_spill] sm:$0xff]  ;;  %v5537_v31 = vld [vmem:[#allocation78_spill] sm:$0xff] }
 0x583   : > { %2307 = vst.msk [vmem:[#allocation4 + $0xa8] sm:$0xff] %vm762_vm12, %v2275_v37  ;;  %v1863_v37 = vld [vmem:[#allocation4 + $0xd0] sm:$0xff]  ;;  %v1662_v6 = vmul.f32 %v5534_v24, %v1630_v1 }
 0x584   : > { %1815 = vst.msk [vmem:[#allocation6 + $0x50] sm:$0xff] %vm1804_vm13, %v1782_v36  ;;  %1820 = vst.msk [vmem:[#allocation6 + $0x78] sm:$0xff] %vm1804_vm13, %v1787_v57  ;;  %v2215_v53 = vpop.f32.mrf.mxu0  ;;  %v1632_v57 = vld [vmem:[#allocation6 + $0xa0] sm:$0xff]  ;;  %v2055_v29 = vmul.f32 %v5001_v14, %v1863_v37 }
 0x585   : > { %v2276_v45 = vadd.f32 %v2215_v53, %v2051_v62  ;;  %v1714_v0 = vpop.xlane.xlu0 %1713  ;;  %v1729_v4 = vpop.xlane.xlu1 %1728  ;;  %v1637_v62 = vld [vmem:[#allocation6 + $0xc8] sm:$0xff]  ;;  %v1640_v37 = vld [vmem:[#allocation6 + $0xe0] sm:$0xff] }
 0x586   : > { %v1784_v41 = vadd.f32 %v1714_v0, %v1656_v47  ;;  %v2217_v26 = vpop.f32.mrf.mxu0  ;;  %v1789_v5 = vadd.f32 %v1729_v4, %v1661_v49  ;;  %v1864_v47 = vld [vmem:[#allocation4 + $0xd8] sm:$0xff]  ;;  %v5535_v49 = vld [vmem:[#allocation26_spill] sm:$0xff] }
 0x587   : > { %2308 = vst.msk [vmem:[#allocation4 + $0xb0] sm:$0xff] %vm762_vm12, %v2276_v45  ;;  %v1664_v39 = vmul.f32 %v5535_v49, %v1632_v57  ;;  %v1669_v45 = vmul.f32 %v4906_v63, %v1637_v62  ;;  %v1666_v63 = vmul.f32 %v5536_v19, %v1634_v43  ;;  %v1642_v57 = vld [vmem:[#allocation6 + $0xf0] sm:$0xff] }
 0x588   : > { %1817 = vst.msk [vmem:[#allocation6 + $0x60] sm:$0xff] %vm1804_vm13, %v1784_v41  ;;  %1822 = vst.msk [vmem:[#allocation6 + $0x88] sm:$0xff] %vm1804_vm13, %v1789_v5  ;;  %v2218_v38 = vpop.f32.mrf.mxu0  ;;  %v1639_v41 = vld [vmem:[#allocation6 + $0xd8] sm:$0xff] }
 0x589   : > { %v2277_v3 = vadd.f32 %v2218_v38, %v2052_v59  ;;  %v1720_v40 = vpop.xlane.xlu0 %1719  ;;  %v1735_v7 = vpop.xlane.xlu1 %1734  ;;  %v2056_v59 = vmul.f32 %v5008_v55, %v1864_v47 }
 0x58a   : > { %v1786_v34 = vadd.f32 %v1720_v40, %v1658_v44  ;;  %v2220_v15 = vpop.f32.mrf.mxu0  ;;  %v1791_v54 = vadd.f32 %v1735_v7, %v1663_v16  ;;  %v1671_v44 = vmul.f32 %v4912_v30, %v1639_v41  ;;  %v1636_v7 = vld [vmem:[#allocation6 + $0xc0] sm:$0xff] }
 0x58b   : > { %2309 = vst.msk [vmem:[#allocation4 + $0xb8] sm:$0xff] %vm762_vm12, %v2277_v3  ;;  %v2057_v15 = vmul.f32 %v5006_v46, %v1865_v12  ;;  %v1668_v30 = vmul.f32 %v5537_v31, %v1636_v7 }
 0x58c   : > { %1819 = vst.msk [vmem:[#allocation6 + $0x70] sm:$0xff] %vm1804_vm13, %v1786_v34  ;;  %1824 = vst.msk [vmem:[#allocation6 + $0x98] sm:$0xff] %vm1804_vm13, %v1791_v54  ;;  %v2223_v51 = vpop.f32.mrf.mxu0  ;;  %v1866_v54 = vld [vmem:[#allocation4 + $0xe8] sm:$0xff] }
 0x58d   : > { %v2278_v56 = vadd.f32 %v2223_v51, %v2053_v10  ;;  %v1726_v20 = vpop.xlane.xlu0 %1725  ;;  %v1741_v17 = vpop.xlane.xlu1 %1740  ;;  %v1673_v51 = vmul.f32 %v4917_v58, %v1641_v18  ;;  %v2058_v46 = vmul.f32 %v5015_v32, %v1866_v54 }
 0x58e   : > { %v1788_v21 = vadd.f32 %v1726_v20, %v1660_v8  ;;  %v2225_v2 = vpop.f32.mrf.mxu0  ;;  %v1793_v50 = vadd.f32 %v1741_v17, %v1665_v27 }
 0x58f   : > { %2310 = vst.msk [vmem:[#allocation4 + $0xc0] sm:$0xff] %vm762_vm12, %v2278_v56  ;;  %v1638_v56 = vld [vmem:[#allocation6 + $0xd0] sm:$0xff]  ;;  %v5538_v2 = vld [vmem:[#allocation80_spill] sm:$0xff] }
 0x590   : > { %1821 = vst.msk [vmem:[#allocation6 + $0x80] sm:$0xff] %vm1804_vm13, %v1788_v21  ;;  %1826 = vst.msk [vmem:[#allocation6 + $0xa8] sm:$0xff] %vm1804_vm13, %v1793_v50  ;;  %v2226_v22 = vpop.f32.mrf.mxu0  ;;  %v1670_v50 = vmul.f32 %v5538_v2, %v1638_v56 }
 0x591   : > { %v2279_v42 = vadd.f32 %v2226_v22, %v2054_v60  ;;  %v1732_v36 = vpop.xlane.xlu0 %1731  ;;  %v1747_v25 = vpop.xlane.xlu1 %1746 }
 0x592   : > { %v1790_v11 = vadd.f32 %v1732_v36, %v1662_v6  ;;  %v2228_v53 = vpop.f32.mrf.mxu0  ;;  %v1795_v13 = vadd.f32 %v1747_v25, %v1667_v28  ;;  %v1675_v6 = vmul.f32 %v4984_v9, %v1643_v48  ;;  %v1867_v9 = vld [vmem:[#allocation4 + $0xf0] sm:$0xff] }
 0x593   : > { %2311 = vst.msk [vmem:[#allocation4 + $0xc8] sm:$0xff] %vm762_vm12, %v2279_v42  ;;  %v5539_v42 = vld [vmem:[#allocation81_spill] sm:$0xff] }
 0x594   : > { %1823 = vst.msk [vmem:[#allocation6 + $0x90] sm:$0xff] %vm1804_vm13, %v1790_v11  ;;  %1828 = vst.msk [vmem:[#allocation6 + $0xb8] sm:$0xff] %vm1804_vm13, %v1795_v13  ;;  %v2231_v33 = vpop.f32.mrf.mxu0  ;;  %v1672_v36 = vmul.f32 %v5539_v42, %v1640_v37  ;;  %v1674_v11 = vmul.f32 %v4978_v52, %v1642_v57 }
 0x595   : > { %v2280_v0 = vadd.f32 %v2231_v33, %v2055_v29  ;;  %v1738_v4 = vpop.xlane.xlu0 %1737  ;;  %v1753_v23 = vpop.xlane.xlu1 %1752  ;;  %v1868_v33 = vld [vmem:[#allocation4 + $0xf8] sm:$0xff] }
 0x596   : > { %v1792_v26 = vadd.f32 %v1738_v4, %v1664_v39  ;;  %v2233_v5 = vpop.f32.mrf.mxu0  ;;  %v1797_v14 = vadd.f32 %v1753_v23, %v1669_v45 }
 0x597   : > { %2312 = vst.msk [vmem:[#allocation4 + $0xd0] sm:$0xff] %vm762_vm12, %v2280_v0 }
 0x598   : > { %1825 = vst.msk [vmem:[#allocation6 + $0xa0] sm:$0xff] %vm1804_vm13, %v1792_v26  ;;  %1830 = vst.msk [vmem:[#allocation6 + $0xc8] sm:$0xff] %vm1804_vm13, %v1797_v14  ;;  %v2234_v38 = vpop.f32.mrf.mxu0 }
 0x599   : > { %v2281_v16 = vadd.f32 %v2234_v38, %v2056_v59  ;;  %v1744_v3 = vpop.xlane.xlu0 %1743  ;;  %v1759_v40 = vpop.xlane.xlu1 %1758 }
 0x59a   : > { %v1794_v35 = vadd.f32 %v1744_v3, %v1666_v63  ;;  %v2236_v34 = vpop.f32.mrf.mxu0  ;;  %v1799_v55 = vadd.f32 %v1759_v40, %v1671_v44 }
 0x59b   : > { %2313 = vst.msk [vmem:[#allocation4 + $0xd8] sm:$0xff] %vm762_vm12, %v2281_v16 }
 0x59c   : > { %1827 = vst.msk [vmem:[#allocation6 + $0xb0] sm:$0xff] %vm1804_vm13, %v1794_v35  ;;  %1832 = vst.msk [vmem:[#allocation6 + $0xd8] sm:$0xff] %vm1804_vm13, %v1799_v55  ;;  %v2239_v10 = vpop.f32.mrf.mxu0 }
 0x59d   : > { %v2282_v61 = vadd.f32 %v2239_v10, %v2057_v15  ;;  %v1750_v8 = vpop.xlane.xlu0 %1749  ;;  %v1765_v27 = vpop.xlane.xlu1 %1764 }
 0x59e   : > { %v1796_v20 = vadd.f32 %v1750_v8, %v1668_v30  ;;  %v2241_v17 = vpop.f32.mrf.mxu0  ;;  %v1801_v1 = vadd.f32 %v1765_v27, %v1673_v51 }
 0x59f   : > { %2314 = vst.msk [vmem:[#allocation4 + $0xe0] sm:$0xff] %vm762_vm12, %v2282_v61 }
 0x5a0   : > { %1829 = vst.msk [vmem:[#allocation6 + $0xc0] sm:$0xff] %vm1804_vm13, %v1796_v20  ;;  %1834 = vst.msk [vmem:[#allocation6 + $0xe8] sm:$0xff] %vm1804_vm13, %v1801_v1  ;;  %v2242_v21 = vpop.f32.mrf.mxu0 }
 0x5a1   : > { %v2283_v58 = vadd.f32 %v2242_v21, %v2058_v46  ;;  %v1756_v60 = vpop.xlane.xlu0 %1755 }
 0x5a2   : > { %v1798_v22 = vadd.f32 %v1756_v60, %v1670_v50  ;;  %v2244_v24 = vpop.f32.mrf.mxu0 }
 0x5a3   : > { %2315 = vst.msk [vmem:[#allocation4 + $0xe8] sm:$0xff] %vm762_vm12, %v2283_v58  ;;  %v1771_v32 = vpop.xlane.xlu1 %1770 }
 0x5a4   : > { %1831 = vst.msk [vmem:[#allocation6 + $0xd0] sm:$0xff] %vm1804_vm13, %v1798_v22  ;;  %v1803_v28 = vadd.f32 %v1771_v32, %v1675_v6 }
 0x5a5   : > { %v1762_v25 = vpop.xlane.xlu0 %1761 }
 0x5a6   : > { %1836 = vst.msk [vmem:[#allocation6 + $0xf8] sm:$0xff] %vm1804_vm13, %v1803_v28  ;;  %v1800_v62 = vadd.f32 %v1762_v25, %v1672_v36 }
 0x5a7   : > { %v2022_v29 = vpop.permute.xlu1 %2021 }
 0x5a8   : > { %1833 = vst.msk [vmem:[#allocation6 + $0xe0] sm:$0xff] %vm1804_vm13, %v1800_v62  ;;  %v2059_v47 = vmul.f32 %v2022_v29, %v1867_v9 }
 0x5a9   : > { %v1768_v53 = vpop.xlane.xlu0 %1767 }
 0x5aa   : > { %v1802_v13 = vadd.f32 %v1768_v53, %v1674_v11 }
 0x5ac   : > { %1835 = vst.msk [vmem:[#allocation6 + $0xf0] sm:$0xff] %vm1804_vm13, %v1802_v13 }
 0x5b1   : > { %v2027_v49 = vpop.permute.xlu0 %2026 }
 0x5b2   : > { %v2060_v4 = vmul.f32 %v2027_v49, %v1868_v33 }
 0x5db   : > { %v2247_v39 = vpop.f32.mrf.mxu0 }
 0x5dc   : > { %v2284_v45 = vadd.f32 %v2247_v39, %v2059_v47 }
 0x5dd   : > { %v2249_v0 = vpop.f32.mrf.mxu0 }
 0x5de   : > { %2316 = vst.msk [vmem:[#allocation4 + $0xf0] sm:$0xff] %vm762_vm12, %v2284_v45  ;;  %2353 = sbr.rel (%p2903_p8) target bundleno = 1815 (0x717), region = 52 }
 0x5df   : > { %v2250_v23 = vpop.f32.mrf.mxu0 }
 0x5e0   : > { %v2285_v43 = vadd.f32 %v2250_v23, %v2060_v4 }
 0x5e1   : > { %v2252_v41 = vpop.f32.mrf.mxu0 }
 0x5e2   : > { %2317 = vst.msk [vmem:[#allocation4 + $0xf8] sm:$0xff] %vm762_vm12, %v2285_v43 }
 0x5e3   : > { %v2356_v52 = vld [vmem:[#allocation6 + $0x10] sm:$0xff]  ;;  %v2354_v26 = vld [vmem:[#allocation6] sm:$0xff]  ;;  %v2357_v5 = vld [vmem:[#allocation6 + $0x18] sm:$0xff]  ;;  %v3544_v14 = vmov 0  }
 0x5e4   : > { %3275 = vset.pattern.permute.xlu1 %v3544_v14  ;;  %3274 = vset.pattern.permute.xlu0 %v3544_v14  ;;  %3276 = vrcp.f32 %v2356_v52  ;;  %v2355_v59 = vld [vmem:[#allocation6 + $0x8] sm:$0xff]  ;;  %v2358_v38 = vld [vmem:[#allocation6 + $0x20] sm:$0xff]  ;;  %v2361_v19 = vld [vmem:[#allocation6 + $0x38] sm:$0xff] }
 0x5e5   : > { %3278 = vrcp.f32 %v2354_v26  ;;  %v2359_v12 = vld [vmem:[#allocation6 + $0x28] sm:$0xff]  ;;  %v2360_v63 = vld [vmem:[#allocation6 + $0x30] sm:$0xff]  ;;  %v2362_v16 = vld [vmem:[#allocation6 + $0x40] sm:$0xff] }
 0x5e6   : > { %3280 = vrcp.f32 %v2357_v5  ;;  %v2363_v44 = vld [vmem:[#allocation6 + $0x48] sm:$0xff]  ;;  %v2365_v18 = vld [vmem:[#allocation6 + $0x58] sm:$0xff]  ;;  %v2364_v34 = vld [vmem:[#allocation6 + $0x50] sm:$0xff] }
 0x5e7   : > { %3282 = vrcp.f32 %v2355_v59  ;;  %v2367_v15 = vld [vmem:[#allocation6 + $0x68] sm:$0xff]  ;;  %v2366_v10 = vld [vmem:[#allocation6 + $0x60] sm:$0xff]  ;;  %v2369_v30 = vld [vmem:[#allocation6 + $0x78] sm:$0xff] }
 0x5e8   : > { %3284 = vrcp.f32 %v2359_v12  ;;  %v2368_v61 = vld [vmem:[#allocation6 + $0x70] sm:$0xff]  ;;  %v2371_v27 = vld [vmem:[#allocation6 + $0x88] sm:$0xff]  ;;  %v2370_v20 = vld [vmem:[#allocation6 + $0x80] sm:$0xff] }
 0x5e9   : > { %3286 = vrcp.f32 %v2358_v38  ;;  %v2373_v1 = vld [vmem:[#allocation6 + $0x98] sm:$0xff]  ;;  %v2372_v48 = vld [vmem:[#allocation6 + $0x90] sm:$0xff]  ;;  %v2375_v2 = vld [vmem:[#allocation6 + $0xa8] sm:$0xff] }
 0x5ea   : > { %3288 = vrcp.f32 %v2361_v19  ;;  %v2374_v58 = vld [vmem:[#allocation6 + $0xa0] sm:$0xff]  ;;  %v2377_v37 = vld [vmem:[#allocation6 + $0xb8] sm:$0xff]  ;;  %v2376_v24 = vld [vmem:[#allocation6 + $0xb0] sm:$0xff] }
 0x5eb   : > { %3290 = vrcp.f32 %v2360_v63  ;;  %v2379_v32 = vld [vmem:[#allocation6 + $0xc8] sm:$0xff]  ;;  %v2378_v42 = vld [vmem:[#allocation6 + $0xc0] sm:$0xff]  ;;  %v2381_v25 = vld [vmem:[#allocation6 + $0xd8] sm:$0xff] }
 0x5ec   : > { %3292 = vrcp.f32 %v2363_v44  ;;  %v2380_v62 = vld [vmem:[#allocation6 + $0xd0] sm:$0xff]  ;;  %v2383_v53 = vld [vmem:[#allocation6 + $0xe8] sm:$0xff]  ;;  %v2382_v9 = vld [vmem:[#allocation6 + $0xe0] sm:$0xff] }
 0x5ed   : > { %3294 = vrcp.f32 %v2362_v16  ;;  %v2385_v47 = vld [vmem:[#allocation6 + $0xf8] sm:$0xff]  ;;  %v2384_v49 = vld [vmem:[#allocation6 + $0xf0] sm:$0xff]  ;;  %v2418_v26 = vld [vmem:[#allocation4] sm:$0xff] }
 0x5ee   : > { %3296 = vrcp.f32 %v2365_v18  ;;  %v2419_v12 = vld [vmem:[#allocation4 + $0x8] sm:$0xff]  ;;  %v2420_v44 = vld [vmem:[#allocation4 + $0x10] sm:$0xff] }
 0x5ef   : > { %3298 = vrcp.f32 %v2364_v34 }
 0x5f0   : > { %3300 = vrcp.f32 %v2367_v15 }
 0x5f1   : > { %v3277_v3 = vpop.eup %3276  ;;  %3302 = vrcp.f32 %v2366_v10 }
 0x5f2   : > { %v3279_v40 = vpop.eup %3278  ;;  %2462 = vperm.xlu1 %3275, %v3277_v3   ;;  %3304 = vrcp.f32 %v2369_v30 }
 0x5f3   : > { %v3281_v7 = vpop.eup %3280  ;;  %2452 = vperm.xlu0 %3274, %v3279_v40   ;;  %3306 = vrcp.f32 %v2368_v61 }
 0x5f4   : > { %v3283_v35 = vpop.eup %3282  ;;  %3308 = vrcp.f32 %v2371_v27 }
 0x5f5   : > { %v3285_v55 = vpop.eup %3284  ;;  %3310 = vrcp.f32 %v2370_v20 }
 0x5f6   : > { %2467 = vperm.xlu1 %3275, %v3281_v7   ;;  %v3287_v54 = vpop.eup %3286  ;;  %3312 = vrcp.f32 %v2373_v1  ;;  %v2421_v7 = vld [vmem:[#allocation4 + $0x18] sm:$0xff] }
 0x5f7   : > { %2457 = vperm.xlu0 %3274, %v3283_v35   ;;  %v3289_v31 = vpop.eup %3288  ;;  %3314 = vrcp.f32 %v2372_v48 }
 0x5f8   : > { %v3291_v51 = vpop.eup %3290  ;;  %3316 = vrcp.f32 %v2375_v2  ;;  %v2434_v2 = vld [vmem:[#allocation4 + $0x80] sm:$0xff] }
 0x5f9   : > { %v3293_v8 = vpop.eup %3292  ;;  %3318 = vrcp.f32 %v2374_v58 }
 0x5fa   : > { %2477 = vperm.xlu1 %3275, %v3285_v55   ;;  %v3295_v56 = vpop.eup %3294  ;;  %3320 = vrcp.f32 %v2377_v37  ;;  %v2422_v55 = vld [vmem:[#allocation4 + $0x20] sm:$0xff]  ;;  %v2427_v37 = vld [vmem:[#allocation4 + $0x48] sm:$0xff] }
 0x5fb   : > { %2472 = vperm.xlu0 %3274, %v3287_v54   ;;  %v3297_v17 = vpop.eup %3296  ;;  %3322 = vrcp.f32 %v2376_v24 }
 0x5fc   : > { %v3299_v46 = vpop.eup %3298  ;;  %3324 = vrcp.f32 %v2379_v32 }
 0x5fd   : > { %v3301_v21 = vpop.eup %3300  ;;  %3326 = vrcp.f32 %v2378_v42  ;;  %v2436_v42 = vld [vmem:[#allocation4 + $0x90] sm:$0xff] }
 0x5fe   : > { %2487 = vperm.xlu1 %3275, %v3289_v31   ;;  %v3303_v50 = vpop.eup %3302  ;;  %3328 = vrcp.f32 %v2381_v25  ;;  %v2423_v31 = vld [vmem:[#allocation4 + $0x28] sm:$0xff] }
 0x5ff   : > { %2482 = vperm.xlu0 %3274, %v3291_v51   ;;  %v3305_v60 = vpop.eup %3304  ;;  %3330 = vrcp.f32 %v2380_v62  ;;  %v2429_v62 = vld [vmem:[#allocation4 + $0x58] sm:$0xff] }
 0x600   : > { %v3307_v22 = vpop.eup %3306  ;;  %3332 = vrcp.f32 %v2383_v53 }
 0x601   : > { %v3309_v6 = vpop.eup %3308  ;;  %3334 = vrcp.f32 %v2382_v9 }
 0x602   : > { %2497 = vperm.xlu1 %3275, %v3293_v8   ;;  %v3311_v28 = vpop.eup %3310  ;;  %3336 = vrcp.f32 %v2385_v47  ;;  %v2424_v8 = vld [vmem:[#allocation4 + $0x30] sm:$0xff]  ;;  %v2438_v47 = vld [vmem:[#allocation4 + $0xa0] sm:$0xff] }
 0x603   : > { %2492 = vperm.xlu0 %3274, %v3295_v56   ;;  %v3313_v36 = vpop.eup %3312  ;;  %3338 = vrcp.f32 %v2384_v49 }
 0x604   : > { %v3315_v57 = vpop.eup %3314 }
 0x605   : > { %v3317_v11 = vpop.eup %3316 }
 0x606   : > { %2507 = vperm.xlu1 %3275, %v3297_v17   ;;  %v3319_v13 = vpop.eup %3318  ;;  %v2425_v17 = vld [vmem:[#allocation4 + $0x38] sm:$0xff] }
 0x607   : > { %2502 = vperm.xlu0 %3274, %v3299_v46   ;;  %v3321_v29 = vpop.eup %3320 }
 0x608   : > { %v3323_v33 = vpop.eup %3322 }
 0x609   : > { %v3325_v39 = vpop.eup %3324 }
 0x60a   : > { %2517 = vperm.xlu1 %3275, %v3301_v21   ;;  %v3327_v45 = vpop.eup %3326  ;;  %v2426_v21 = vld [vmem:[#allocation4 + $0x40] sm:$0xff] }
 0x60b   : > { %2512 = vperm.xlu0 %3274, %v3303_v50   ;;  %v3329_v0 = vpop.eup %3328 }
 0x60c   : > { %v3331_v4 = vpop.eup %3330 }
 0x60d   : > { %v3333_v23 = vpop.eup %3332 }
 0x60e   : > { %2527 = vperm.xlu1 %3275, %v3305_v60   ;;  %v3335_v43 = vpop.eup %3334 }
 0x60f   : > { %2522 = vperm.xlu0 %3274, %v3307_v22   ;;  %v3337_v41 = vpop.eup %3336  ;;  %v2435_v22 = vld [vmem:[#allocation4 + $0x88] sm:$0xff] }
 0x610   : > { %v3339_v52 = vpop.eup %3338 }
 0x612   : > { %2537 = vperm.xlu1 %3275, %v3309_v6  }
 0x613   : > { %2532 = vperm.xlu0 %3274, %v3311_v28   ;;  %v2428_v28 = vld [vmem:[#allocation4 + $0x50] sm:$0xff] }
 0x616   : > { %2547 = vperm.xlu1 %3275, %v3313_v36  }
 0x617   : > { %2542 = vperm.xlu0 %3274, %v3315_v57  }
 0x61a   : > { %2557 = vperm.xlu1 %3275, %v3317_v11   ;;  %v2437_v11 = vld [vmem:[#allocation4 + $0x98] sm:$0xff] }
 0x61b   : > { %2552 = vperm.xlu0 %3274, %v3319_v13  }
 0x61e   : > { %2567 = vperm.xlu1 %3275, %v3321_v29   ;;  %v2430_v29 = vld [vmem:[#allocation4 + $0x60] sm:$0xff] }
 0x61f   : > { %2562 = vperm.xlu0 %3274, %v3323_v33  }
 0x622   : > { %2577 = vperm.xlu1 %3275, %v3325_v39  }
 0x623   : > { %2572 = vperm.xlu0 %3274, %v3327_v45   ;;  %v2431_v45 = vld [vmem:[#allocation4 + $0x68] sm:$0xff] }
 0x626   : > { %2587 = vperm.xlu1 %3275, %v3329_v0   ;;  %v2439_v0 = vld [vmem:[#allocation4 + $0xa8] sm:$0xff] }
 0x627   : > { %2582 = vperm.xlu0 %3274, %v3331_v4  }
 0x62a   : > { %2597 = vperm.xlu1 %3275, %v3333_v23  }
 0x62b   : > { %2592 = vperm.xlu0 %3274, %v3335_v43  }
 0x62e   : > { %2607 = vperm.xlu1 %3275, %v3337_v41   ;;  %v2432_v41 = vld [vmem:[#allocation4 + $0x70] sm:$0xff] }
 0x62f   : > { %2602 = vperm.xlu0 %3274, %v3339_v52   ;;  %v2440_v52 = vld [vmem:[#allocation4 + $0xb0] sm:$0xff] }
 0x66d   : > { %v2463_v5 = vpop.permute.xlu1 %2462 }
 0x66e   : > { %v2453_v14 = vpop.permute.xlu0 %2452  ;;  %v2612_v40 = vmul.f32 %v2463_v5, %v2420_v44  ;;  %v2442_v44 = vld [vmem:[#allocation4 + $0xc0] sm:$0xff] }
 0x66f   : > { %v2610_v59 = vmul.f32 %v2453_v14, %v2418_v26 }
 0x671   : > { %2643 = vxpose.xlu0.b32.start [1/16] (narrow) %v2610_v59, 16  ;;  %v2468_v38 = vpop.permute.xlu1 %2467  ;;  %v2433_v59 = vld [vmem:[#allocation4 + $0x78] sm:$0xff] }
 0x672   : > { %v2458_v19 = vpop.permute.xlu0 %2457  ;;  %v2613_v34 = vmul.f32 %v2468_v38, %v2421_v7 }
 0x673   : > { %v2611_v63 = vmul.f32 %v2458_v19, %v2419_v12  ;;  %v2441_v12 = vld [vmem:[#allocation4 + $0xb8] sm:$0xff] }
 0x675   : > { %2644 = vxpose.xlu0.b32.cont [2/16] (narrow) %v2611_v63, 16  ;;  %v2478_v16 = vpop.permute.xlu1 %2477 }
 0x676   : > { %v2473_v3 = vpop.permute.xlu0 %2472  ;;  %v2615_v61 = vmul.f32 %v2478_v16, %v2423_v31  ;;  %v2446_v31 = vld [vmem:[#allocation4 + $0xe0] sm:$0xff] }
 0x677   : > { %v2614_v10 = vmul.f32 %v2473_v3, %v2422_v55 }
 0x679   : > { %2645 = vxpose.xlu0.b32.cont [3/16] (narrow) %v2612_v40, 16  ;;  %v2488_v18 = vpop.permute.xlu1 %2487  ;;  %v2443_v40 = vld [vmem:[#allocation4 + $0xc8] sm:$0xff] }
 0x67a   : > { %v2483_v35 = vpop.permute.xlu0 %2482  ;;  %v2617_v48 = vmul.f32 %v2488_v18, %v2425_v17 }
 0x67b   : > { %v2616_v20 = vmul.f32 %v2483_v35, %v2424_v8  ;;  %v2444_v35 = vld [vmem:[#allocation4 + $0xd0] sm:$0xff] }
 0x67d   : > { %2646 = vxpose.xlu0.b32.cont [4/16] (narrow) %v2613_v34, 16  ;;  %v2498_v15 = vpop.permute.xlu1 %2497 }
 0x67e   : > { %v2493_v54 = vpop.permute.xlu0 %2492  ;;  %v2619_v6 = vmul.f32 %v2498_v15, %v2427_v37  ;;  %v2445_v15 = vld [vmem:[#allocation4 + $0xd8] sm:$0xff]  ;;  %v2714_v37 = vld [vmem:[#allocation2 + $0x18] sm:$0xff] }
 0x67f   : > { %v2618_v58 = vmul.f32 %v2493_v54, %v2426_v21  ;;  %v2707_v21 = vstv %s2642_s23 }
 0x681   : > { %2647 = vxpose.xlu0.b32.cont [5/16] (narrow) %v2614_v10, 16  ;;  %v2508_v30 = vpop.permute.xlu1 %2507 }
 0x682   : > { %v2503_v51 = vpop.permute.xlu0 %2502  ;;  %v2621_v13 = vmul.f32 %v2508_v30, %v2429_v62 }
 0x683   : > { %v2620_v25 = vmul.f32 %v2503_v51, %v2428_v28 }
 0x685   : > { %2648 = vxpose.xlu0.b32.cont [6/16] (narrow) %v2615_v61, 16  ;;  %v2518_v27 = vpop.permute.xlu1 %2517  ;;  %v2447_v61 = vld [vmem:[#allocation4 + $0xe8] sm:$0xff] }
 0x686   : > { %v2513_v56 = vpop.permute.xlu0 %2512  ;;  %v2623_v23 = vmul.f32 %v2518_v27, %v2431_v45 }
 0x687   : > { %v2622_v49 = vmul.f32 %v2513_v56, %v2430_v29  ;;  %v2448_v56 = vld [vmem:[#allocation4 + $0xf0] sm:$0xff] }
 0x689   : > { %2649 = vxpose.xlu0.b32.cont [7/16] (narrow) %v2616_v20, 16  ;;  %v2528_v1 = vpop.permute.xlu1 %2527 }
 0x68a   : > { %v2523_v46 = vpop.permute.xlu0 %2522  ;;  %v2625_v19 = vmul.f32 %v2528_v1, %v2433_v59  ;;  %v2449_v1 = vld [vmem:[#allocation4 + $0xf8] sm:$0xff] }
 0x68b   : > { %v2624_v5 = vmul.f32 %v2523_v46, %v2432_v41 }
 0x68d   : > { %2650 = vxpose.xlu0.b32.cont [8/16] (narrow) %v2617_v48, 16  ;;  %v2538_v24 = vpop.permute.xlu1 %2537 }
 0x68e   : > { %v2533_v50 = vpop.permute.xlu0 %2532  ;;  %v2627_v32 = vmul.f32 %v2538_v24, %v2435_v22 }
 0x68f   : > { %v2626_v60 = vmul.f32 %v2533_v50, %v2434_v2  ;;  %v2712_v2 = vld [vmem:[#allocation2 + $0x10] sm:$0xff] }
 0x691   : > { %2651 = vxpose.xlu0.b32.cont [9/16] (narrow) %v2618_v58, 16  ;;  %2675 = vxpose.xlu1.b32.start [1/16] (narrow) %v2626_v60, 16  ;;  %v2548_v53 = vpop.permute.xlu1 %2547 }
 0x692   : > { %v2543_v36 = vpop.permute.xlu0 %2542  ;;  %v2629_v9 = vmul.f32 %v2548_v53, %v2437_v11 }
 0x693   : > { %v2628_v57 = vmul.f32 %v2543_v36, %v2436_v42 }
 0x695   : > { %2652 = vxpose.xlu0.b32.cont [10/16] (narrow) %v2619_v6, 16  ;;  %2676 = vxpose.xlu1.b32.cont [2/16] (narrow) %v2627_v32, 16  ;;  %v2558_v4 = vpop.permute.xlu1 %2557  ;;  %v2713_v32 = vld [vmem:[#allocation2] sm:$0xff] }
 0x696   : > { %v2553_v33 = vpop.permute.xlu0 %2552  ;;  %v2631_v43 = vmul.f32 %v2558_v4, %v2439_v0 }
 0x697   : > { %v2630_v39 = vmul.f32 %v2553_v33, %v2438_v47 }
 0x699   : > { %2653 = vxpose.xlu0.b32.cont [11/16] (narrow) %v2620_v25, 16  ;;  %2677 = vxpose.xlu1.b32.cont [3/16] (narrow) %v2628_v57, 16  ;;  %v2568_v38 = vpop.permute.xlu1 %2567  ;;  %v2715_v25 = vld [vmem:[#allocation2 + $0x8] sm:$0xff] }
 0x69a   : > { %v2563_v26 = vpop.permute.xlu0 %2562  ;;  %v2633_v63 = vmul.f32 %v2568_v38, %v2441_v12 }
 0x69b   : > { %v2632_v14 = vmul.f32 %v2563_v26, %v2440_v52 }
 0x69d   : > { %2654 = vxpose.xlu0.b32.cont [12/16] (narrow) %v2621_v13, 16  ;;  %2678 = vxpose.xlu1.b32.cont [4/16] (narrow) %v2629_v9, 16  ;;  %v2578_v7 = vpop.permute.xlu1 %2577 }
 0x69e   : > { %v2573_v16 = vpop.permute.xlu0 %2572  ;;  %v2635_v18 = vmul.f32 %v2578_v7, %v2443_v40 }
 0x69f   : > { %v2634_v3 = vmul.f32 %v2573_v16, %v2442_v44 }
 0x6a1   : > { %2655 = vxpose.xlu0.b32.cont [13/16] (narrow) %v2622_v49, 16  ;;  %2679 = vxpose.xlu1.b32.cont [5/16] (narrow) %v2630_v39, 16  ;;  %v2588_v54 = vpop.permute.xlu1 %2587 }
 0x6a2   : > { %v2583_v34 = vpop.permute.xlu0 %2582  ;;  %v2637_v10 = vmul.f32 %v2588_v54, %v2445_v15 }
 0x6a3   : > { %v2636_v55 = vmul.f32 %v2583_v34, %v2444_v35 }
 0x6a5   : > { %2656 = vxpose.xlu0.b32.cont [14/16] (narrow) %v2623_v23, 16  ;;  %2680 = vxpose.xlu1.b32.cont [6/16] (narrow) %v2631_v43, 16  ;;  %v2598_v8 = vpop.permute.xlu1 %2597 }
 0x6a6   : > { %v2593_v30 = vpop.permute.xlu0 %2592  ;;  %v2639_v27 = vmul.f32 %v2598_v8, %v2447_v61 }
 0x6a7   : > { %v2638_v51 = vmul.f32 %v2593_v30, %v2446_v31 }
 0x6a9   : > { %2657 = vxpose.xlu0.b32.cont [15/16] (narrow) %v2624_v5, 16  ;;  %2681 = vxpose.xlu1.b32.cont [7/16] (narrow) %v2632_v14, 16  ;;  %v2608_v46 = vpop.permute.xlu1 %2607 }
 0x6aa   : > { %v2603_v20 = vpop.permute.xlu0 %2602  ;;  %v2641_v48 = vmul.f32 %v2608_v46, %v2449_v1 }
 0x6ab   : > { %v2640_v17 = vmul.f32 %v2603_v20, %v2448_v56 }
 0x6ad   : > { %2658 = vxpose.xlu0.b32.end [16/16] (narrow) %v2625_v19, 16  ;;  %2682 = vxpose.xlu1.b32.cont [8/16] (narrow) %v2633_v63, 16 }
 0x6b1   : > { %2683 = vxpose.xlu1.b32.cont [9/16] (narrow) %v2634_v3, 16 }
 0x6b5   : > { %2684 = vxpose.xlu1.b32.cont [10/16] (narrow) %v2635_v18, 16 }
 0x6b9   : > { %2685 = vxpose.xlu1.b32.cont [11/16] (narrow) %v2636_v55, 16 }
 0x6bd   : > { %2686 = vxpose.xlu1.b32.cont [12/16] (narrow) %v2637_v10, 16 }
 0x6c1   : > { %2687 = vxpose.xlu1.b32.cont [13/16] (narrow) %v2638_v51, 16 }
 0x6c5   : > { %2688 = vxpose.xlu1.b32.cont [14/16] (narrow) %v2639_v27, 16 }
 0x6c9   : > { %2689 = vxpose.xlu1.b32.cont [15/16] (narrow) %v2640_v17, 16 }
 0x6cd   : > { %2690 = vxpose.xlu1.b32.end [16/16] (narrow) %v2641_v48, 16 }
 0x6ed   : > { %v2659_v50 = vpop.trf.xlu0 }
 0x6ee   : > { %v2708_v58 = vmul.f32 %v2707_v21, %v2659_v50 }
 0x6f0   : > { %v2716_v60 = vadd.f32 %v2712_v2, %v2708_v58 }
 0x6f1   : > { %v2660_v22 = vpop.trf.xlu0 }
 0x6f2   : > { %2720 = vst [vmem:[%s3802_s1] sm:$0xff] %v2716_v60  ;;  %v2710_v24 = vmul.f32 %v2707_v21, %v2660_v22 }
 0x6f4   : > { %v2718_v6 = vadd.f32 %v2714_v37, %v2710_v24 }
 0x6f6   : > { %2722 = vst [vmem:[%s3802_s1 + $0x10] sm:$0xff] %v2718_v6 }
 0x70d   : > { %v2691_v28 = vpop.trf.xlu1 }
 0x70e   : > { %v2709_v42 = vmul.f32 %v2707_v21, %v2691_v28 }
 0x710   : > { %v2717_v36 = vadd.f32 %v2713_v32, %v2709_v42 }
 0x711   : > { %v2692_v57 = vpop.trf.xlu1 }
 0x712   : > { %2721 = vst [vmem:[%s3802_s1 + $0x8] sm:$0xff] %v2717_v36  ;;  %v2711_v62 = vmul.f32 %v2707_v21, %v2692_v57 }
 0x714   : > { %v2719_v11 = vadd.f32 %v2715_v25, %v2711_v62 }
 0x716   : > { %2723 = vst [vmem:[%s3802_s1 + $0x18] sm:$0xff] %v2719_v11 }
 0x717 PF: > { %s5540_s13 = sld [smem:[#allocation18_spill]]  ;;  %s2905_s20 = sshll.u32 %s3516_s0, 1 }
 0x718   : > { %s5541_s26 = sld [smem:[#allocation21_spill]]  ;;  %s2740_s12 = sshll.u32 %s3802_s1, 4  ;;  %s5115_s12 = int_to_ptr.vmem [resolvable:$true] %s2740_s12 }
 0x719   : > { %s5542_s4 = sld [smem:[#allocation97_spill]]  ;;  %s2725_s16 = scalar_lea.sflag [#allocation10], %s3775_s11 }
 0x71a   : > { %s3396_s17 = scalar_lea.vmem %s5115_s12, 512  ;;  %s3545_s0 = smov [#allocation13]  }
 0x71b   : > { %p3397_p1 = scmp.ne.s32.totalorder %s5115_s12, %s3396_s17  ;;  %s3400_s7 = sshll.u32 %s3545_s0, 4  ;;  %s3401_s7 = int_to_ptr.vmem [resolvable:$false] %s3400_s7 }
 0x71c   : > { %s3402_s10 = scalar_lea.vmem %s3401_s7, 1024  ;;  %p3403_p9 = scmp.lt.s32.totalorder %s5115_s12, %s3401_s7 }
 0x71d   : > { %s2906_s6 = sshll.u32 %s5540_s13, 3  ;;  %p3404_p10 = scmp.lt.s32.totalorder %s3402_s10, %s3396_s17 }
 0x71e   : > { %s2737_s29 = sadd.s32 %s2906_s6, %s2905_s20  ;;  %p5543_p13 = scmp.ne.s32.totalorder %s5541_s26, 0 }
 0x71f   : > { %s2907_s14 = sshll.u32 %s2737_s29, 7  ;;  %p3405_p0 = por %p3404_p10, %p3403_p9 }
 0x720   : > { %s5120_s9 = scalar_lea.hbm %s5542_s4, %s2907_s14  ;;  %p3398_p3 = pnand %p3397_p1, %p5543_p13 }
 0x722   : > { %p3399_p6 = pneg %p3398_p3 }
 0x724   : > { %p3406_p11 = pnand %p3405_p0, %p3399_p6 }
 0x726   : > { %3409 = shalt.err (!%p3406_p11)
}
 0x727   : > { %s3410_s25 = scalar_lea.hbm %s5120_s9, 512  ;;  %s3414_s13 = scalar_lea.hbm %s5542_s4, 2048 }
 0x728   : > { %p3411_p12 = scmp.ne.s32.totalorder %s5120_s9, %s3410_s25  ;;  %p3415_p5 = scmp.lt.s32.totalorder %s5120_s9, %s5542_s4 }
 0x729   : > { %p3416_p7 = scmp.lt.s32.totalorder %s3414_s13, %s3410_s25 }
 0x72a   : > { %p3412_p2 = pnand %p3411_p12, %p5543_p13 }
 0x72b   : > { %p3417_p8 = por %p3416_p7, %p3415_p5 }
 0x72c   : > { %p3413_p4 = pneg %p3412_p2 }
 0x72e   : > { %p3418_p1 = pnand %p3417_p8, %p3413_p4 }
 0x730   : > { %3421 = shalt.err (!%p3418_p1)
}
 0x731   : > { %s3546_s29 = smov 256   ;;  %s3547_s14 = smov 512  }
 0x732   : > { %s3548_s24 = smov 16  }
 0x733   : > { %2918 = dma.vmem_to_hbm [thread:$0]  (%p5543_p13), %s5115_s12, 512, %s5120_s9, %s2725_s16, %s3546_s29, %s3547_s14, %s3548_s24  }
 0x734 PF: > { %s5544_s5 = sld [smem:[#allocation17_spill]]  ;;  %p2932_p3 = scmp.ge.s32.totalorder %s3536_s28, 2 }
 0x735   : > { %s5545_s17 = sld [smem:[#allocation22_spill]] }
 0x73a   : > { %s2755_s0 = sand.u32 1, %s5544_s5  }
 0x73b   : > { %p5546_p6 = scmp.ne.s32.totalorder %s5545_s17, 0  ;;  %s2756_s7 = scalar_lea.sflag [#allocation10], %s2755_s0 }
 0x73d   : > { %p2928_p9 = pnand %p2932_p3, %p5546_p6 }
 0x73f   : > { %p2929_p10 = pneg %p2928_p9 }
 0x741   : > { %3483 = dma.done.wait (%p2929_p10), %s2756_s7, 512  }
 0x742   : > { %3485 = vsyncadd (%p2929_p10), %s2756_s7, 4294966784  ;;  %s24_s28 = sadd.s32 1, %s3536_s28   ;;  %s5548_s23 = sld [smem:[#allocation19_spill]] }
 0x743   : > { %p5150_p0 = scmp.ge.s32.totalorder %s24_s28, 10   ;;  %s5549_s0 = sld [smem:[#allocation20_spill]] }
 0x744   : > { %s5550_s25 = sld [smem:[#allocation23_spill]]  ;;  %s5552_s17 = smov %s3492_s18 }
 0x745   : > { %s5551_s26 = sld [smem:[#allocation24_spill]]  ;;  %s5553_s18 = smov %s3496_s19 }
 0x746   : > { %s5554_s19 = smov %s3766_s15  ;;  %s5555_s20 = smov %s3504_s21 }
 0x747   : > { %s5556_s21 = smov %s3508_s22  ;;  %s5557_s22 = smov %s3761_s8 }
 0x748   : > { %s5558_s24 = smov %s3532_s27  ;;  %s5559_s27 = smov %s5569_s30 }
 0x749   :  { %23 = sbr.rel (!%p5150_p0) target bundleno = 16 (0x10), region = 102 }
 0x74e   :  { %2761 = vsyncpa [#allocation9], 1 }
 0x74f   :  { %2763 = vsyncpa [#allocation9 + $0x1], 1 }
 0x750   :  { %2764 = vsyncpa [#allocation12], 1 }
 0x751   :  { %2766 = vsyncpa [#allocation12 + $0x1], 1 }
 0x752   :  { %2767 = vsyncpa [#allocation10], 1 }
 0x753   :  { %2769 = vsyncpa [#allocation10 + $0x1], 1 }

</bundles_post_ra>
